<compile_context>
chip_gen: v6e
topology: v6e:2x2x1
jax: 0.10.0
libtpu: 0.0.40
codegen_flags: <defaults>
</compile_context>

<pallas_src>
import functools
import math

import jax
import jax.numpy as jnp
from jax import lax
from jax.experimental import pallas as pl
from jax.experimental.pallas import tpu as pltpu

# ---------------- hyperparameters (small, consistent with the module) ----------------
D_MODEL = 32
D_FF = 64
D_K = 8
D_V = 8
N_HEADS = 4
N_LAYERS = 2
SRC_VOCAB = 16
TGT_VOCAB = 16
LN_EPS = 1e-5                 # torch nn.LayerNorm default
MASK_FILL = -1000000000.0     # masked_fill_(-1e9)

HK = N_HEADS * D_K            # 32  (width of the Q block and of the K block)
HV = N_HEADS * D_V            # 32  (width of the V block / fc input)
QKV_W = 2 * HK + HV           # 96  (concatenated W_Q | W_K | W_V)


# ---------------- in-kernel helpers ----------------
def _layernorm(y, eps):
    """LayerNorm over last dim, gamma=1 / beta=0 (fresh nn.LayerNorm), float32 math."""
    mean = jnp.mean(y, axis=-1, keepdims=True)
    var = jnp.mean(jnp.square(y - mean), axis=-1, keepdims=True)
    return (y - mean) * lax.rsqrt(var + eps)


def _heads_attention(q, k_all, v_all, masked, wfc_ref, layer, attn_ref):
    """All-heads scaled-dot-product attention + output projection, fully in VMEM.

    q:       [Lq, H*dk] f32    k_all: [Lk, H*dk] f32    v_all: [Lk, H*dv] f32
    masked:  [Lq, Lk] bool (True where masked), hoisted by the caller
    wfc_ref: [n_layers, H, dv, d_model] bf16 ref (output projection, per-head blocks)
    attn_ref:[1, H, Lq, Lk] output ref (attention probabilities, kept for the module's return)
    returns: fc(context)  [Lq, d_model] f32  (pre-residual, pre-LN)
    """
    scale = 1.0 / math.sqrt(D_K)
    out = None
    for h in range(N_HEADS):                                # static, unrolled
        qh = q[:, h * D_K:(h + 1) * D_K]                    # [Lq, dk]
        kh = k_all[:, h * D_K:(h + 1) * D_K]                # [Lk, dk]
        vh = v_all[:, h * D_V:(h + 1) * D_V]                # [Lk, dv]
        s = lax.dot_general(qh.astype(jnp.bfloat16), kh.astype(jnp.bfloat16),
                            (((1,), (1,)), ((), ())),
                            preferred_element_type=jnp.float32) * scale
        s = jnp.where(masked, MASK_FILL, s)
        s = s - jnp.max(s, axis=-1, keepdims=True)
        e = jnp.exp(s)
        p = e * pl.reciprocal(jnp.sum(e, axis=-1, keepdims=True), approx=True)
        attn_ref[0, h] = p
        ctx = jnp.dot(p.astype(jnp.bfloat16), vh.astype(jnp.bfloat16),
                      preferred_element_type=jnp.float32)               # [Lq, dv]
        # ctx @ W_fc == sum_h ctx_h @ W_fc[h]  -> accumulate output projection per head
        part = jnp.dot(ctx.astype(jnp.bfloat16), wfc_ref[layer, h],
                       preferred_element_type=jnp.float32)              # [Lq, d_model]
        out = part if out is None else out + part
    return out


# ---------------- fused stack kernels ----------------
def _encoder_kernel(x_ref, mask_ref, wqkv_ref, wfc_ref, w1_ref, w2_ref,
                    o_ref, *attn_refs, eps):
    """Entire encoder stack for one batch element, fully resident in VMEM."""
    x = x_ref[0]                                            # [L, d_model] f32
    masked = mask_ref[0] > 0                                # hoisted: reused by every layer/head
    for layer in range(N_LAYERS):                           # static, unrolled
        # --- self-attention block ---
        qkv = jnp.dot(x.astype(jnp.bfloat16), wqkv_ref[layer],
                      preferred_element_type=jnp.float32)   # [L, 3*H*dk]
        q = qkv[:, :HK]
        k_all = qkv[:, HK:2 * HK]
        v_all = qkv[:, 2 * HK:]
        out = _heads_attention(q, k_all, v_all, masked, wfc_ref, layer, attn_refs[layer])
        x = _layernorm(out + x, eps)
        # --- position-wise FFN block ---
        h = jnp.maximum(jnp.dot(x.astype(jnp.bfloat16), w1_ref[layer],
                                preferred_element_type=jnp.float32), 0.0)
        ff = jnp.dot(h.astype(jnp.bfloat16), w2_ref[layer],
                     preferred_element_type=jnp.float32)
        x = _layernorm(ff + x, eps)
    o_ref[0] = x


def _decoder_kernel(x_ref, enc_ref, smask_ref, cmask_ref,
                    s_wqkv_ref, s_wfc_ref, c_wq_ref, c_wkv_ref, c_wfc_ref,
                    w1_ref, w2_ref, proj_ref,
                    logits_ref, *attn_refs, eps):
    """Entire decoder stack + final vocab projection for one batch element."""
    x = x_ref[0]                                            # [Lt, d_model] f32
    enc = enc_ref[0].astype(jnp.bfloat16)                   # cast once, reused by all cross-attn
    smasked = smask_ref[0] > 0
    cmasked = cmask_ref[0] > 0
    self_attn_refs = attn_refs[:N_LAYERS]
    cross_attn_refs = attn_refs[N_LAYERS:]
    for layer in range(N_LAYERS):                           # static, unrolled
        # --- masked self-attention ---
        qkv = jnp.dot(x.astype(jnp.bfloat16), s_wqkv_ref[layer],
                      preferred_element_type=jnp.float32)
        q = qkv[:, :HK]
        k_all = qkv[:, HK:2 * HK]
        v_all = qkv[:, 2 * HK:]
        out = _heads_attention(q, k_all, v_all, smasked, s_wfc_ref, layer,
                               self_attn_refs[layer])
        x = _layernorm(out + x, eps)
        # --- encoder-decoder cross-attention (fused KV matmul on the encoder stream) ---
        q = jnp.dot(x.astype(jnp.bfloat16), c_wq_ref[layer],
                    preferred_element_type=jnp.float32)     # [Lt, H*dk]
        kv = jnp.dot(enc, c_wkv_ref[layer],
                     preferred_element_type=jnp.float32)    # [Ls, H*dk + H*dv]
        k_all = kv[:, :HK]
        v_all = kv[:, HK:]
        out = _heads_attention(q, k_all, v_all, cmasked, c_wfc_ref, layer,
                               cross_attn_refs[layer])
        x = _layernorm(out + x, eps)
        # --- position-wise FFN ---
        h = jnp.maximum(jnp.dot(x.astype(jnp.bfloat16), w1_ref[layer],
                                preferred_element_type=jnp.float32), 0.0)
        ff = jnp.dot(h.astype(jnp.bfloat16), w2_ref[layer],
                     preferred_element_type=jnp.float32)
        x = _layernorm(ff + x, eps)
    # --- final projection to vocab (fused; avoids a third launch) ---
    logits_ref[0] = jnp.dot(x.astype(jnp.bfloat16), proj_ref[...],
                            preferred_element_type=jnp.float32)


# ---------------- pallas_call wrappers ----------------
def encoder_stack(p, x, mask_i32):
    """x: [B, L, dm] f32; mask: [B, L, L] int32 -> (enc_out [B,L,dm], [attn_l0, attn_l1, ...])."""
    b, l, dm = x.shape
    out_shape = tuple(
        [jax.ShapeDtypeStruct((b, l, dm), jnp.float32)] +
        [jax.ShapeDtypeStruct((b, N_HEADS, l, l), jnp.float32)] * N_LAYERS)
    out_specs = tuple(
        [pl.BlockSpec((1, l, dm), lambda i: (i, 0, 0))] +
        [pl.BlockSpec((1, N_HEADS, l, l), lambda i: (i, 0, 0, 0))] * N_LAYERS)
    outs = pl.pallas_call(
        functools.partial(_encoder_kernel, eps=LN_EPS),
        out_shape=out_shape,
        grid=(b,),
        in_specs=[pl.BlockSpec((1, l, dm), lambda i: (i, 0, 0)),
                  pl.BlockSpec((1, l, l), lambda i: (i, 0, 0)),
                  pl.BlockSpec((N_LAYERS, dm, QKV_W), lambda i: (0, 0, 0)),
                  pl.BlockSpec((N_LAYERS, N_HEADS, D_V, dm), lambda i: (0, 0, 0, 0)),
                  pl.BlockSpec((N_LAYERS, dm, D_FF), lambda i: (0, 0, 0)),
                  pl.BlockSpec((N_LAYERS, D_FF, dm), lambda i: (0, 0, 0))],
        out_specs=out_specs,
        compiler_params=pltpu.CompilerParams(dimension_semantics=("parallel",)),
    )(x, mask_i32, p["w_qkv"], p["w_fc"], p["ffn_w1"], p["ffn_w2"])
    return outs[0], list(outs[1:])


def decoder_stack(p, x, enc_out, self_mask_i32, cross_mask_i32, proj_w):
    """x: [B, Lt, dm]; enc_out: [B, Ls, dm]; masks int32 -> (logits [B*Lt, V], self_attns, enc_attns)."""
    b, lt, dm = x.shape
    ls = enc_out.shape[1]
    v = proj_w.shape[1]
    out_shape = tuple(
        [jax.ShapeDtypeStruct((b, lt, v), jnp.float32)] +
        [jax.ShapeDtypeStruct((b, N_HEADS, lt, lt), jnp.float32)] * N_LAYERS +
        [jax.ShapeDtypeStruct((b, N_HEADS, lt, ls), jnp.float32)] * N_LAYERS)
    out_specs = tuple(
        [pl.BlockSpec((1, lt, v), lambda i: (i, 0, 0))] +
        [pl.BlockSpec((1, N_HEADS, lt, lt), lambda i: (i, 0, 0, 0))] * N_LAYERS +
        [pl.BlockSpec((1, N_HEADS, lt, ls), lambda i: (i, 0, 0, 0))] * N_LAYERS)
    outs = pl.pallas_call(
        functools.partial(_decoder_kernel, eps=LN_EPS),
        out_shape=out_shape,
        grid=(b,),
        in_specs=[pl.BlockSpec((1, lt, dm), lambda i: (i, 0, 0)),
                  pl.BlockSpec((1, ls, dm), lambda i: (i, 0, 0)),
                  pl.BlockSpec((1, lt, lt), lambda i: (i, 0, 0)),
                  pl.BlockSpec((1, lt, ls), lambda i: (i, 0, 0)),
                  pl.BlockSpec((N_LAYERS, dm, QKV_W), lambda i: (0, 0, 0)),
                  pl.BlockSpec((N_LAYERS, N_HEADS, D_V, dm), lambda i: (0, 0, 0, 0)),
                  pl.BlockSpec((N_LAYERS, dm, HK), lambda i: (0, 0, 0)),
                  pl.BlockSpec((N_LAYERS, dm, HK + HV), lambda i: (0, 0, 0)),
                  pl.BlockSpec((N_LAYERS, N_HEADS, D_V, dm), lambda i: (0, 0, 0, 0)),
                  pl.BlockSpec((N_LAYERS, dm, D_FF), lambda i: (0, 0, 0)),
                  pl.BlockSpec((N_LAYERS, D_FF, dm), lambda i: (0, 0, 0)),
                  pl.BlockSpec((dm, v), lambda i: (0, 0))],
        out_specs=out_specs,
        compiler_params=pltpu.CompilerParams(dimension_semantics=("parallel",)),
    )(x, enc_out, self_mask_i32, cross_mask_i32,
      p["self_w_qkv"], p["self_w_fc"], p["cross_w_q"], p["cross_w_kv"], p["cross_w_fc"],
      p["ffn_w1"], p["ffn_w2"], proj_w)
    logits = outs[0].reshape(b * lt, v)                     # dec_logits.view(-1, tgt_vocab_size)
    dec_self_attns = list(outs[1:1 + N_LAYERS])
    dec_enc_attns = list(outs[1 + N_LAYERS:])
    return logits, dec_self_attns, dec_enc_attns


# ---------------- glue (plain JAX) ----------------
def get_atten_pad_mask(seq_q, seq_k):
    b, lq = seq_q.shape
    lk = seq_k.shape[1]
    pad = (seq_k == 0)[:, None, :]
    return jnp.broadcast_to(pad, (b, lq, lk))


def get_atten_subsequence_mask(seq):
    b, l = seq.shape
    sub = jnp.triu(jnp.ones((l, l), dtype=jnp.int32), k=1)
    return jnp.broadcast_to(sub[None], (b, l, l))


def positional_encoding(seq_len, d_model):
    pos = jnp.arange(seq_len, dtype=jnp.float32)[:, None]
    div = jnp.exp(jnp.arange(0, d_model, 2, dtype=jnp.float32) * (-math.log(10000.0) / d_model))
    pe = jnp.zeros((seq_len, d_model), jnp.float32)
    pe = pe.at[:, 0::2].set(jnp.sin(pos * div))
    pe = pe.at[:, 1::2].set(jnp.cos(pos * div))
    return pe


# ---------------- parameters (deterministic synthetic init, MXU weights stored bf16, stacked per layer) ----------------
def init_params(key):
    state = {"key": key}

    def nxt():
        state["key"], sub = jax.random.split(state["key"])
        return sub

    def dense(shape, scale=0.1, dtype=jnp.bfloat16):
        return (scale * jax.random.normal(nxt(), shape, jnp.float32)).astype(dtype)

    def stack(maker):
        return jnp.stack([maker() for _ in range(N_LAYERS)], axis=0)

    def fc_weight():
        # output projection stored per-head [H, d_v, d_model] so the kernel accumulates
        # ctx_h @ W_fc[h] without any lane concatenation of the per-head contexts.
        return dense((N_HEADS * D_V, D_MODEL)).reshape(N_HEADS, D_V, D_MODEL)

    params = {
        "src_emb": dense((SRC_VOCAB, D_MODEL), 1.0, jnp.float32),
        "tgt_emb": dense((TGT_VOCAB, D_MODEL), 1.0, jnp.float32),
        "proj": dense((D_MODEL, TGT_VOCAB)),
        "enc": {
            "w_qkv": stack(lambda: dense((D_MODEL, QKV_W))),          # W_Q|W_K|W_V fused
            "w_fc": stack(fc_weight),
            "ffn_w1": stack(lambda: dense((D_MODEL, D_FF))),
            "ffn_w2": stack(lambda: dense((D_FF, D_MODEL))),
        },
        "dec": {
            "self_w_qkv": stack(lambda: dense((D_MODEL, QKV_W))),
            "self_w_fc": stack(fc_weight),
            "cross_w_q": stack(lambda: dense((D_MODEL, HK))),
            "cross_w_kv": stack(lambda: dense((D_MODEL, HK + HV))),   # W_K|W_V fused (enc stream)
            "cross_w_fc": stack(fc_weight),
            "ffn_w1": stack(lambda: dense((D_MODEL, D_FF))),
            "ffn_w2": stack(lambda: dense((D_FF, D_MODEL))),
        },
    }
    return params


# ---------------- full Transformer forward ----------------
def transformer_forward(params, enc_inputs, dec_inputs):
    b, src_len = enc_inputs.shape
    tgt_len = dec_inputs.shape[1]

    # ---- Encoder (one fused pallas_call for the whole stack) ----
    enc_x = params["src_emb"][enc_inputs]                         # embedding gather (glue)
    enc_x = enc_x + positional_encoding(src_len, D_MODEL)[None]
    # TODO(synk): nn.Dropout(p=0.1) in PositionalEncoding treated as identity (eval semantics).
    enc_self_mask = get_atten_pad_mask(enc_inputs, enc_inputs).astype(jnp.int32)
    enc_out, enc_self_attns = encoder_stack(params["enc"], enc_x, enc_self_mask)

    # ---- Decoder + projection (one fused pallas_call) ----
    dec_x = params["tgt_emb"][dec_inputs]
    dec_x = dec_x + positional_encoding(tgt_len, D_MODEL)[None]
    dec_self_pad = get_atten_pad_mask(dec_inputs, dec_inputs)
    dec_sub = get_atten_subsequence_mask(dec_inputs)
    dec_self_mask = ((dec_self_pad.astype(jnp.int32) + dec_sub) > 0).astype(jnp.int32)
    dec_enc_mask = get_atten_pad_mask(dec_inputs, enc_inputs).astype(jnp.int32)
    logits, dec_self_attns, dec_enc_attns = decoder_stack(
        params["dec"], dec_x, enc_out, dec_self_mask, dec_enc_mask, params["proj"])

    return logits, enc_self_attns, dec_self_attns, dec_enc_attns


if __name__ == "__main__":
    key = jax.random.PRNGKey(0)
    pkey, ekey, dkey = jax.random.split(key, 3)
    params = init_params(pkey)

    B, SRC_LEN, TGT_LEN = 2, 8, 8
    enc_inputs = jax.random.randint(ekey, (B, SRC_LEN), 1, SRC_VOCAB, dtype=jnp.int32)
    dec_inputs = jax.random.randint(dkey, (B, TGT_LEN), 1, TGT_VOCAB, dtype=jnp.int32)
    enc_inputs = enc_inputs.at[0, -2:].set(0)   # pad tokens -> exercises pad mask
    dec_inputs = dec_inputs.at[1, -1:].set(0)

    forward = jax.jit(transformer_forward)
    logits, enc_attns, dec_self_attns, dec_enc_attns = forward(params, enc_inputs, dec_inputs)
    jax.block_until_ready(logits)

    assert logits.shape == (B * TGT_LEN, TGT_VOCAB)
    assert len(enc_attns) == N_LAYERS and enc_attns[0].shape == (B, N_HEADS, SRC_LEN, SRC_LEN)
    assert len(dec_self_attns) == N_LAYERS and dec_self_attns[0].shape == (B, N_HEADS, TGT_LEN, TGT_LEN)
    assert len(dec_enc_attns) == N_LAYERS and dec_enc_attns[0].shape == (B, N_HEADS, TGT_LEN, SRC_LEN)
    assert bool(jnp.all(jnp.isfinite(logits)))
    # attention rows must sum to ~1 (softmax) -> quick sanity on the fused attention path
    assert bool(jnp.all(jnp.abs(jnp.sum(enc_attns[0], axis=-1) - 1.0) < 1e-2))
    print("KERNEL_OK")
</pallas_src>

<mosaic_0001>
module attributes {stable_mosaic.version = 11 : i64} {
  func.func @_encoder_kernel(%arg0: i32, %arg1: memref<1x8x32xf32, #tpu.memory_space<vmem>>, %arg2: memref<1x8x8xi32, #tpu.memory_space<vmem>>, %arg3: memref<2x32x96xbf16, #tpu.memory_space<vmem>>, %arg4: memref<2x4x8x32xbf16, #tpu.memory_space<vmem>>, %arg5: memref<2x32x64xbf16, #tpu.memory_space<vmem>>, %arg6: memref<2x64x32xbf16, #tpu.memory_space<vmem>>, %arg7: memref<1x8x32xf32, #tpu.memory_space<vmem>>, %arg8: memref<1x4x8x8xf32, #tpu.memory_space<vmem>>, %arg9: memref<1x4x8x8xf32, #tpu.memory_space<vmem>>) attributes {dimension_semantics = [#tpu.dimension_semantics<parallel>], iteration_bounds = array<i64: 2>, scalar_prefetch = 0 : i64, scratch_operands = 0 : i64, tpu.core_type = #tpu.core_type<tc>, window_params = [{transform_indices = @transform_0, window_bounds = array<i64: 1, 8, 32>}, {transform_indices = @transform_1, window_bounds = array<i64: 1, 8, 8>}, {pipeline_mode = #tpu.pipeline_mode<synchronous>, transform_indices = @transform_2, window_bounds = array<i64: 2, 32, 96>}, {pipeline_mode = #tpu.pipeline_mode<synchronous>, transform_indices = @transform_3, window_bounds = array<i64: 2, 4, 8, 32>}, {pipeline_mode = #tpu.pipeline_mode<synchronous>, transform_indices = @transform_4, window_bounds = array<i64: 2, 32, 64>}, {pipeline_mode = #tpu.pipeline_mode<synchronous>, transform_indices = @transform_5, window_bounds = array<i64: 2, 64, 32>}, {transform_indices = @transform_6, window_bounds = array<i64: 1, 8, 32>}, {transform_indices = @transform_7, window_bounds = array<i64: 1, 4, 8, 8>}, {transform_indices = @transform_8, window_bounds = array<i64: 1, 4, 8, 8>}]} {
    %c0 = arith.constant 0 : index
    %c0_0 = arith.constant 0 : index
    %c0_1 = arith.constant 0 : index
    %0 = vector.load %arg1[%c0, %c0_0, %c0_1] : memref<1x8x32xf32, #tpu.memory_space<vmem>>, vector<1x8x32xf32>
    %1 = vector.shape_cast %0 : vector<1x8x32xf32> to vector<8x32xf32>
    %c0_2 = arith.constant 0 : index
    %c0_3 = arith.constant 0 : index
    %c0_4 = arith.constant 0 : index
    %2 = vector.load %arg2[%c0_2, %c0_3, %c0_4] : memref<1x8x8xi32, #tpu.memory_space<vmem>>, vector<1x8x8xi32>
    %3 = vector.shape_cast %2 : vector<1x8x8xi32> to vector<8x8xi32>
    %c0_i32 = arith.constant 0 : i32
    %4 = vector.broadcast %c0_i32 : i32 to vector<8x8xi32>
    %5 = arith.cmpi sgt, %3, %4 : vector<8x8xi32>
    %6 = arith.truncf %1 : vector<8x32xf32> to vector<8x32xbf16>
    %c0_5 = arith.constant 0 : index
    %c0_6 = arith.constant 0 : index
    %c0_7 = arith.constant 0 : index
    %7 = vector.load %arg3[%c0_5, %c0_6, %c0_7] : memref<2x32x96xbf16, #tpu.memory_space<vmem>>, vector<1x32x96xbf16>
    %8 = vector.shape_cast %7 : vector<1x32x96xbf16> to vector<32x96xbf16>
    %cst = arith.constant dense<0.000000e+00> : vector<8x96xf32>
    %9 = tpu.matmul %6, %8, %cst {dimension_numbers = #tpu.dot_dimension_numbers<[1], [0], [0], [1], [0, 0, 1, 1], [], []>} : vector<8x32xbf16>, vector<32x96xbf16>, vector<8x96xf32> -> vector<8x96xf32>
    %10 = vector.extract_strided_slice %9 {offsets = [0, 0], sizes = [8, 32], strides = [1, 1]} : vector<8x96xf32> to vector<8x32xf32>
    %11 = vector.extract_strided_slice %9 {offsets = [0, 32], sizes = [8, 32], strides = [1, 1]} : vector<8x96xf32> to vector<8x32xf32>
    %12 = vector.extract_strided_slice %9 {offsets = [0, 64], sizes = [8, 32], strides = [1, 1]} : vector<8x96xf32> to vector<8x32xf32>
    %13 = vector.extract_strided_slice %10 {offsets = [0, 0], sizes = [8, 8], strides = [1, 1]} : vector<8x32xf32> to vector<8x8xf32>
    %14 = vector.extract_strided_slice %11 {offsets = [0, 0], sizes = [8, 8], strides = [1, 1]} : vector<8x32xf32> to vector<8x8xf32>
    %15 = vector.extract_strided_slice %12 {offsets = [0, 0], sizes = [8, 8], strides = [1, 1]} : vector<8x32xf32> to vector<8x8xf32>
    %16 = arith.truncf %13 : vector<8x8xf32> to vector<8x8xbf16>
    %17 = arith.truncf %14 : vector<8x8xf32> to vector<8x8xbf16>
    %cst_8 = arith.constant dense<0.000000e+00> : vector<8x8xf32>
    %18 = tpu.matmul %16, %17, %cst_8 {dimension_numbers = #tpu.dot_dimension_numbers<[1], [1], [0], [0], [0, 0, 1, 0], [], []>} : vector<8x8xbf16>, vector<8x8xbf16>, vector<8x8xf32> -> vector<8x8xf32>
    %cst_9 = arith.constant 0.353553385 : f32
    %19 = vector.broadcast %cst_9 : f32 to vector<8x8xf32>
    %20 = arith.mulf %18, %19 : vector<8x8xf32>
    %cst_10 = arith.constant -1.000000e+09 : f32
    %21 = vector.broadcast %cst_10 : f32 to vector<8x8xf32>
    %22 = arith.select %5, %21, %20 : vector<8x8xi1>, vector<8x8xf32>
    %cst_11 = arith.constant dense<0xFF800000> : vector<8xf32>
    %23 = vector.multi_reduction <maximumf>, %22, %cst_11 [1] : vector<8x8xf32> to vector<8xf32>
    %24 = vector.shape_cast %23 : vector<8xf32> to vector<8x1xf32>
    %25 = vector.broadcast %24 : vector<8x1xf32> to vector<8x8xf32>
    %26 = arith.subf %22, %25 : vector<8x8xf32>
    %27 = math.exp %26 : vector<8x8xf32>
    %cst_12 = arith.constant dense<0.000000e+00> : vector<8xf32>
    %28 = vector.multi_reduction <add>, %27, %cst_12 [1] : vector<8x8xf32> to vector<8xf32>
    %29 = vector.shape_cast %28 : vector<8xf32> to vector<8x1xf32>
    %30 = tpu.reciprocal %29 {approx = true} : vector<8x1xf32> -> vector<8x1xf32>
    %31 = vector.broadcast %30 : vector<8x1xf32> to vector<8x8xf32>
    %32 = arith.mulf %27, %31 : vector<8x8xf32>
    %c0_13 = arith.constant 0 : index
    %c0_14 = arith.constant 0 : index
    %c0_15 = arith.constant 0 : index
    %c0_16 = arith.constant 0 : index
    %33 = vector.load %arg8[%c0_13, %c0_14, %c0_15, %c0_16] : memref<1x4x8x8xf32, #tpu.memory_space<vmem>>, vector<1x1x8x8xf32>
    %34 = vector.shape_cast %33 : vector<1x1x8x8xf32> to vector<8x8xf32>
    %35 = vector.shape_cast %32 : vector<8x8xf32> to vector<1x1x8x8xf32>
    tpu.vector_store %arg8[%c0_13, %c0_14, %c0_15, %c0_16], %35 {strides = array<i32>} : memref<1x4x8x8xf32, #tpu.memory_space<vmem>>, vector<1x1x8x8xf32>,
    %36 = arith.truncf %32 : vector<8x8xf32> to vector<8x8xbf16>
    %37 = arith.truncf %15 : vector<8x8xf32> to vector<8x8xbf16>
    %cst_17 = arith.constant dense<0.000000e+00> : vector<8x8xf32>
    %38 = tpu.matmul %36, %37, %cst_17 {dimension_numbers = #tpu.dot_dimension_numbers<[1], [0], [0], [1], [0, 0, 1, 1], [], []>} : vector<8x8xbf16>, vector<8x8xbf16>, vector<8x8xf32> -> vector<8x8xf32>
    %39 = arith.truncf %38 : vector<8x8xf32> to vector<8x8xbf16>
    %c0_18 = arith.constant 0 : index
    %c0_19 = arith.constant 0 : index
    %c0_20 = arith.constant 0 : index
    %c0_21 = arith.constant 0 : index
    %40 = vector.load %arg4[%c0_18, %c0_19, %c0_20, %c0_21] : memref<2x4x8x32xbf16, #tpu.memory_space<vmem>>, vector<1x1x8x32xbf16>
    %41 = vector.shape_cast %40 : vector<1x1x8x32xbf16> to vector<8x32xbf16>
    %cst_22 = arith.constant dense<0.000000e+00> : vector<8x32xf32>
    %42 = tpu.matmul %39, %41, %cst_22 {dimension_numbers = #tpu.dot_dimension_numbers<[1], [0], [0], [1], [0, 0, 1, 1], [], []>} : vector<8x8xbf16>, vector<8x32xbf16>, vector<8x32xf32> -> vector<8x32xf32>
    %43 = vector.extract_strided_slice %10 {offsets = [0, 8], sizes = [8, 8], strides = [1, 1]} : vector<8x32xf32> to vector<8x8xf32>
    %44 = vector.extract_strided_slice %11 {offsets = [0, 8], sizes = [8, 8], strides = [1, 1]} : vector<8x32xf32> to vector<8x8xf32>
    %45 = vector.extract_strided_slice %12 {offsets = [0, 8], sizes = [8, 8], strides = [1, 1]} : vector<8x32xf32> to vector<8x8xf32>
    %46 = arith.truncf %43 : vector<8x8xf32> to vector<8x8xbf16>
    %47 = arith.truncf %44 : vector<8x8xf32> to vector<8x8xbf16>
    %cst_23 = arith.constant dense<0.000000e+00> : vector<8x8xf32>
    %48 = tpu.matmul %46, %47, %cst_23 {dimension_numbers = #tpu.dot_dimension_numbers<[1], [1], [0], [0], [0, 0, 1, 0], [], []>} : vector<8x8xbf16>, vector<8x8xbf16>, vector<8x8xf32> -> vector<8x8xf32>
    %cst_24 = arith.constant 0.353553385 : f32
    %49 = vector.broadcast %cst_24 : f32 to vector<8x8xf32>
    %50 = arith.mulf %48, %49 : vector<8x8xf32>
    %cst_25 = arith.constant -1.000000e+09 : f32
    %51 = vector.broadcast %cst_25 : f32 to vector<8x8xf32>
    %52 = arith.select %5, %51, %50 : vector<8x8xi1>, vector<8x8xf32>
    %cst_26 = arith.constant dense<0xFF800000> : vector<8xf32>
    %53 = vector.multi_reduction <maximumf>, %52, %cst_26 [1] : vector<8x8xf32> to vector<8xf32>
    %54 = vector.shape_cast %53 : vector<8xf32> to vector<8x1xf32>
    %55 = vector.broadcast %54 : vector<8x1xf32> to vector<8x8xf32>
    %56 = arith.subf %52, %55 : vector<8x8xf32>
    %57 = math.exp %56 : vector<8x8xf32>
    %cst_27 = arith.constant dense<0.000000e+00> : vector<8xf32>
    %58 = vector.multi_reduction <add>, %57, %cst_27 [1] : vector<8x8xf32> to vector<8xf32>
    %59 = vector.shape_cast %58 : vector<8xf32> to vector<8x1xf32>
    %60 = tpu.reciprocal %59 {approx = true} : vector<8x1xf32> -> vector<8x1xf32>
    %61 = vector.broadcast %60 : vector<8x1xf32> to vector<8x8xf32>
    %62 = arith.mulf %57, %61 : vector<8x8xf32>
    %c0_28 = arith.constant 0 : index
    %c1 = arith.constant 1 : index
    %c0_29 = arith.constant 0 : index
    %c0_30 = arith.constant 0 : index
    %63 = vector.load %arg8[%c0_28, %c1, %c0_29, %c0_30] : memref<1x4x8x8xf32, #tpu.memory_space<vmem>>, vector<1x1x8x8xf32>
    %64 = vector.shape_cast %63 : vector<1x1x8x8xf32> to vector<8x8xf32>
    %65 = vector.shape_cast %62 : vector<8x8xf32> to vector<1x1x8x8xf32>
    tpu.vector_store %arg8[%c0_28, %c1, %c0_29, %c0_30], %65 {strides = array<i32>} : memref<1x4x8x8xf32, #tpu.memory_space<vmem>>, vector<1x1x8x8xf32>,
    %66 = arith.truncf %62 : vector<8x8xf32> to vector<8x8xbf16>
    %67 = arith.truncf %45 : vector<8x8xf32> to vector<8x8xbf16>
    %cst_31 = arith.constant dense<0.000000e+00> : vector<8x8xf32>
    %68 = tpu.matmul %66, %67, %cst_31 {dimension_numbers = #tpu.dot_dimension_numbers<[1], [0], [0], [1], [0, 0, 1, 1], [], []>} : vector<8x8xbf16>, vector<8x8xbf16>, vector<8x8xf32> -> vector<8x8xf32>
    %69 = arith.truncf %68 : vector<8x8xf32> to vector<8x8xbf16>
    %c0_32 = arith.constant 0 : index
    %c1_33 = arith.constant 1 : index
    %c0_34 = arith.constant 0 : index
    %c0_35 = arith.constant 0 : index
    %70 = vector.load %arg4[%c0_32, %c1_33, %c0_34, %c0_35] : memref<2x4x8x32xbf16, #tpu.memory_space<vmem>>, vector<1x1x8x32xbf16>
    %71 = vector.shape_cast %70 : vector<1x1x8x32xbf16> to vector<8x32xbf16>
    %cst_36 = arith.constant dense<0.000000e+00> : vector<8x32xf32>
    %72 = tpu.matmul %69, %71, %cst_36 {dimension_numbers = #tpu.dot_dimension_numbers<[1], [0], [0], [1], [0, 0, 1, 1], [], []>} : vector<8x8xbf16>, vector<8x32xbf16>, vector<8x32xf32> -> vector<8x32xf32>
    %73 = arith.addf %42, %72 : vector<8x32xf32>
    %74 = vector.extract_strided_slice %10 {offsets = [0, 16], sizes = [8, 8], strides = [1, 1]} : vector<8x32xf32> to vector<8x8xf32>
    %75 = vector.extract_strided_slice %11 {offsets = [0, 16], sizes = [8, 8], strides = [1, 1]} : vector<8x32xf32> to vector<8x8xf32>
    %76 = vector.extract_strided_slice %12 {offsets = [0, 16], sizes = [8, 8], strides = [1, 1]} : vector<8x32xf32> to vector<8x8xf32>
    %77 = arith.truncf %74 : vector<8x8xf32> to vector<8x8xbf16>
    %78 = arith.truncf %75 : vector<8x8xf32> to vector<8x8xbf16>
    %cst_37 = arith.constant dense<0.000000e+00> : vector<8x8xf32>
    %79 = tpu.matmul %77, %78, %cst_37 {dimension_numbers = #tpu.dot_dimension_numbers<[1], [1], [0], [0], [0, 0, 1, 0], [], []>} : vector<8x8xbf16>, vector<8x8xbf16>, vector<8x8xf32> -> vector<8x8xf32>
    %cst_38 = arith.constant 0.353553385 : f32
    %80 = vector.broadcast %cst_38 : f32 to vector<8x8xf32>
    %81 = arith.mulf %79, %80 : vector<8x8xf32>
    %cst_39 = arith.constant -1.000000e+09 : f32
    %82 = vector.broadcast %cst_39 : f32 to vector<8x8xf32>
    %83 = arith.select %5, %82, %81 : vector<8x8xi1>, vector<8x8xf32>
    %cst_40 = arith.constant dense<0xFF800000> : vector<8xf32>
    %84 = vector.multi_reduction <maximumf>, %83, %cst_40 [1] : vector<8x8xf32> to vector<8xf32>
    %85 = vector.shape_cast %84 : vector<8xf32> to vector<8x1xf32>
    %86 = vector.broadcast %85 : vector<8x1xf32> to vector<8x8xf32>
    %87 = arith.subf %83, %86 : vector<8x8xf32>
    %88 = math.exp %87 : vector<8x8xf32>
    %cst_41 = arith.constant dense<0.000000e+00> : vector<8xf32>
    %89 = vector.multi_reduction <add>, %88, %cst_41 [1] : vector<8x8xf32> to vector<8xf32>
    %90 = vector.shape_cast %89 : vector<8xf32> to vector<8x1xf32>
    %91 = tpu.reciprocal %90 {approx = true} : vector<8x1xf32> -> vector<8x1xf32>
    %92 = vector.broadcast %91 : vector<8x1xf32> to vector<8x8xf32>
    %93 = arith.mulf %88, %92 : vector<8x8xf32>
    %c0_42 = arith.constant 0 : index
    %c2 = arith.constant 2 : index
    %c0_43 = arith.constant 0 : index
    %c0_44 = arith.constant 0 : index
    %94 = vector.load %arg8[%c0_42, %c2, %c0_43, %c0_44] : memref<1x4x8x8xf32, #tpu.memory_space<vmem>>, vector<1x1x8x8xf32>
    %95 = vector.shape_cast %94 : vector<1x1x8x8xf32> to vector<8x8xf32>
    %96 = vector.shape_cast %93 : vector<8x8xf32> to vector<1x1x8x8xf32>
    tpu.vector_store %arg8[%c0_42, %c2, %c0_43, %c0_44], %96 {strides = array<i32>} : memref<1x4x8x8xf32, #tpu.memory_space<vmem>>, vector<1x1x8x8xf32>,
    %97 = arith.truncf %93 : vector<8x8xf32> to vector<8x8xbf16>
    %98 = arith.truncf %76 : vector<8x8xf32> to vector<8x8xbf16>
    %cst_45 = arith.constant dense<0.000000e+00> : vector<8x8xf32>
    %99 = tpu.matmul %97, %98, %cst_45 {dimension_numbers = #tpu.dot_dimension_numbers<[1], [0], [0], [1], [0, 0, 1, 1], [], []>} : vector<8x8xbf16>, vector<8x8xbf16>, vector<8x8xf32> -> vector<8x8xf32>
    %100 = arith.truncf %99 : vector<8x8xf32> to vector<8x8xbf16>
    %c0_46 = arith.constant 0 : index
    %c2_47 = arith.constant 2 : index
    %c0_48 = arith.constant 0 : index
    %c0_49 = arith.constant 0 : index
    %101 = vector.load %arg4[%c0_46, %c2_47, %c0_48, %c0_49] : memref<2x4x8x32xbf16, #tpu.memory_space<vmem>>, vector<1x1x8x32xbf16>
    %102 = vector.shape_cast %101 : vector<1x1x8x32xbf16> to vector<8x32xbf16>
    %cst_50 = arith.constant dense<0.000000e+00> : vector<8x32xf32>
    %103 = tpu.matmul %100, %102, %cst_50 {dimension_numbers = #tpu.dot_dimension_numbers<[1], [0], [0], [1], [0, 0, 1, 1], [], []>} : vector<8x8xbf16>, vector<8x32xbf16>, vector<8x32xf32> -> vector<8x32xf32>
    %104 = arith.addf %73, %103 : vector<8x32xf32>
    %105 = vector.extract_strided_slice %10 {offsets = [0, 24], sizes = [8, 8], strides = [1, 1]} : vector<8x32xf32> to vector<8x8xf32>
    %106 = vector.extract_strided_slice %11 {offsets = [0, 24], sizes = [8, 8], strides = [1, 1]} : vector<8x32xf32> to vector<8x8xf32>
    %107 = vector.extract_strided_slice %12 {offsets = [0, 24], sizes = [8, 8], strides = [1, 1]} : vector<8x32xf32> to vector<8x8xf32>
    %108 = arith.truncf %105 : vector<8x8xf32> to vector<8x8xbf16>
    %109 = arith.truncf %106 : vector<8x8xf32> to vector<8x8xbf16>
    %cst_51 = arith.constant dense<0.000000e+00> : vector<8x8xf32>
    %110 = tpu.matmul %108, %109, %cst_51 {dimension_numbers = #tpu.dot_dimension_numbers<[1], [1], [0], [0], [0, 0, 1, 0], [], []>} : vector<8x8xbf16>, vector<8x8xbf16>, vector<8x8xf32> -> vector<8x8xf32>
    %cst_52 = arith.constant 0.353553385 : f32
    %111 = vector.broadcast %cst_52 : f32 to vector<8x8xf32>
    %112 = arith.mulf %110, %111 : vector<8x8xf32>
    %cst_53 = arith.constant -1.000000e+09 : f32
    %113 = vector.broadcast %cst_53 : f32 to vector<8x8xf32>
    %114 = arith.select %5, %113, %112 : vector<8x8xi1>, vector<8x8xf32>
    %cst_54 = arith.constant dense<0xFF800000> : vector<8xf32>
    %115 = vector.multi_reduction <maximumf>, %114, %cst_54 [1] : vector<8x8xf32> to vector<8xf32>
    %116 = vector.shape_cast %115 : vector<8xf32> to vector<8x1xf32>
    %117 = vector.broadcast %116 : vector<8x1xf32> to vector<8x8xf32>
    %118 = arith.subf %114, %117 : vector<8x8xf32>
    %119 = math.exp %118 : vector<8x8xf32>
    %cst_55 = arith.constant dense<0.000000e+00> : vector<8xf32>
    %120 = vector.multi_reduction <add>, %119, %cst_55 [1] : vector<8x8xf32> to vector<8xf32>
    %121 = vector.shape_cast %120 : vector<8xf32> to vector<8x1xf32>
    %122 = tpu.reciprocal %121 {approx = true} : vector<8x1xf32> -> vector<8x1xf32>
    %123 = vector.broadcast %122 : vector<8x1xf32> to vector<8x8xf32>
    %124 = arith.mulf %119, %123 : vector<8x8xf32>
    %c0_56 = arith.constant 0 : index
    %c3 = arith.constant 3 : index
    %c0_57 = arith.constant 0 : index
    %c0_58 = arith.constant 0 : index
    %125 = vector.load %arg8[%c0_56, %c3, %c0_57, %c0_58] : memref<1x4x8x8xf32, #tpu.memory_space<vmem>>, vector<1x1x8x8xf32>
    %126 = vector.shape_cast %125 : vector<1x1x8x8xf32> to vector<8x8xf32>
    %127 = vector.shape_cast %124 : vector<8x8xf32> to vector<1x1x8x8xf32>
    tpu.vector_store %arg8[%c0_56, %c3, %c0_57, %c0_58], %127 {strides = array<i32>} : memref<1x4x8x8xf32, #tpu.memory_space<vmem>>, vector<1x1x8x8xf32>,
    %128 = arith.truncf %124 : vector<8x8xf32> to vector<8x8xbf16>
    %129 = arith.truncf %107 : vector<8x8xf32> to vector<8x8xbf16>
    %cst_59 = arith.constant dense<0.000000e+00> : vector<8x8xf32>
    %130 = tpu.matmul %128, %129, %cst_59 {dimension_numbers = #tpu.dot_dimension_numbers<[1], [0], [0], [1], [0, 0, 1, 1], [], []>} : vector<8x8xbf16>, vector<8x8xbf16>, vector<8x8xf32> -> vector<8x8xf32>
    %131 = arith.truncf %130 : vector<8x8xf32> to vector<8x8xbf16>
    %c0_60 = arith.constant 0 : index
    %c3_61 = arith.constant 3 : index
    %c0_62 = arith.constant 0 : index
    %c0_63 = arith.constant 0 : index
    %132 = vector.load %arg4[%c0_60, %c3_61, %c0_62, %c0_63] : memref<2x4x8x32xbf16, #tpu.memory_space<vmem>>, vector<1x1x8x32xbf16>
    %133 = vector.shape_cast %132 : vector<1x1x8x32xbf16> to vector<8x32xbf16>
    %cst_64 = arith.constant dense<0.000000e+00> : vector<8x32xf32>
    %134 = tpu.matmul %131, %133, %cst_64 {dimension_numbers = #tpu.dot_dimension_numbers<[1], [0], [0], [1], [0, 0, 1, 1], [], []>} : vector<8x8xbf16>, vector<8x32xbf16>, vector<8x32xf32> -> vector<8x32xf32>
    %135 = arith.addf %104, %134 : vector<8x32xf32>
    %136 = arith.addf %135, %1 : vector<8x32xf32>
    %cst_65 = arith.constant dense<0.000000e+00> : vector<8xf32>
    %137 = vector.multi_reduction <add>, %136, %cst_65 [1] : vector<8x32xf32> to vector<8xf32>
    %138 = vector.shape_cast %137 : vector<8xf32> to vector<8x1xf32>
    %cst_66 = arith.constant 3.200000e+01 : f32
    %139 = vector.broadcast %cst_66 : f32 to vector<8x1xf32>
    %140 = arith.divf %138, %139 : vector<8x1xf32>
    %141 = vector.broadcast %140 : vector<8x1xf32> to vector<8x32xf32>
    %142 = arith.subf %136, %141 : vector<8x32xf32>
    %143 = arith.mulf %142, %142 : vector<8x32xf32>
    %cst_67 = arith.constant dense<0.000000e+00> : vector<8xf32>
    %144 = vector.multi_reduction <add>, %143, %cst_67 [1] : vector<8x32xf32> to vector<8xf32>
    %145 = vector.shape_cast %144 : vector<8xf32> to vector<8x1xf32>
    %cst_68 = arith.constant 3.200000e+01 : f32
    %146 = vector.broadcast %cst_68 : f32 to vector<8x1xf32>
    %147 = arith.divf %145, %146 : vector<8x1xf32>
    %148 = vector.broadcast %140 : vector<8x1xf32> to vector<8x32xf32>
    %149 = arith.subf %136, %148 : vector<8x32xf32>
    %cst_69 = arith.constant 9.99999974E-6 : f32
    %150 = vector.broadcast %cst_69 : f32 to vector<8x1xf32>
    %151 = arith.addf %147, %150 : vector<8x1xf32>
    %152 = math.rsqrt %151 : vector<8x1xf32>
    %153 = vector.broadcast %152 : vector<8x1xf32> to vector<8x32xf32>
    %154 = arith.mulf %149, %153 : vector<8x32xf32>
    %155 = arith.truncf %154 : vector<8x32xf32> to vector<8x32xbf16>
    %c0_70 = arith.constant 0 : index
    %c0_71 = arith.constant 0 : index
    %c0_72 = arith.constant 0 : index
    %156 = vector.load %arg5[%c0_70, %c0_71, %c0_72] : memref<2x32x64xbf16, #tpu.memory_space<vmem>>, vector<1x32x64xbf16>
    %157 = vector.shape_cast %156 : vector<1x32x64xbf16> to vector<32x64xbf16>
    %cst_73 = arith.constant dense<0.000000e+00> : vector<8x64xf32>
    %158 = tpu.matmul %155, %157, %cst_73 {dimension_numbers = #tpu.dot_dimension_numbers<[1], [0], [0], [1], [0, 0, 1, 1], [], []>} : vector<8x32xbf16>, vector<32x64xbf16>, vector<8x64xf32> -> vector<8x64xf32>
    %cst_74 = arith.constant 0.000000e+00 : f32
    %159 = vector.broadcast %cst_74 : f32 to vector<8x64xf32>
    %160 = arith.maximumf %158, %159 : vector<8x64xf32>
    %161 = arith.truncf %160 : vector<8x64xf32> to vector<8x64xbf16>
    %c0_75 = arith.constant 0 : index
    %c0_76 = arith.constant 0 : index
    %c0_77 = arith.constant 0 : index
    %162 = vector.load %arg6[%c0_75, %c0_76, %c0_77] : memref<2x64x32xbf16, #tpu.memory_space<vmem>>, vector<1x64x32xbf16>
    %163 = vector.shape_cast %162 : vector<1x64x32xbf16> to vector<64x32xbf16>
    %cst_78 = arith.constant dense<0.000000e+00> : vector<8x32xf32>
    %164 = tpu.matmul %161, %163, %cst_78 {dimension_numbers = #tpu.dot_dimension_numbers<[1], [0], [0], [1], [0, 0, 1, 1], [], []>} : vector<8x64xbf16>, vector<64x32xbf16>, vector<8x32xf32> -> vector<8x32xf32>
    %165 = arith.addf %164, %154 : vector<8x32xf32>
    %cst_79 = arith.constant dense<0.000000e+00> : vector<8xf32>
    %166 = vector.multi_reduction <add>, %165, %cst_79 [1] : vector<8x32xf32> to vector<8xf32>
    %167 = vector.shape_cast %166 : vector<8xf32> to vector<8x1xf32>
    %cst_80 = arith.constant 3.200000e+01 : f32
    %168 = vector.broadcast %cst_80 : f32 to vector<8x1xf32>
    %169 = arith.divf %167, %168 : vector<8x1xf32>
    %170 = vector.broadcast %169 : vector<8x1xf32> to vector<8x32xf32>
    %171 = arith.subf %165, %170 : vector<8x32xf32>
    %172 = arith.mulf %171, %171 : vector<8x32xf32>
    %cst_81 = arith.constant dense<0.000000e+00> : vector<8xf32>
    %173 = vector.multi_reduction <add>, %172, %cst_81 [1] : vector<8x32xf32> to vector<8xf32>
    %174 = vector.shape_cast %173 : vector<8xf32> to vector<8x1xf32>
    %cst_82 = arith.constant 3.200000e+01 : f32
    %175 = vector.broadcast %cst_82 : f32 to vector<8x1xf32>
    %176 = arith.divf %174, %175 : vector<8x1xf32>
    %177 = vector.broadcast %169 : vector<8x1xf32> to vector<8x32xf32>
    %178 = arith.subf %165, %177 : vector<8x32xf32>
    %cst_83 = arith.constant 9.99999974E-6 : f32
    %179 = vector.broadcast %cst_83 : f32 to vector<8x1xf32>
    %180 = arith.addf %176, %179 : vector<8x1xf32>
    %181 = math.rsqrt %180 : vector<8x1xf32>
    %182 = vector.broadcast %181 : vector<8x1xf32> to vector<8x32xf32>
    %183 = arith.mulf %178, %182 : vector<8x32xf32>
    %184 = arith.truncf %183 : vector<8x32xf32> to vector<8x32xbf16>
    %c1_84 = arith.constant 1 : index
    %c0_85 = arith.constant 0 : index
    %c0_86 = arith.constant 0 : index
    %185 = vector.load %arg3[%c1_84, %c0_85, %c0_86] : memref<2x32x96xbf16, #tpu.memory_space<vmem>>, vector<1x32x96xbf16>
    %186 = vector.shape_cast %185 : vector<1x32x96xbf16> to vector<32x96xbf16>
    %cst_87 = arith.constant dense<0.000000e+00> : vector<8x96xf32>
    %187 = tpu.matmul %184, %186, %cst_87 {dimension_numbers = #tpu.dot_dimension_numbers<[1], [0], [0], [1], [0, 0, 1, 1], [], []>} : vector<8x32xbf16>, vector<32x96xbf16>, vector<8x96xf32> -> vector<8x96xf32>
    %188 = vector.extract_strided_slice %187 {offsets = [0, 0], sizes = [8, 32], strides = [1, 1]} : vector<8x96xf32> to vector<8x32xf32>
    %189 = vector.extract_strided_slice %187 {offsets = [0, 32], sizes = [8, 32], strides = [1, 1]} : vector<8x96xf32> to vector<8x32xf32>
    %190 = vector.extract_strided_slice %187 {offsets = [0, 64], sizes = [8, 32], strides = [1, 1]} : vector<8x96xf32> to vector<8x32xf32>
    %191 = vector.extract_strided_slice %188 {offsets = [0, 0], sizes = [8, 8], strides = [1, 1]} : vector<8x32xf32> to vector<8x8xf32>
    %192 = vector.extract_strided_slice %189 {offsets = [0, 0], sizes = [8, 8], strides = [1, 1]} : vector<8x32xf32> to vector<8x8xf32>
    %193 = vector.extract_strided_slice %190 {offsets = [0, 0], sizes = [8, 8], strides = [1, 1]} : vector<8x32xf32> to vector<8x8xf32>
    %194 = arith.truncf %191 : vector<8x8xf32> to vector<8x8xbf16>
    %195 = arith.truncf %192 : vector<8x8xf32> to vector<8x8xbf16>
    %cst_88 = arith.constant dense<0.000000e+00> : vector<8x8xf32>
    %196 = tpu.matmul %194, %195, %cst_88 {dimension_numbers = #tpu.dot_dimension_numbers<[1], [1], [0], [0], [0, 0, 1, 0], [], []>} : vector<8x8xbf16>, vector<8x8xbf16>, vector<8x8xf32> -> vector<8x8xf32>
    %cst_89 = arith.constant 0.353553385 : f32
    %197 = vector.broadcast %cst_89 : f32 to vector<8x8xf32>
    %198 = arith.mulf %196, %197 : vector<8x8xf32>
    %cst_90 = arith.constant -1.000000e+09 : f32
    %199 = vector.broadcast %cst_90 : f32 to vector<8x8xf32>
    %200 = arith.select %5, %199, %198 : vector<8x8xi1>, vector<8x8xf32>
    %cst_91 = arith.constant dense<0xFF800000> : vector<8xf32>
    %201 = vector.multi_reduction <maximumf>, %200, %cst_91 [1] : vector<8x8xf32> to vector<8xf32>
    %202 = vector.shape_cast %201 : vector<8xf32> to vector<8x1xf32>
    %203 = vector.broadcast %202 : vector<8x1xf32> to vector<8x8xf32>
    %204 = arith.subf %200, %203 : vector<8x8xf32>
    %205 = math.exp %204 : vector<8x8xf32>
    %cst_92 = arith.constant dense<0.000000e+00> : vector<8xf32>
    %206 = vector.multi_reduction <add>, %205, %cst_92 [1] : vector<8x8xf32> to vector<8xf32>
    %207 = vector.shape_cast %206 : vector<8xf32> to vector<8x1xf32>
    %208 = tpu.reciprocal %207 {approx = true} : vector<8x1xf32> -> vector<8x1xf32>
    %209 = vector.broadcast %208 : vector<8x1xf32> to vector<8x8xf32>
    %210 = arith.mulf %205, %209 : vector<8x8xf32>
    %c0_93 = arith.constant 0 : index
    %c0_94 = arith.constant 0 : index
    %c0_95 = arith.constant 0 : index
    %c0_96 = arith.constant 0 : index
    %211 = vector.load %arg9[%c0_93, %c0_94, %c0_95, %c0_96] : memref<1x4x8x8xf32, #tpu.memory_space<vmem>>, vector<1x1x8x8xf32>
    %212 = vector.shape_cast %211 : vector<1x1x8x8xf32> to vector<8x8xf32>
    %213 = vector.shape_cast %210 : vector<8x8xf32> to vector<1x1x8x8xf32>
    tpu.vector_store %arg9[%c0_93, %c0_94, %c0_95, %c0_96], %213 {strides = array<i32>} : memref<1x4x8x8xf32, #tpu.memory_space<vmem>>, vector<1x1x8x8xf32>,
    %214 = arith.truncf %210 : vector<8x8xf32> to vector<8x8xbf16>
    %215 = arith.truncf %193 : vector<8x8xf32> to vector<8x8xbf16>
    %cst_97 = arith.constant dense<0.000000e+00> : vector<8x8xf32>
    %216 = tpu.matmul %214, %215, %cst_97 {dimension_numbers = #tpu.dot_dimension_numbers<[1], [0], [0], [1], [0, 0, 1, 1], [], []>} : vector<8x8xbf16>, vector<8x8xbf16>, vector<8x8xf32> -> vector<8x8xf32>
    %217 = arith.truncf %216 : vector<8x8xf32> to vector<8x8xbf16>
    %c1_98 = arith.constant 1 : index
    %c0_99 = arith.constant 0 : index
    %c0_100 = arith.constant 0 : index
    %c0_101 = arith.constant 0 : index
    %218 = vector.load %arg4[%c1_98, %c0_99, %c0_100, %c0_101] : memref<2x4x8x32xbf16, #tpu.memory_space<vmem>>, vector<1x1x8x32xbf16>
    %219 = vector.shape_cast %218 : vector<1x1x8x32xbf16> to vector<8x32xbf16>
    %cst_102 = arith.constant dense<0.000000e+00> : vector<8x32xf32>
    %220 = tpu.matmul %217, %219, %cst_102 {dimension_numbers = #tpu.dot_dimension_numbers<[1], [0], [0], [1], [0, 0, 1, 1], [], []>} : vector<8x8xbf16>, vector<8x32xbf16>, vector<8x32xf32> -> vector<8x32xf32>
    %221 = vector.extract_strided_slice %188 {offsets = [0, 8], sizes = [8, 8], strides = [1, 1]} : vector<8x32xf32> to vector<8x8xf32>
    %222 = vector.extract_strided_slice %189 {offsets = [0, 8], sizes = [8, 8], strides = [1, 1]} : vector<8x32xf32> to vector<8x8xf32>
    %223 = vector.extract_strided_slice %190 {offsets = [0, 8], sizes = [8, 8], strides = [1, 1]} : vector<8x32xf32> to vector<8x8xf32>
    %224 = arith.truncf %221 : vector<8x8xf32> to vector<8x8xbf16>
    %225 = arith.truncf %222 : vector<8x8xf32> to vector<8x8xbf16>
    %cst_103 = arith.constant dense<0.000000e+00> : vector<8x8xf32>
    %226 = tpu.matmul %224, %225, %cst_103 {dimension_numbers = #tpu.dot_dimension_numbers<[1], [1], [0], [0], [0, 0, 1, 0], [], []>} : vector<8x8xbf16>, vector<8x8xbf16>, vector<8x8xf32> -> vector<8x8xf32>
    %cst_104 = arith.constant 0.353553385 : f32
    %227 = vector.broadcast %cst_104 : f32 to vector<8x8xf32>
    %228 = arith.mulf %226, %227 : vector<8x8xf32>
    %cst_105 = arith.constant -1.000000e+09 : f32
    %229 = vector.broadcast %cst_105 : f32 to vector<8x8xf32>
    %230 = arith.select %5, %229, %228 : vector<8x8xi1>, vector<8x8xf32>
    %cst_106 = arith.constant dense<0xFF800000> : vector<8xf32>
    %231 = vector.multi_reduction <maximumf>, %230, %cst_106 [1] : vector<8x8xf32> to vector<8xf32>
    %232 = vector.shape_cast %231 : vector<8xf32> to vector<8x1xf32>
    %233 = vector.broadcast %232 : vector<8x1xf32> to vector<8x8xf32>
    %234 = arith.subf %230, %233 : vector<8x8xf32>
    %235 = math.exp %234 : vector<8x8xf32>
    %cst_107 = arith.constant dense<0.000000e+00> : vector<8xf32>
    %236 = vector.multi_reduction <add>, %235, %cst_107 [1] : vector<8x8xf32> to vector<8xf32>
    %237 = vector.shape_cast %236 : vector<8xf32> to vector<8x1xf32>
    %238 = tpu.reciprocal %237 {approx = true} : vector<8x1xf32> -> vector<8x1xf32>
    %239 = vector.broadcast %238 : vector<8x1xf32> to vector<8x8xf32>
    %240 = arith.mulf %235, %239 : vector<8x8xf32>
    %c0_108 = arith.constant 0 : index
    %c1_109 = arith.constant 1 : index
    %c0_110 = arith.constant 0 : index
    %c0_111 = arith.constant 0 : index
    %241 = vector.load %arg9[%c0_108, %c1_109, %c0_110, %c0_111] : memref<1x4x8x8xf32, #tpu.memory_space<vmem>>, vector<1x1x8x8xf32>
    %242 = vector.shape_cast %241 : vector<1x1x8x8xf32> to vector<8x8xf32>
    %243 = vector.shape_cast %240 : vector<8x8xf32> to vector<1x1x8x8xf32>
    tpu.vector_store %arg9[%c0_108, %c1_109, %c0_110, %c0_111], %243 {strides = array<i32>} : memref<1x4x8x8xf32, #tpu.memory_space<vmem>>, vector<1x1x8x8xf32>,
    %244 = arith.truncf %240 : vector<8x8xf32> to vector<8x8xbf16>
    %245 = arith.truncf %223 : vector<8x8xf32> to vector<8x8xbf16>
    %cst_112 = arith.constant dense<0.000000e+00> : vector<8x8xf32>
    %246 = tpu.matmul %244, %245, %cst_112 {dimension_numbers = #tpu.dot_dimension_numbers<[1], [0], [0], [1], [0, 0, 1, 1], [], []>} : vector<8x8xbf16>, vector<8x8xbf16>, vector<8x8xf32> -> vector<8x8xf32>
    %247 = arith.truncf %246 : vector<8x8xf32> to vector<8x8xbf16>
    %c1_113 = arith.constant 1 : index
    %c1_114 = arith.constant 1 : index
    %c0_115 = arith.constant 0 : index
    %c0_116 = arith.constant 0 : index
    %248 = vector.load %arg4[%c1_113, %c1_114, %c0_115, %c0_116] : memref<2x4x8x32xbf16, #tpu.memory_space<vmem>>, vector<1x1x8x32xbf16>
    %249 = vector.shape_cast %248 : vector<1x1x8x32xbf16> to vector<8x32xbf16>
    %cst_117 = arith.constant dense<0.000000e+00> : vector<8x32xf32>
    %250 = tpu.matmul %247, %249, %cst_117 {dimension_numbers = #tpu.dot_dimension_numbers<[1], [0], [0], [1], [0, 0, 1, 1], [], []>} : vector<8x8xbf16>, vector<8x32xbf16>, vector<8x32xf32> -> vector<8x32xf32>
    %251 = arith.addf %220, %250 : vector<8x32xf32>
    %252 = vector.extract_strided_slice %188 {offsets = [0, 16], sizes = [8, 8], strides = [1, 1]} : vector<8x32xf32> to vector<8x8xf32>
    %253 = vector.extract_strided_slice %189 {offsets = [0, 16], sizes = [8, 8], strides = [1, 1]} : vector<8x32xf32> to vector<8x8xf32>
    %254 = vector.extract_strided_slice %190 {offsets = [0, 16], sizes = [8, 8], strides = [1, 1]} : vector<8x32xf32> to vector<8x8xf32>
    %255 = arith.truncf %252 : vector<8x8xf32> to vector<8x8xbf16>
    %256 = arith.truncf %253 : vector<8x8xf32> to vector<8x8xbf16>
    %cst_118 = arith.constant dense<0.000000e+00> : vector<8x8xf32>
    %257 = tpu.matmul %255, %256, %cst_118 {dimension_numbers = #tpu.dot_dimension_numbers<[1], [1], [0], [0], [0, 0, 1, 0], [], []>} : vector<8x8xbf16>, vector<8x8xbf16>, vector<8x8xf32> -> vector<8x8xf32>
    %cst_119 = arith.constant 0.353553385 : f32
    %258 = vector.broadcast %cst_119 : f32 to vector<8x8xf32>
    %259 = arith.mulf %257, %258 : vector<8x8xf32>
    %cst_120 = arith.constant -1.000000e+09 : f32
    %260 = vector.broadcast %cst_120 : f32 to vector<8x8xf32>
    %261 = arith.select %5, %260, %259 : vector<8x8xi1>, vector<8x8xf32>
    %cst_121 = arith.constant dense<0xFF800000> : vector<8xf32>
    %262 = vector.multi_reduction <maximumf>, %261, %cst_121 [1] : vector<8x8xf32> to vector<8xf32>
    %263 = vector.shape_cast %262 : vector<8xf32> to vector<8x1xf32>
    %264 = vector.broadcast %263 : vector<8x1xf32> to vector<8x8xf32>
    %265 = arith.subf %261, %264 : vector<8x8xf32>
    %266 = math.exp %265 : vector<8x8xf32>
    %cst_122 = arith.constant dense<0.000000e+00> : vector<8xf32>
    %267 = vector.multi_reduction <add>, %266, %cst_122 [1] : vector<8x8xf32> to vector<8xf32>
    %268 = vector.shape_cast %267 : vector<8xf32> to vector<8x1xf32>
    %269 = tpu.reciprocal %268 {approx = true} : vector<8x1xf32> -> vector<8x1xf32>
    %270 = vector.broadcast %269 : vector<8x1xf32> to vector<8x8xf32>
    %271 = arith.mulf %266, %270 : vector<8x8xf32>
    %c0_123 = arith.constant 0 : index
    %c2_124 = arith.constant 2 : index
    %c0_125 = arith.constant 0 : index
    %c0_126 = arith.constant 0 : index
    %272 = vector.load %arg9[%c0_123, %c2_124, %c0_125, %c0_126] : memref<1x4x8x8xf32, #tpu.memory_space<vmem>>, vector<1x1x8x8xf32>
    %273 = vector.shape_cast %272 : vector<1x1x8x8xf32> to vector<8x8xf32>
    %274 = vector.shape_cast %271 : vector<8x8xf32> to vector<1x1x8x8xf32>
    tpu.vector_store %arg9[%c0_123, %c2_124, %c0_125, %c0_126], %274 {strides = array<i32>} : memref<1x4x8x8xf32, #tpu.memory_space<vmem>>, vector<1x1x8x8xf32>,
    %275 = arith.truncf %271 : vector<8x8xf32> to vector<8x8xbf16>
    %276 = arith.truncf %254 : vector<8x8xf32> to vector<8x8xbf16>
    %cst_127 = arith.constant dense<0.000000e+00> : vector<8x8xf32>
    %277 = tpu.matmul %275, %276, %cst_127 {dimension_numbers = #tpu.dot_dimension_numbers<[1], [0], [0], [1], [0, 0, 1, 1], [], []>} : vector<8x8xbf16>, vector<8x8xbf16>, vector<8x8xf32> -> vector<8x8xf32>
    %278 = arith.truncf %277 : vector<8x8xf32> to vector<8x8xbf16>
    %c1_128 = arith.constant 1 : index
    %c2_129 = arith.constant 2 : index
    %c0_130 = arith.constant 0 : index
    %c0_131 = arith.constant 0 : index
    %279 = vector.load %arg4[%c1_128, %c2_129, %c0_130, %c0_131] : memref<2x4x8x32xbf16, #tpu.memory_space<vmem>>, vector<1x1x8x32xbf16>
    %280 = vector.shape_cast %279 : vector<1x1x8x32xbf16> to vector<8x32xbf16>
    %cst_132 = arith.constant dense<0.000000e+00> : vector<8x32xf32>
    %281 = tpu.matmul %278, %280, %cst_132 {dimension_numbers = #tpu.dot_dimension_numbers<[1], [0], [0], [1], [0, 0, 1, 1], [], []>} : vector<8x8xbf16>, vector<8x32xbf16>, vector<8x32xf32> -> vector<8x32xf32>
    %282 = arith.addf %251, %281 : vector<8x32xf32>
    %283 = vector.extract_strided_slice %188 {offsets = [0, 24], sizes = [8, 8], strides = [1, 1]} : vector<8x32xf32> to vector<8x8xf32>
    %284 = vector.extract_strided_slice %189 {offsets = [0, 24], sizes = [8, 8], strides = [1, 1]} : vector<8x32xf32> to vector<8x8xf32>
    %285 = vector.extract_strided_slice %190 {offsets = [0, 24], sizes = [8, 8], strides = [1, 1]} : vector<8x32xf32> to vector<8x8xf32>
    %286 = arith.truncf %283 : vector<8x8xf32> to vector<8x8xbf16>
    %287 = arith.truncf %284 : vector<8x8xf32> to vector<8x8xbf16>
    %cst_133 = arith.constant dense<0.000000e+00> : vector<8x8xf32>
    %288 = tpu.matmul %286, %287, %cst_133 {dimension_numbers = #tpu.dot_dimension_numbers<[1], [1], [0], [0], [0, 0, 1, 0], [], []>} : vector<8x8xbf16>, vector<8x8xbf16>, vector<8x8xf32> -> vector<8x8xf32>
    %cst_134 = arith.constant 0.353553385 : f32
    %289 = vector.broadcast %cst_134 : f32 to vector<8x8xf32>
    %290 = arith.mulf %288, %289 : vector<8x8xf32>
    %cst_135 = arith.constant -1.000000e+09 : f32
    %291 = vector.broadcast %cst_135 : f32 to vector<8x8xf32>
    %292 = arith.select %5, %291, %290 : vector<8x8xi1>, vector<8x8xf32>
    %cst_136 = arith.constant dense<0xFF800000> : vector<8xf32>
    %293 = vector.multi_reduction <maximumf>, %292, %cst_136 [1] : vector<8x8xf32> to vector<8xf32>
    %294 = vector.shape_cast %293 : vector<8xf32> to vector<8x1xf32>
    %295 = vector.broadcast %294 : vector<8x1xf32> to vector<8x8xf32>
    %296 = arith.subf %292, %295 : vector<8x8xf32>
    %297 = math.exp %296 : vector<8x8xf32>
    %cst_137 = arith.constant dense<0.000000e+00> : vector<8xf32>
    %298 = vector.multi_reduction <add>, %297, %cst_137 [1] : vector<8x8xf32> to vector<8xf32>
    %299 = vector.shape_cast %298 : vector<8xf32> to vector<8x1xf32>
    %300 = tpu.reciprocal %299 {approx = true} : vector<8x1xf32> -> vector<8x1xf32>
    %301 = vector.broadcast %300 : vector<8x1xf32> to vector<8x8xf32>
    %302 = arith.mulf %297, %301 : vector<8x8xf32>
    %c0_138 = arith.constant 0 : index
    %c3_139 = arith.constant 3 : index
    %c0_140 = arith.constant 0 : index
    %c0_141 = arith.constant 0 : index
    %303 = vector.load %arg9[%c0_138, %c3_139, %c0_140, %c0_141] : memref<1x4x8x8xf32, #tpu.memory_space<vmem>>, vector<1x1x8x8xf32>
    %304 = vector.shape_cast %303 : vector<1x1x8x8xf32> to vector<8x8xf32>
    %305 = vector.shape_cast %302 : vector<8x8xf32> to vector<1x1x8x8xf32>
    tpu.vector_store %arg9[%c0_138, %c3_139, %c0_140, %c0_141], %305 {strides = array<i32>} : memref<1x4x8x8xf32, #tpu.memory_space<vmem>>, vector<1x1x8x8xf32>,
    %306 = arith.truncf %302 : vector<8x8xf32> to vector<8x8xbf16>
    %307 = arith.truncf %285 : vector<8x8xf32> to vector<8x8xbf16>
    %cst_142 = arith.constant dense<0.000000e+00> : vector<8x8xf32>
    %308 = tpu.matmul %306, %307, %cst_142 {dimension_numbers = #tpu.dot_dimension_numbers<[1], [0], [0], [1], [0, 0, 1, 1], [], []>} : vector<8x8xbf16>, vector<8x8xbf16>, vector<8x8xf32> -> vector<8x8xf32>
    %309 = arith.truncf %308 : vector<8x8xf32> to vector<8x8xbf16>
    %c1_143 = arith.constant 1 : index
    %c3_144 = arith.constant 3 : index
    %c0_145 = arith.constant 0 : index
    %c0_146 = arith.constant 0 : index
    %310 = vector.load %arg4[%c1_143, %c3_144, %c0_145, %c0_146] : memref<2x4x8x32xbf16, #tpu.memory_space<vmem>>, vector<1x1x8x32xbf16>
    %311 = vector.shape_cast %310 : vector<1x1x8x32xbf16> to vector<8x32xbf16>
    %cst_147 = arith.constant dense<0.000000e+00> : vector<8x32xf32>
    %312 = tpu.matmul %309, %311, %cst_147 {dimension_numbers = #tpu.dot_dimension_numbers<[1], [0], [0], [1], [0, 0, 1, 1], [], []>} : vector<8x8xbf16>, vector<8x32xbf16>, vector<8x32xf32> -> vector<8x32xf32>
    %313 = arith.addf %282, %312 : vector<8x32xf32>
    %314 = arith.addf %313, %183 : vector<8x32xf32>
    %cst_148 = arith.constant dense<0.000000e+00> : vector<8xf32>
    %315 = vector.multi_reduction <add>, %314, %cst_148 [1] : vector<8x32xf32> to vector<8xf32>
    %316 = vector.shape_cast %315 : vector<8xf32> to vector<8x1xf32>
    %cst_149 = arith.constant 3.200000e+01 : f32
    %317 = vector.broadcast %cst_149 : f32 to vector<8x1xf32>
    %318 = arith.divf %316, %317 : vector<8x1xf32>
    %319 = vector.broadcast %318 : vector<8x1xf32> to vector<8x32xf32>
    %320 = arith.subf %314, %319 : vector<8x32xf32>
    %321 = arith.mulf %320, %320 : vector<8x32xf32>
    %cst_150 = arith.constant dense<0.000000e+00> : vector<8xf32>
    %322 = vector.multi_reduction <add>, %321, %cst_150 [1] : vector<8x32xf32> to vector<8xf32>
    %323 = vector.shape_cast %322 : vector<8xf32> to vector<8x1xf32>
    %cst_151 = arith.constant 3.200000e+01 : f32
    %324 = vector.broadcast %cst_151 : f32 to vector<8x1xf32>
    %325 = arith.divf %323, %324 : vector<8x1xf32>
    %326 = vector.broadcast %318 : vector<8x1xf32> to vector<8x32xf32>
    %327 = arith.subf %314, %326 : vector<8x32xf32>
    %cst_152 = arith.constant 9.99999974E-6 : f32
    %328 = vector.broadcast %cst_152 : f32 to vector<8x1xf32>
    %329 = arith.addf %325, %328 : vector<8x1xf32>
    %330 = math.rsqrt %329 : vector<8x1xf32>
    %331 = vector.broadcast %330 : vector<8x1xf32> to vector<8x32xf32>
    %332 = arith.mulf %327, %331 : vector<8x32xf32>
    %333 = arith.truncf %332 : vector<8x32xf32> to vector<8x32xbf16>
    %c1_153 = arith.constant 1 : index
    %c0_154 = arith.constant 0 : index
    %c0_155 = arith.constant 0 : index
    %334 = vector.load %arg5[%c1_153, %c0_154, %c0_155] : memref<2x32x64xbf16, #tpu.memory_space<vmem>>, vector<1x32x64xbf16>
    %335 = vector.shape_cast %334 : vector<1x32x64xbf16> to vector<32x64xbf16>
    %cst_156 = arith.constant dense<0.000000e+00> : vector<8x64xf32>
    %336 = tpu.matmul %333, %335, %cst_156 {dimension_numbers = #tpu.dot_dimension_numbers<[1], [0], [0], [1], [0, 0, 1, 1], [], []>} : vector<8x32xbf16>, vector<32x64xbf16>, vector<8x64xf32> -> vector<8x64xf32>
    %cst_157 = arith.constant 0.000000e+00 : f32
    %337 = vector.broadcast %cst_157 : f32 to vector<8x64xf32>
    %338 = arith.maximumf %336, %337 : vector<8x64xf32>
    %339 = arith.truncf %338 : vector<8x64xf32> to vector<8x64xbf16>
    %c1_158 = arith.constant 1 : index
    %c0_159 = arith.constant 0 : index
    %c0_160 = arith.constant 0 : index
    %340 = vector.load %arg6[%c1_158, %c0_159, %c0_160] : memref<2x64x32xbf16, #tpu.memory_space<vmem>>, vector<1x64x32xbf16>
    %341 = vector.shape_cast %340 : vector<1x64x32xbf16> to vector<64x32xbf16>
    %cst_161 = arith.constant dense<0.000000e+00> : vector<8x32xf32>
    %342 = tpu.matmul %339, %341, %cst_161 {dimension_numbers = #tpu.dot_dimension_numbers<[1], [0], [0], [1], [0, 0, 1, 1], [], []>} : vector<8x64xbf16>, vector<64x32xbf16>, vector<8x32xf32> -> vector<8x32xf32>
    %343 = arith.addf %342, %332 : vector<8x32xf32>
    %cst_162 = arith.constant dense<0.000000e+00> : vector<8xf32>
    %344 = vector.multi_reduction <add>, %343, %cst_162 [1] : vector<8x32xf32> to vector<8xf32>
    %345 = vector.shape_cast %344 : vector<8xf32> to vector<8x1xf32>
    %cst_163 = arith.constant 3.200000e+01 : f32
    %346 = vector.broadcast %cst_163 : f32 to vector<8x1xf32>
    %347 = arith.divf %345, %346 : vector<8x1xf32>
    %348 = vector.broadcast %347 : vector<8x1xf32> to vector<8x32xf32>
    %349 = arith.subf %343, %348 : vector<8x32xf32>
    %350 = arith.mulf %349, %349 : vector<8x32xf32>
    %cst_164 = arith.constant dense<0.000000e+00> : vector<8xf32>
    %351 = vector.multi_reduction <add>, %350, %cst_164 [1] : vector<8x32xf32> to vector<8xf32>
    %352 = vector.shape_cast %351 : vector<8xf32> to vector<8x1xf32>
    %cst_165 = arith.constant 3.200000e+01 : f32
    %353 = vector.broadcast %cst_165 : f32 to vector<8x1xf32>
    %354 = arith.divf %352, %353 : vector<8x1xf32>
    %355 = vector.broadcast %347 : vector<8x1xf32> to vector<8x32xf32>
    %356 = arith.subf %343, %355 : vector<8x32xf32>
    %cst_166 = arith.constant 9.99999974E-6 : f32
    %357 = vector.broadcast %cst_166 : f32 to vector<8x1xf32>
    %358 = arith.addf %354, %357 : vector<8x1xf32>
    %359 = math.rsqrt %358 : vector<8x1xf32>
    %360 = vector.broadcast %359 : vector<8x1xf32> to vector<8x32xf32>
    %361 = arith.mulf %356, %360 : vector<8x32xf32>
    %c0_167 = arith.constant 0 : index
    %c0_168 = arith.constant 0 : index
    %c0_169 = arith.constant 0 : index
    %362 = vector.load %arg7[%c0_167, %c0_168, %c0_169] : memref<1x8x32xf32, #tpu.memory_space<vmem>>, vector<1x8x32xf32>
    %363 = vector.shape_cast %362 : vector<1x8x32xf32> to vector<8x32xf32>
    %364 = vector.shape_cast %361 : vector<8x32xf32> to vector<1x8x32xf32>
    tpu.vector_store %arg7[%c0_167, %c0_168, %c0_169], %364 {strides = array<i32>} : memref<1x8x32xf32, #tpu.memory_space<vmem>>, vector<1x8x32xf32>,
    return
  }
  func.func @transform_0(%arg0: i32) -> (i32, i32, i32) {
    %c0_i32 = arith.constant 0 : i32
    %c0_i32_0 = arith.constant 0 : i32
    %c0_i32_1 = arith.constant 0 : i32
    return %arg0, %c0_i32, %c0_i32_0 : i32, i32, i32
  }
  func.func @transform_1(%arg0: i32) -> (i32, i32, i32) {
    %c0_i32 = arith.constant 0 : i32
    %c0_i32_0 = arith.constant 0 : i32
    %c0_i32_1 = arith.constant 0 : i32
    return %arg0, %c0_i32, %c0_i32_0 : i32, i32, i32
  }
  func.func @transform_2(%arg0: i32) -> (i32, i32, i32) {
    %c0_i32 = arith.constant 0 : i32
    %c0_i32_0 = arith.constant 0 : i32
    %c0_i32_1 = arith.constant 0 : i32
    %c0_i32_2 = arith.constant 0 : i32
    return %c0_i32, %c0_i32_0, %c0_i32_1 : i32, i32, i32
  }
  func.func @transform_3(%arg0: i32) -> (i32, i32, i32, i32) {
    %c0_i32 = arith.constant 0 : i32
    %c0_i32_0 = arith.constant 0 : i32
    %c0_i32_1 = arith.constant 0 : i32
    %c0_i32_2 = arith.constant 0 : i32
    %c0_i32_3 = arith.constant 0 : i32
    return %c0_i32, %c0_i32_0, %c0_i32_1, %c0_i32_2 : i32, i32, i32, i32
  }
  func.func @transform_4(%arg0: i32) -> (i32, i32, i32) {
    %c0_i32 = arith.constant 0 : i32
    %c0_i32_0 = arith.constant 0 : i32
    %c0_i32_1 = arith.constant 0 : i32
    %c0_i32_2 = arith.constant 0 : i32
    return %c0_i32, %c0_i32_0, %c0_i32_1 : i32, i32, i32
  }
  func.func @transform_5(%arg0: i32) -> (i32, i32, i32) {
    %c0_i32 = arith.constant 0 : i32
    %c0_i32_0 = arith.constant 0 : i32
    %c0_i32_1 = arith.constant 0 : i32
    %c0_i32_2 = arith.constant 0 : i32
    return %c0_i32, %c0_i32_0, %c0_i32_1 : i32, i32, i32
  }
  func.func @transform_6(%arg0: i32) -> (i32, i32, i32) {
    %c0_i32 = arith.constant 0 : i32
    %c0_i32_0 = arith.constant 0 : i32
    %c0_i32_1 = arith.constant 0 : i32
    return %arg0, %c0_i32, %c0_i32_0 : i32, i32, i32
  }
  func.func @transform_7(%arg0: i32) -> (i32, i32, i32, i32) {
    %c0_i32 = arith.constant 0 : i32
    %c0_i32_0 = arith.constant 0 : i32
    %c0_i32_1 = arith.constant 0 : i32
    %c0_i32_2 = arith.constant 0 : i32
    return %arg0, %c0_i32, %c0_i32_0, %c0_i32_1 : i32, i32, i32, i32
  }
  func.func @transform_8(%arg0: i32) -> (i32, i32, i32, i32) {
    %c0_i32 = arith.constant 0 : i32
    %c0_i32_0 = arith.constant 0 : i32
    %c0_i32_1 = arith.constant 0 : i32
    %c0_i32_2 = arith.constant 0 : i32
    return %arg0, %c0_i32, %c0_i32_0, %c0_i32_1 : i32, i32, i32, i32
  }
}

module attributes {stable_mosaic.version = 11 : i64} {
  func.func @_decoder_kernel(%arg0: i32, %arg1: memref<1x8x32xf32, #tpu.memory_space<vmem>>, %arg2: memref<1x8x32xf32, #tpu.memory_space<vmem>>, %arg3: memref<1x8x8xi32, #tpu.memory_space<vmem>>, %arg4: memref<1x8x8xi32, #tpu.memory_space<vmem>>, %arg5: memref<2x32x96xbf16, #tpu.memory_space<vmem>>, %arg6: memref<2x4x8x32xbf16, #tpu.memory_space<vmem>>, %arg7: memref<2x32x32xbf16, #tpu.memory_space<vmem>>, %arg8: memref<2x32x64xbf16, #tpu.memory_space<vmem>>, %arg9: memref<2x4x8x32xbf16, #tpu.memory_space<vmem>>, %arg10: memref<2x32x64xbf16, #tpu.memory_space<vmem>>, %arg11: memref<2x64x32xbf16, #tpu.memory_space<vmem>>, %arg12: memref<32x16xbf16, #tpu.memory_space<vmem>>, %arg13: memref<1x8x16xf32, #tpu.memory_space<vmem>>, %arg14: memref<1x4x8x8xf32, #tpu.memory_space<vmem>>, %arg15: memref<1x4x8x8xf32, #tpu.memory_space<vmem>>, %arg16: memref<1x4x8x8xf32, #tpu.memory_space<vmem>>, %arg17: memref<1x4x8x8xf32, #tpu.memory_space<vmem>>) attributes {dimension_semantics = [#tpu.dimension_semantics<parallel>], iteration_bounds = array<i64: 2>, scalar_prefetch = 0 : i64, scratch_operands = 0 : i64, tpu.core_type = #tpu.core_type<tc>, window_params = [{transform_indices = @transform_0, window_bounds = array<i64: 1, 8, 32>}, {transform_indices = @transform_1, window_bounds = array<i64: 1, 8, 32>}, {transform_indices = @transform_2, window_bounds = array<i64: 1, 8, 8>}, {transform_indices = @transform_3, window_bounds = array<i64: 1, 8, 8>}, {pipeline_mode = #tpu.pipeline_mode<synchronous>, transform_indices = @transform_4, window_bounds = array<i64: 2, 32, 96>}, {pipeline_mode = #tpu.pipeline_mode<synchronous>, transform_indices = @transform_5, window_bounds = array<i64: 2, 4, 8, 32>}, {pipeline_mode = #tpu.pipeline_mode<synchronous>, transform_indices = @transform_6, window_bounds = array<i64: 2, 32, 32>}, {pipeline_mode = #tpu.pipeline_mode<synchronous>, transform_indices = @transform_7, window_bounds = array<i64: 2, 32, 64>}, {pipeline_mode = #tpu.pipeline_mode<synchronous>, transform_indices = @transform_8, window_bounds = array<i64: 2, 4, 8, 32>}, {pipeline_mode = #tpu.pipeline_mode<synchronous>, transform_indices = @transform_9, window_bounds = array<i64: 2, 32, 64>}, {pipeline_mode = #tpu.pipeline_mode<synchronous>, transform_indices = @transform_10, window_bounds = array<i64: 2, 64, 32>}, {pipeline_mode = #tpu.pipeline_mode<synchronous>, transform_indices = @transform_11, window_bounds = array<i64: 32, 16>}, {transform_indices = @transform_12, window_bounds = array<i64: 1, 8, 16>}, {transform_indices = @transform_13, window_bounds = array<i64: 1, 4, 8, 8>}, {transform_indices = @transform_14, window_bounds = array<i64: 1, 4, 8, 8>}, {transform_indices = @transform_15, window_bounds = array<i64: 1, 4, 8, 8>}, {transform_indices = @transform_16, window_bounds = array<i64: 1, 4, 8, 8>}]} {
    %c0 = arith.constant 0 : index
    %c0_0 = arith.constant 0 : index
    %c0_1 = arith.constant 0 : index
    %0 = vector.load %arg1[%c0, %c0_0, %c0_1] : memref<1x8x32xf32, #tpu.memory_space<vmem>>, vector<1x8x32xf32>
    %1 = vector.shape_cast %0 : vector<1x8x32xf32> to vector<8x32xf32>
    %c0_2 = arith.constant 0 : index
    %c0_3 = arith.constant 0 : index
    %c0_4 = arith.constant 0 : index
    %2 = vector.load %arg2[%c0_2, %c0_3, %c0_4] : memref<1x8x32xf32, #tpu.memory_space<vmem>>, vector<1x8x32xf32>
    %3 = vector.shape_cast %2 : vector<1x8x32xf32> to vector<8x32xf32>
    %4 = arith.truncf %3 : vector<8x32xf32> to vector<8x32xbf16>
    %c0_5 = arith.constant 0 : index
    %c0_6 = arith.constant 0 : index
    %c0_7 = arith.constant 0 : index
    %5 = vector.load %arg3[%c0_5, %c0_6, %c0_7] : memref<1x8x8xi32, #tpu.memory_space<vmem>>, vector<1x8x8xi32>
    %6 = vector.shape_cast %5 : vector<1x8x8xi32> to vector<8x8xi32>
    %c0_i32 = arith.constant 0 : i32
    %7 = vector.broadcast %c0_i32 : i32 to vector<8x8xi32>
    %8 = arith.cmpi sgt, %6, %7 : vector<8x8xi32>
    %c0_8 = arith.constant 0 : index
    %c0_9 = arith.constant 0 : index
    %c0_10 = arith.constant 0 : index
    %9 = vector.load %arg4[%c0_8, %c0_9, %c0_10] : memref<1x8x8xi32, #tpu.memory_space<vmem>>, vector<1x8x8xi32>
    %10 = vector.shape_cast %9 : vector<1x8x8xi32> to vector<8x8xi32>
    %c0_i32_11 = arith.constant 0 : i32
    %11 = vector.broadcast %c0_i32_11 : i32 to vector<8x8xi32>
    %12 = arith.cmpi sgt, %10, %11 : vector<8x8xi32>
    %13 = arith.truncf %1 : vector<8x32xf32> to vector<8x32xbf16>
    %c0_12 = arith.constant 0 : index
    %c0_13 = arith.constant 0 : index
    %c0_14 = arith.constant 0 : index
    %14 = vector.load %arg5[%c0_12, %c0_13, %c0_14] : memref<2x32x96xbf16, #tpu.memory_space<vmem>>, vector<1x32x96xbf16>
    %15 = vector.shape_cast %14 : vector<1x32x96xbf16> to vector<32x96xbf16>
    %cst = arith.constant dense<0.000000e+00> : vector<8x96xf32>
    %16 = tpu.matmul %13, %15, %cst {dimension_numbers = #tpu.dot_dimension_numbers<[1], [0], [0], [1], [0, 0, 1, 1], [], []>} : vector<8x32xbf16>, vector<32x96xbf16>, vector<8x96xf32> -> vector<8x96xf32>
    %17 = vector.extract_strided_slice %16 {offsets = [0, 0], sizes = [8, 32], strides = [1, 1]} : vector<8x96xf32> to vector<8x32xf32>
    %18 = vector.extract_strided_slice %16 {offsets = [0, 32], sizes = [8, 32], strides = [1, 1]} : vector<8x96xf32> to vector<8x32xf32>
    %19 = vector.extract_strided_slice %16 {offsets = [0, 64], sizes = [8, 32], strides = [1, 1]} : vector<8x96xf32> to vector<8x32xf32>
    %20 = vector.extract_strided_slice %17 {offsets = [0, 0], sizes = [8, 8], strides = [1, 1]} : vector<8x32xf32> to vector<8x8xf32>
    %21 = vector.extract_strided_slice %18 {offsets = [0, 0], sizes = [8, 8], strides = [1, 1]} : vector<8x32xf32> to vector<8x8xf32>
    %22 = vector.extract_strided_slice %19 {offsets = [0, 0], sizes = [8, 8], strides = [1, 1]} : vector<8x32xf32> to vector<8x8xf32>
    %23 = arith.truncf %20 : vector<8x8xf32> to vector<8x8xbf16>
    %24 = arith.truncf %21 : vector<8x8xf32> to vector<8x8xbf16>
    %cst_15 = arith.constant dense<0.000000e+00> : vector<8x8xf32>
    %25 = tpu.matmul %23, %24, %cst_15 {dimension_numbers = #tpu.dot_dimension_numbers<[1], [1], [0], [0], [0, 0, 1, 0], [], []>} : vector<8x8xbf16>, vector<8x8xbf16>, vector<8x8xf32> -> vector<8x8xf32>
    %cst_16 = arith.constant 0.353553385 : f32
    %26 = vector.broadcast %cst_16 : f32 to vector<8x8xf32>
    %27 = arith.mulf %25, %26 : vector<8x8xf32>
    %cst_17 = arith.constant -1.000000e+09 : f32
    %28 = vector.broadcast %cst_17 : f32 to vector<8x8xf32>
    %29 = arith.select %8, %28, %27 : vector<8x8xi1>, vector<8x8xf32>
    %cst_18 = arith.constant dense<0xFF800000> : vector<8xf32>
    %30 = vector.multi_reduction <maximumf>, %29, %cst_18 [1] : vector<8x8xf32> to vector<8xf32>
    %31 = vector.shape_cast %30 : vector<8xf32> to vector<8x1xf32>
    %32 = vector.broadcast %31 : vector<8x1xf32> to vector<8x8xf32>
    %33 = arith.subf %29, %32 : vector<8x8xf32>
    %34 = math.exp %33 : vector<8x8xf32>
    %cst_19 = arith.constant dense<0.000000e+00> : vector<8xf32>
    %35 = vector.multi_reduction <add>, %34, %cst_19 [1] : vector<8x8xf32> to vector<8xf32>
    %36 = vector.shape_cast %35 : vector<8xf32> to vector<8x1xf32>
    %37 = tpu.reciprocal %36 {approx = true} : vector<8x1xf32> -> vector<8x1xf32>
    %38 = vector.broadcast %37 : vector<8x1xf32> to vector<8x8xf32>
    %39 = arith.mulf %34, %38 : vector<8x8xf32>
    %c0_20 = arith.constant 0 : index
    %c0_21 = arith.constant 0 : index
    %c0_22 = arith.constant 0 : index
    %c0_23 = arith.constant 0 : index
    %40 = vector.load %arg14[%c0_20, %c0_21, %c0_22, %c0_23] : memref<1x4x8x8xf32, #tpu.memory_space<vmem>>, vector<1x1x8x8xf32>
    %41 = vector.shape_cast %40 : vector<1x1x8x8xf32> to vector<8x8xf32>
    %42 = vector.shape_cast %39 : vector<8x8xf32> to vector<1x1x8x8xf32>
    tpu.vector_store %arg14[%c0_20, %c0_21, %c0_22, %c0_23], %42 {strides = array<i32>} : memref<1x4x8x8xf32, #tpu.memory_space<vmem>>, vector<1x1x8x8xf32>,
    %43 = arith.truncf %39 : vector<8x8xf32> to vector<8x8xbf16>
    %44 = arith.truncf %22 : vector<8x8xf32> to vector<8x8xbf16>
    %cst_24 = arith.constant dense<0.000000e+00> : vector<8x8xf32>
    %45 = tpu.matmul %43, %44, %cst_24 {dimension_numbers = #tpu.dot_dimension_numbers<[1], [0], [0], [1], [0, 0, 1, 1], [], []>} : vector<8x8xbf16>, vector<8x8xbf16>, vector<8x8xf32> -> vector<8x8xf32>
    %46 = arith.truncf %45 : vector<8x8xf32> to vector<8x8xbf16>
    %c0_25 = arith.constant 0 : index
    %c0_26 = arith.constant 0 : index
    %c0_27 = arith.constant 0 : index
    %c0_28 = arith.constant 0 : index
    %47 = vector.load %arg6[%c0_25, %c0_26, %c0_27, %c0_28] : memref<2x4x8x32xbf16, #tpu.memory_space<vmem>>, vector<1x1x8x32xbf16>
    %48 = vector.shape_cast %47 : vector<1x1x8x32xbf16> to vector<8x32xbf16>
    %cst_29 = arith.constant dense<0.000000e+00> : vector<8x32xf32>
    %49 = tpu.matmul %46, %48, %cst_29 {dimension_numbers = #tpu.dot_dimension_numbers<[1], [0], [0], [1], [0, 0, 1, 1], [], []>} : vector<8x8xbf16>, vector<8x32xbf16>, vector<8x32xf32> -> vector<8x32xf32>
    %50 = vector.extract_strided_slice %17 {offsets = [0, 8], sizes = [8, 8], strides = [1, 1]} : vector<8x32xf32> to vector<8x8xf32>
    %51 = vector.extract_strided_slice %18 {offsets = [0, 8], sizes = [8, 8], strides = [1, 1]} : vector<8x32xf32> to vector<8x8xf32>
    %52 = vector.extract_strided_slice %19 {offsets = [0, 8], sizes = [8, 8], strides = [1, 1]} : vector<8x32xf32> to vector<8x8xf32>
    %53 = arith.truncf %50 : vector<8x8xf32> to vector<8x8xbf16>
    %54 = arith.truncf %51 : vector<8x8xf32> to vector<8x8xbf16>
    %cst_30 = arith.constant dense<0.000000e+00> : vector<8x8xf32>
    %55 = tpu.matmul %53, %54, %cst_30 {dimension_numbers = #tpu.dot_dimension_numbers<[1], [1], [0], [0], [0, 0, 1, 0], [], []>} : vector<8x8xbf16>, vector<8x8xbf16>, vector<8x8xf32> -> vector<8x8xf32>
    %cst_31 = arith.constant 0.353553385 : f32
    %56 = vector.broadcast %cst_31 : f32 to vector<8x8xf32>
    %57 = arith.mulf %55, %56 : vector<8x8xf32>
    %cst_32 = arith.constant -1.000000e+09 : f32
    %58 = vector.broadcast %cst_32 : f32 to vector<8x8xf32>
    %59 = arith.select %8, %58, %57 : vector<8x8xi1>, vector<8x8xf32>
    %cst_33 = arith.constant dense<0xFF800000> : vector<8xf32>
    %60 = vector.multi_reduction <maximumf>, %59, %cst_33 [1] : vector<8x8xf32> to vector<8xf32>
    %61 = vector.shape_cast %60 : vector<8xf32> to vector<8x1xf32>
    %62 = vector.broadcast %61 : vector<8x1xf32> to vector<8x8xf32>
    %63 = arith.subf %59, %62 : vector<8x8xf32>
    %64 = math.exp %63 : vector<8x8xf32>
    %cst_34 = arith.constant dense<0.000000e+00> : vector<8xf32>
    %65 = vector.multi_reduction <add>, %64, %cst_34 [1] : vector<8x8xf32> to vector<8xf32>
    %66 = vector.shape_cast %65 : vector<8xf32> to vector<8x1xf32>
    %67 = tpu.reciprocal %66 {approx = true} : vector<8x1xf32> -> vector<8x1xf32>
    %68 = vector.broadcast %67 : vector<8x1xf32> to vector<8x8xf32>
    %69 = arith.mulf %64, %68 : vector<8x8xf32>
    %c0_35 = arith.constant 0 : index
    %c1 = arith.constant 1 : index
    %c0_36 = arith.constant 0 : index
    %c0_37 = arith.constant 0 : index
    %70 = vector.load %arg14[%c0_35, %c1, %c0_36, %c0_37] : memref<1x4x8x8xf32, #tpu.memory_space<vmem>>, vector<1x1x8x8xf32>
    %71 = vector.shape_cast %70 : vector<1x1x8x8xf32> to vector<8x8xf32>
    %72 = vector.shape_cast %69 : vector<8x8xf32> to vector<1x1x8x8xf32>
    tpu.vector_store %arg14[%c0_35, %c1, %c0_36, %c0_37], %72 {strides = array<i32>} : memref<1x4x8x8xf32, #tpu.memory_space<vmem>>, vector<1x1x8x8xf32>,
    %73 = arith.truncf %69 : vector<8x8xf32> to vector<8x8xbf16>
    %74 = arith.truncf %52 : vector<8x8xf32> to vector<8x8xbf16>
    %cst_38 = arith.constant dense<0.000000e+00> : vector<8x8xf32>
    %75 = tpu.matmul %73, %74, %cst_38 {dimension_numbers = #tpu.dot_dimension_numbers<[1], [0], [0], [1], [0, 0, 1, 1], [], []>} : vector<8x8xbf16>, vector<8x8xbf16>, vector<8x8xf32> -> vector<8x8xf32>
    %76 = arith.truncf %75 : vector<8x8xf32> to vector<8x8xbf16>
    %c0_39 = arith.constant 0 : index
    %c1_40 = arith.constant 1 : index
    %c0_41 = arith.constant 0 : index
    %c0_42 = arith.constant 0 : index
    %77 = vector.load %arg6[%c0_39, %c1_40, %c0_41, %c0_42] : memref<2x4x8x32xbf16, #tpu.memory_space<vmem>>, vector<1x1x8x32xbf16>
    %78 = vector.shape_cast %77 : vector<1x1x8x32xbf16> to vector<8x32xbf16>
    %cst_43 = arith.constant dense<0.000000e+00> : vector<8x32xf32>
    %79 = tpu.matmul %76, %78, %cst_43 {dimension_numbers = #tpu.dot_dimension_numbers<[1], [0], [0], [1], [0, 0, 1, 1], [], []>} : vector<8x8xbf16>, vector<8x32xbf16>, vector<8x32xf32> -> vector<8x32xf32>
    %80 = arith.addf %49, %79 : vector<8x32xf32>
    %81 = vector.extract_strided_slice %17 {offsets = [0, 16], sizes = [8, 8], strides = [1, 1]} : vector<8x32xf32> to vector<8x8xf32>
    %82 = vector.extract_strided_slice %18 {offsets = [0, 16], sizes = [8, 8], strides = [1, 1]} : vector<8x32xf32> to vector<8x8xf32>
    %83 = vector.extract_strided_slice %19 {offsets = [0, 16], sizes = [8, 8], strides = [1, 1]} : vector<8x32xf32> to vector<8x8xf32>
    %84 = arith.truncf %81 : vector<8x8xf32> to vector<8x8xbf16>
    %85 = arith.truncf %82 : vector<8x8xf32> to vector<8x8xbf16>
    %cst_44 = arith.constant dense<0.000000e+00> : vector<8x8xf32>
    %86 = tpu.matmul %84, %85, %cst_44 {dimension_numbers = #tpu.dot_dimension_numbers<[1], [1], [0], [0], [0, 0, 1, 0], [], []>} : vector<8x8xbf16>, vector<8x8xbf16>, vector<8x8xf32> -> vector<8x8xf32>
    %cst_45 = arith.constant 0.353553385 : f32
    %87 = vector.broadcast %cst_45 : f32 to vector<8x8xf32>
    %88 = arith.mulf %86, %87 : vector<8x8xf32>
    %cst_46 = arith.constant -1.000000e+09 : f32
    %89 = vector.broadcast %cst_46 : f32 to vector<8x8xf32>
    %90 = arith.select %8, %89, %88 : vector<8x8xi1>, vector<8x8xf32>
    %cst_47 = arith.constant dense<0xFF800000> : vector<8xf32>
    %91 = vector.multi_reduction <maximumf>, %90, %cst_47 [1] : vector<8x8xf32> to vector<8xf32>
    %92 = vector.shape_cast %91 : vector<8xf32> to vector<8x1xf32>
    %93 = vector.broadcast %92 : vector<8x1xf32> to vector<8x8xf32>
    %94 = arith.subf %90, %93 : vector<8x8xf32>
    %95 = math.exp %94 : vector<8x8xf32>
    %cst_48 = arith.constant dense<0.000000e+00> : vector<8xf32>
    %96 = vector.multi_reduction <add>, %95, %cst_48 [1] : vector<8x8xf32> to vector<8xf32>
    %97 = vector.shape_cast %96 : vector<8xf32> to vector<8x1xf32>
    %98 = tpu.reciprocal %97 {approx = true} : vector<8x1xf32> -> vector<8x1xf32>
    %99 = vector.broadcast %98 : vector<8x1xf32> to vector<8x8xf32>
    %100 = arith.mulf %95, %99 : vector<8x8xf32>
    %c0_49 = arith.constant 0 : index
    %c2 = arith.constant 2 : index
    %c0_50 = arith.constant 0 : index
    %c0_51 = arith.constant 0 : index
    %101 = vector.load %arg14[%c0_49, %c2, %c0_50, %c0_51] : memref<1x4x8x8xf32, #tpu.memory_space<vmem>>, vector<1x1x8x8xf32>
    %102 = vector.shape_cast %101 : vector<1x1x8x8xf32> to vector<8x8xf32>
    %103 = vector.shape_cast %100 : vector<8x8xf32> to vector<1x1x8x8xf32>
    tpu.vector_store %arg14[%c0_49, %c2, %c0_50, %c0_51], %103 {strides = array<i32>} : memref<1x4x8x8xf32, #tpu.memory_space<vmem>>, vector<1x1x8x8xf32>,
    %104 = arith.truncf %100 : vector<8x8xf32> to vector<8x8xbf16>
    %105 = arith.truncf %83 : vector<8x8xf32> to vector<8x8xbf16>
    %cst_52 = arith.constant dense<0.000000e+00> : vector<8x8xf32>
    %106 = tpu.matmul %104, %105, %cst_52 {dimension_numbers = #tpu.dot_dimension_numbers<[1], [0], [0], [1], [0, 0, 1, 1], [], []>} : vector<8x8xbf16>, vector<8x8xbf16>, vector<8x8xf32> -> vector<8x8xf32>
    %107 = arith.truncf %106 : vector<8x8xf32> to vector<8x8xbf16>
    %c0_53 = arith.constant 0 : index
    %c2_54 = arith.constant 2 : index
    %c0_55 = arith.constant 0 : index
    %c0_56 = arith.constant 0 : index
    %108 = vector.load %arg6[%c0_53, %c2_54, %c0_55, %c0_56] : memref<2x4x8x32xbf16, #tpu.memory_space<vmem>>, vector<1x1x8x32xbf16>
    %109 = vector.shape_cast %108 : vector<1x1x8x32xbf16> to vector<8x32xbf16>
    %cst_57 = arith.constant dense<0.000000e+00> : vector<8x32xf32>
    %110 = tpu.matmul %107, %109, %cst_57 {dimension_numbers = #tpu.dot_dimension_numbers<[1], [0], [0], [1], [0, 0, 1, 1], [], []>} : vector<8x8xbf16>, vector<8x32xbf16>, vector<8x32xf32> -> vector<8x32xf32>
    %111 = arith.addf %80, %110 : vector<8x32xf32>
    %112 = vector.extract_strided_slice %17 {offsets = [0, 24], sizes = [8, 8], strides = [1, 1]} : vector<8x32xf32> to vector<8x8xf32>
    %113 = vector.extract_strided_slice %18 {offsets = [0, 24], sizes = [8, 8], strides = [1, 1]} : vector<8x32xf32> to vector<8x8xf32>
    %114 = vector.extract_strided_slice %19 {offsets = [0, 24], sizes = [8, 8], strides = [1, 1]} : vector<8x32xf32> to vector<8x8xf32>
    %115 = arith.truncf %112 : vector<8x8xf32> to vector<8x8xbf16>
    %116 = arith.truncf %113 : vector<8x8xf32> to vector<8x8xbf16>
    %cst_58 = arith.constant dense<0.000000e+00> : vector<8x8xf32>
    %117 = tpu.matmul %115, %116, %cst_58 {dimension_numbers = #tpu.dot_dimension_numbers<[1], [1], [0], [0], [0, 0, 1, 0], [], []>} : vector<8x8xbf16>, vector<8x8xbf16>, vector<8x8xf32> -> vector<8x8xf32>
    %cst_59 = arith.constant 0.353553385 : f32
    %118 = vector.broadcast %cst_59 : f32 to vector<8x8xf32>
    %119 = arith.mulf %117, %118 : vector<8x8xf32>
    %cst_60 = arith.constant -1.000000e+09 : f32
    %120 = vector.broadcast %cst_60 : f32 to vector<8x8xf32>
    %121 = arith.select %8, %120, %119 : vector<8x8xi1>, vector<8x8xf32>
    %cst_61 = arith.constant dense<0xFF800000> : vector<8xf32>
    %122 = vector.multi_reduction <maximumf>, %121, %cst_61 [1] : vector<8x8xf32> to vector<8xf32>
    %123 = vector.shape_cast %122 : vector<8xf32> to vector<8x1xf32>
    %124 = vector.broadcast %123 : vector<8x1xf32> to vector<8x8xf32>
    %125 = arith.subf %121, %124 : vector<8x8xf32>
    %126 = math.exp %125 : vector<8x8xf32>
    %cst_62 = arith.constant dense<0.000000e+00> : vector<8xf32>
    %127 = vector.multi_reduction <add>, %126, %cst_62 [1] : vector<8x8xf32> to vector<8xf32>
    %128 = vector.shape_cast %127 : vector<8xf32> to vector<8x1xf32>
    %129 = tpu.reciprocal %128 {approx = true} : vector<8x1xf32> -> vector<8x1xf32>
    %130 = vector.broadcast %129 : vector<8x1xf32> to vector<8x8xf32>
    %131 = arith.mulf %126, %130 : vector<8x8xf32>
    %c0_63 = arith.constant 0 : index
    %c3 = arith.constant 3 : index
    %c0_64 = arith.constant 0 : index
    %c0_65 = arith.constant 0 : index
    %132 = vector.load %arg14[%c0_63, %c3, %c0_64, %c0_65] : memref<1x4x8x8xf32, #tpu.memory_space<vmem>>, vector<1x1x8x8xf32>
    %133 = vector.shape_cast %132 : vector<1x1x8x8xf32> to vector<8x8xf32>
    %134 = vector.shape_cast %131 : vector<8x8xf32> to vector<1x1x8x8xf32>
    tpu.vector_store %arg14[%c0_63, %c3, %c0_64, %c0_65], %134 {strides = array<i32>} : memref<1x4x8x8xf32, #tpu.memory_space<vmem>>, vector<1x1x8x8xf32>,
    %135 = arith.truncf %131 : vector<8x8xf32> to vector<8x8xbf16>
    %136 = arith.truncf %114 : vector<8x8xf32> to vector<8x8xbf16>
    %cst_66 = arith.constant dense<0.000000e+00> : vector<8x8xf32>
    %137 = tpu.matmul %135, %136, %cst_66 {dimension_numbers = #tpu.dot_dimension_numbers<[1], [0], [0], [1], [0, 0, 1, 1], [], []>} : vector<8x8xbf16>, vector<8x8xbf16>, vector<8x8xf32> -> vector<8x8xf32>
    %138 = arith.truncf %137 : vector<8x8xf32> to vector<8x8xbf16>
    %c0_67 = arith.constant 0 : index
    %c3_68 = arith.constant 3 : index
    %c0_69 = arith.constant 0 : index
    %c0_70 = arith.constant 0 : index
    %139 = vector.load %arg6[%c0_67, %c3_68, %c0_69, %c0_70] : memref<2x4x8x32xbf16, #tpu.memory_space<vmem>>, vector<1x1x8x32xbf16>
    %140 = vector.shape_cast %139 : vector<1x1x8x32xbf16> to vector<8x32xbf16>
    %cst_71 = arith.constant dense<0.000000e+00> : vector<8x32xf32>
    %141 = tpu.matmul %138, %140, %cst_71 {dimension_numbers = #tpu.dot_dimension_numbers<[1], [0], [0], [1], [0, 0, 1, 1], [], []>} : vector<8x8xbf16>, vector<8x32xbf16>, vector<8x32xf32> -> vector<8x32xf32>
    %142 = arith.addf %111, %141 : vector<8x32xf32>
    %143 = arith.addf %142, %1 : vector<8x32xf32>
    %cst_72 = arith.constant dense<0.000000e+00> : vector<8xf32>
    %144 = vector.multi_reduction <add>, %143, %cst_72 [1] : vector<8x32xf32> to vector<8xf32>
    %145 = vector.shape_cast %144 : vector<8xf32> to vector<8x1xf32>
    %cst_73 = arith.constant 3.200000e+01 : f32
    %146 = vector.broadcast %cst_73 : f32 to vector<8x1xf32>
    %147 = arith.divf %145, %146 : vector<8x1xf32>
    %148 = vector.broadcast %147 : vector<8x1xf32> to vector<8x32xf32>
    %149 = arith.subf %143, %148 : vector<8x32xf32>
    %150 = arith.mulf %149, %149 : vector<8x32xf32>
    %cst_74 = arith.constant dense<0.000000e+00> : vector<8xf32>
    %151 = vector.multi_reduction <add>, %150, %cst_74 [1] : vector<8x32xf32> to vector<8xf32>
    %152 = vector.shape_cast %151 : vector<8xf32> to vector<8x1xf32>
    %cst_75 = arith.constant 3.200000e+01 : f32
    %153 = vector.broadcast %cst_75 : f32 to vector<8x1xf32>
    %154 = arith.divf %152, %153 : vector<8x1xf32>
    %155 = vector.broadcast %147 : vector<8x1xf32> to vector<8x32xf32>
    %156 = arith.subf %143, %155 : vector<8x32xf32>
    %cst_76 = arith.constant 9.99999974E-6 : f32
    %157 = vector.broadcast %cst_76 : f32 to vector<8x1xf32>
    %158 = arith.addf %154, %157 : vector<8x1xf32>
    %159 = math.rsqrt %158 : vector<8x1xf32>
    %160 = vector.broadcast %159 : vector<8x1xf32> to vector<8x32xf32>
    %161 = arith.mulf %156, %160 : vector<8x32xf32>
    %162 = arith.truncf %161 : vector<8x32xf32> to vector<8x32xbf16>
    %c0_77 = arith.constant 0 : index
    %c0_78 = arith.constant 0 : index
    %c0_79 = arith.constant 0 : index
    %163 = vector.load %arg7[%c0_77, %c0_78, %c0_79] : memref<2x32x32xbf16, #tpu.memory_space<vmem>>, vector<1x32x32xbf16>
    %164 = vector.shape_cast %163 : vector<1x32x32xbf16> to vector<32x32xbf16>
    %cst_80 = arith.constant dense<0.000000e+00> : vector<8x32xf32>
    %165 = tpu.matmul %162, %164, %cst_80 {dimension_numbers = #tpu.dot_dimension_numbers<[1], [0], [0], [1], [0, 0, 1, 1], [], []>} : vector<8x32xbf16>, vector<32x32xbf16>, vector<8x32xf32> -> vector<8x32xf32>
    %c0_81 = arith.constant 0 : index
    %c0_82 = arith.constant 0 : index
    %c0_83 = arith.constant 0 : index
    %166 = vector.load %arg8[%c0_81, %c0_82, %c0_83] : memref<2x32x64xbf16, #tpu.memory_space<vmem>>, vector<1x32x64xbf16>
    %167 = vector.shape_cast %166 : vector<1x32x64xbf16> to vector<32x64xbf16>
    %cst_84 = arith.constant dense<0.000000e+00> : vector<8x64xf32>
    %168 = tpu.matmul %4, %167, %cst_84 {dimension_numbers = #tpu.dot_dimension_numbers<[1], [0], [0], [1], [0, 0, 1, 1], [], []>} : vector<8x32xbf16>, vector<32x64xbf16>, vector<8x64xf32> -> vector<8x64xf32>
    %169 = vector.extract_strided_slice %168 {offsets = [0, 0], sizes = [8, 32], strides = [1, 1]} : vector<8x64xf32> to vector<8x32xf32>
    %170 = vector.extract_strided_slice %168 {offsets = [0, 32], sizes = [8, 32], strides = [1, 1]} : vector<8x64xf32> to vector<8x32xf32>
    %171 = vector.extract_strided_slice %165 {offsets = [0, 0], sizes = [8, 8], strides = [1, 1]} : vector<8x32xf32> to vector<8x8xf32>
    %172 = vector.extract_strided_slice %169 {offsets = [0, 0], sizes = [8, 8], strides = [1, 1]} : vector<8x32xf32> to vector<8x8xf32>
    %173 = vector.extract_strided_slice %170 {offsets = [0, 0], sizes = [8, 8], strides = [1, 1]} : vector<8x32xf32> to vector<8x8xf32>
    %174 = arith.truncf %171 : vector<8x8xf32> to vector<8x8xbf16>
    %175 = arith.truncf %172 : vector<8x8xf32> to vector<8x8xbf16>
    %cst_85 = arith.constant dense<0.000000e+00> : vector<8x8xf32>
    %176 = tpu.matmul %174, %175, %cst_85 {dimension_numbers = #tpu.dot_dimension_numbers<[1], [1], [0], [0], [0, 0, 1, 0], [], []>} : vector<8x8xbf16>, vector<8x8xbf16>, vector<8x8xf32> -> vector<8x8xf32>
    %cst_86 = arith.constant 0.353553385 : f32
    %177 = vector.broadcast %cst_86 : f32 to vector<8x8xf32>
    %178 = arith.mulf %176, %177 : vector<8x8xf32>
    %cst_87 = arith.constant -1.000000e+09 : f32
    %179 = vector.broadcast %cst_87 : f32 to vector<8x8xf32>
    %180 = arith.select %12, %179, %178 : vector<8x8xi1>, vector<8x8xf32>
    %cst_88 = arith.constant dense<0xFF800000> : vector<8xf32>
    %181 = vector.multi_reduction <maximumf>, %180, %cst_88 [1] : vector<8x8xf32> to vector<8xf32>
    %182 = vector.shape_cast %181 : vector<8xf32> to vector<8x1xf32>
    %183 = vector.broadcast %182 : vector<8x1xf32> to vector<8x8xf32>
    %184 = arith.subf %180, %183 : vector<8x8xf32>
    %185 = math.exp %184 : vector<8x8xf32>
    %cst_89 = arith.constant dense<0.000000e+00> : vector<8xf32>
    %186 = vector.multi_reduction <add>, %185, %cst_89 [1] : vector<8x8xf32> to vector<8xf32>
    %187 = vector.shape_cast %186 : vector<8xf32> to vector<8x1xf32>
    %188 = tpu.reciprocal %187 {approx = true} : vector<8x1xf32> -> vector<8x1xf32>
    %189 = vector.broadcast %188 : vector<8x1xf32> to vector<8x8xf32>
    %190 = arith.mulf %185, %189 : vector<8x8xf32>
    %c0_90 = arith.constant 0 : index
    %c0_91 = arith.constant 0 : index
    %c0_92 = arith.constant 0 : index
    %c0_93 = arith.constant 0 : index
    %191 = vector.load %arg16[%c0_90, %c0_91, %c0_92, %c0_93] : memref<1x4x8x8xf32, #tpu.memory_space<vmem>>, vector<1x1x8x8xf32>
    %192 = vector.shape_cast %191 : vector<1x1x8x8xf32> to vector<8x8xf32>
    %193 = vector.shape_cast %190 : vector<8x8xf32> to vector<1x1x8x8xf32>
    tpu.vector_store %arg16[%c0_90, %c0_91, %c0_92, %c0_93], %193 {strides = array<i32>} : memref<1x4x8x8xf32, #tpu.memory_space<vmem>>, vector<1x1x8x8xf32>,
    %194 = arith.truncf %190 : vector<8x8xf32> to vector<8x8xbf16>
    %195 = arith.truncf %173 : vector<8x8xf32> to vector<8x8xbf16>
    %cst_94 = arith.constant dense<0.000000e+00> : vector<8x8xf32>
    %196 = tpu.matmul %194, %195, %cst_94 {dimension_numbers = #tpu.dot_dimension_numbers<[1], [0], [0], [1], [0, 0, 1, 1], [], []>} : vector<8x8xbf16>, vector<8x8xbf16>, vector<8x8xf32> -> vector<8x8xf32>
    %197 = arith.truncf %196 : vector<8x8xf32> to vector<8x8xbf16>
    %c0_95 = arith.constant 0 : index
    %c0_96 = arith.constant 0 : index
    %c0_97 = arith.constant 0 : index
    %c0_98 = arith.constant 0 : index
    %198 = vector.load %arg9[%c0_95, %c0_96, %c0_97, %c0_98] : memref<2x4x8x32xbf16, #tpu.memory_space<vmem>>, vector<1x1x8x32xbf16>
    %199 = vector.shape_cast %198 : vector<1x1x8x32xbf16> to vector<8x32xbf16>
    %cst_99 = arith.constant dense<0.000000e+00> : vector<8x32xf32>
    %200 = tpu.matmul %197, %199, %cst_99 {dimension_numbers = #tpu.dot_dimension_numbers<[1], [0], [0], [1], [0, 0, 1, 1], [], []>} : vector<8x8xbf16>, vector<8x32xbf16>, vector<8x32xf32> -> vector<8x32xf32>
    %201 = vector.extract_strided_slice %165 {offsets = [0, 8], sizes = [8, 8], strides = [1, 1]} : vector<8x32xf32> to vector<8x8xf32>
    %202 = vector.extract_strided_slice %169 {offsets = [0, 8], sizes = [8, 8], strides = [1, 1]} : vector<8x32xf32> to vector<8x8xf32>
    %203 = vector.extract_strided_slice %170 {offsets = [0, 8], sizes = [8, 8], strides = [1, 1]} : vector<8x32xf32> to vector<8x8xf32>
    %204 = arith.truncf %201 : vector<8x8xf32> to vector<8x8xbf16>
    %205 = arith.truncf %202 : vector<8x8xf32> to vector<8x8xbf16>
    %cst_100 = arith.constant dense<0.000000e+00> : vector<8x8xf32>
    %206 = tpu.matmul %204, %205, %cst_100 {dimension_numbers = #tpu.dot_dimension_numbers<[1], [1], [0], [0], [0, 0, 1, 0], [], []>} : vector<8x8xbf16>, vector<8x8xbf16>, vector<8x8xf32> -> vector<8x8xf32>
    %cst_101 = arith.constant 0.353553385 : f32
    %207 = vector.broadcast %cst_101 : f32 to vector<8x8xf32>
    %208 = arith.mulf %206, %207 : vector<8x8xf32>
    %cst_102 = arith.constant -1.000000e+09 : f32
    %209 = vector.broadcast %cst_102 : f32 to vector<8x8xf32>
    %210 = arith.select %12, %209, %208 : vector<8x8xi1>, vector<8x8xf32>
    %cst_103 = arith.constant dense<0xFF800000> : vector<8xf32>
    %211 = vector.multi_reduction <maximumf>, %210, %cst_103 [1] : vector<8x8xf32> to vector<8xf32>
    %212 = vector.shape_cast %211 : vector<8xf32> to vector<8x1xf32>
    %213 = vector.broadcast %212 : vector<8x1xf32> to vector<8x8xf32>
    %214 = arith.subf %210, %213 : vector<8x8xf32>
    %215 = math.exp %214 : vector<8x8xf32>
    %cst_104 = arith.constant dense<0.000000e+00> : vector<8xf32>
    %216 = vector.multi_reduction <add>, %215, %cst_104 [1] : vector<8x8xf32> to vector<8xf32>
    %217 = vector.shape_cast %216 : vector<8xf32> to vector<8x1xf32>
    %218 = tpu.reciprocal %217 {approx = true} : vector<8x1xf32> -> vector<8x1xf32>
    %219 = vector.broadcast %218 : vector<8x1xf32> to vector<8x8xf32>
    %220 = arith.mulf %215, %219 : vector<8x8xf32>
    %c0_105 = arith.constant 0 : index
    %c1_106 = arith.constant 1 : index
    %c0_107 = arith.constant 0 : index
    %c0_108 = arith.constant 0 : index
    %221 = vector.load %arg16[%c0_105, %c1_106, %c0_107, %c0_108] : memref<1x4x8x8xf32, #tpu.memory_space<vmem>>, vector<1x1x8x8xf32>
    %222 = vector.shape_cast %221 : vector<1x1x8x8xf32> to vector<8x8xf32>
    %223 = vector.shape_cast %220 : vector<8x8xf32> to vector<1x1x8x8xf32>
    tpu.vector_store %arg16[%c0_105, %c1_106, %c0_107, %c0_108], %223 {strides = array<i32>} : memref<1x4x8x8xf32, #tpu.memory_space<vmem>>, vector<1x1x8x8xf32>,
    %224 = arith.truncf %220 : vector<8x8xf32> to vector<8x8xbf16>
    %225 = arith.truncf %203 : vector<8x8xf32> to vector<8x8xbf16>
    %cst_109 = arith.constant dense<0.000000e+00> : vector<8x8xf32>
    %226 = tpu.matmul %224, %225, %cst_109 {dimension_numbers = #tpu.dot_dimension_numbers<[1], [0], [0], [1], [0, 0, 1, 1], [], []>} : vector<8x8xbf16>, vector<8x8xbf16>, vector<8x8xf32> -> vector<8x8xf32>
    %227 = arith.truncf %226 : vector<8x8xf32> to vector<8x8xbf16>
    %c0_110 = arith.constant 0 : index
    %c1_111 = arith.constant 1 : index
    %c0_112 = arith.constant 0 : index
    %c0_113 = arith.constant 0 : index
    %228 = vector.load %arg9[%c0_110, %c1_111, %c0_112, %c0_113] : memref<2x4x8x32xbf16, #tpu.memory_space<vmem>>, vector<1x1x8x32xbf16>
    %229 = vector.shape_cast %228 : vector<1x1x8x32xbf16> to vector<8x32xbf16>
    %cst_114 = arith.constant dense<0.000000e+00> : vector<8x32xf32>
    %230 = tpu.matmul %227, %229, %cst_114 {dimension_numbers = #tpu.dot_dimension_numbers<[1], [0], [0], [1], [0, 0, 1, 1], [], []>} : vector<8x8xbf16>, vector<8x32xbf16>, vector<8x32xf32> -> vector<8x32xf32>
    %231 = arith.addf %200, %230 : vector<8x32xf32>
    %232 = vector.extract_strided_slice %165 {offsets = [0, 16], sizes = [8, 8], strides = [1, 1]} : vector<8x32xf32> to vector<8x8xf32>
    %233 = vector.extract_strided_slice %169 {offsets = [0, 16], sizes = [8, 8], strides = [1, 1]} : vector<8x32xf32> to vector<8x8xf32>
    %234 = vector.extract_strided_slice %170 {offsets = [0, 16], sizes = [8, 8], strides = [1, 1]} : vector<8x32xf32> to vector<8x8xf32>
    %235 = arith.truncf %232 : vector<8x8xf32> to vector<8x8xbf16>
    %236 = arith.truncf %233 : vector<8x8xf32> to vector<8x8xbf16>
    %cst_115 = arith.constant dense<0.000000e+00> : vector<8x8xf32>
    %237 = tpu.matmul %235, %236, %cst_115 {dimension_numbers = #tpu.dot_dimension_numbers<[1], [1], [0], [0], [0, 0, 1, 0], [], []>} : vector<8x8xbf16>, vector<8x8xbf16>, vector<8x8xf32> -> vector<8x8xf32>
    %cst_116 = arith.constant 0.353553385 : f32
    %238 = vector.broadcast %cst_116 : f32 to vector<8x8xf32>
    %239 = arith.mulf %237, %238 : vector<8x8xf32>
    %cst_117 = arith.constant -1.000000e+09 : f32
    %240 = vector.broadcast %cst_117 : f32 to vector<8x8xf32>
    %241 = arith.select %12, %240, %239 : vector<8x8xi1>, vector<8x8xf32>
    %cst_118 = arith.constant dense<0xFF800000> : vector<8xf32>
    %242 = vector.multi_reduction <maximumf>, %241, %cst_118 [1] : vector<8x8xf32> to vector<8xf32>
    %243 = vector.shape_cast %242 : vector<8xf32> to vector<8x1xf32>
    %244 = vector.broadcast %243 : vector<8x1xf32> to vector<8x8xf32>
    %245 = arith.subf %241, %244 : vector<8x8xf32>
    %246 = math.exp %245 : vector<8x8xf32>
    %cst_119 = arith.constant dense<0.000000e+00> : vector<8xf32>
    %247 = vector.multi_reduction <add>, %246, %cst_119 [1] : vector<8x8xf32> to vector<8xf32>
    %248 = vector.shape_cast %247 : vector<8xf32> to vector<8x1xf32>
    %249 = tpu.reciprocal %248 {approx = true} : vector<8x1xf32> -> vector<8x1xf32>
    %250 = vector.broadcast %249 : vector<8x1xf32> to vector<8x8xf32>
    %251 = arith.mulf %246, %250 : vector<8x8xf32>
    %c0_120 = arith.constant 0 : index
    %c2_121 = arith.constant 2 : index
    %c0_122 = arith.constant 0 : index
    %c0_123 = arith.constant 0 : index
    %252 = vector.load %arg16[%c0_120, %c2_121, %c0_122, %c0_123] : memref<1x4x8x8xf32, #tpu.memory_space<vmem>>, vector<1x1x8x8xf32>
    %253 = vector.shape_cast %252 : vector<1x1x8x8xf32> to vector<8x8xf32>
    %254 = vector.shape_cast %251 : vector<8x8xf32> to vector<1x1x8x8xf32>
    tpu.vector_store %arg16[%c0_120, %c2_121, %c0_122, %c0_123], %254 {strides = array<i32>} : memref<1x4x8x8xf32, #tpu.memory_space<vmem>>, vector<1x1x8x8xf32>,
    %255 = arith.truncf %251 : vector<8x8xf32> to vector<8x8xbf16>
    %256 = arith.truncf %234 : vector<8x8xf32> to vector<8x8xbf16>
    %cst_124 = arith.constant dense<0.000000e+00> : vector<8x8xf32>
    %257 = tpu.matmul %255, %256, %cst_124 {dimension_numbers = #tpu.dot_dimension_numbers<[1], [0], [0], [1], [0, 0, 1, 1], [], []>} : vector<8x8xbf16>, vector<8x8xbf16>, vector<8x8xf32> -> vector<8x8xf32>
    %258 = arith.truncf %257 : vector<8x8xf32> to vector<8x8xbf16>
    %c0_125 = arith.constant 0 : index
    %c2_126 = arith.constant 2 : index
    %c0_127 = arith.constant 0 : index
    %c0_128 = arith.constant 0 : index
    %259 = vector.load %arg9[%c0_125, %c2_126, %c0_127, %c0_128] : memref<2x4x8x32xbf16, #tpu.memory_space<vmem>>, vector<1x1x8x32xbf16>
    %260 = vector.shape_cast %259 : vector<1x1x8x32xbf16> to vector<8x32xbf16>
    %cst_129 = arith.constant dense<0.000000e+00> : vector<8x32xf32>
    %261 = tpu.matmul %258, %260, %cst_129 {dimension_numbers = #tpu.dot_dimension_numbers<[1], [0], [0], [1], [0, 0, 1, 1], [], []>} : vector<8x8xbf16>, vector<8x32xbf16>, vector<8x32xf32> -> vector<8x32xf32>
    %262 = arith.addf %231, %261 : vector<8x32xf32>
    %263 = vector.extract_strided_slice %165 {offsets = [0, 24], sizes = [8, 8], strides = [1, 1]} : vector<8x32xf32> to vector<8x8xf32>
    %264 = vector.extract_strided_slice %169 {offsets = [0, 24], sizes = [8, 8], strides = [1, 1]} : vector<8x32xf32> to vector<8x8xf32>
    %265 = vector.extract_strided_slice %170 {offsets = [0, 24], sizes = [8, 8], strides = [1, 1]} : vector<8x32xf32> to vector<8x8xf32>
    %266 = arith.truncf %263 : vector<8x8xf32> to vector<8x8xbf16>
    %267 = arith.truncf %264 : vector<8x8xf32> to vector<8x8xbf16>
    %cst_130 = arith.constant dense<0.000000e+00> : vector<8x8xf32>
    %268 = tpu.matmul %266, %267, %cst_130 {dimension_numbers = #tpu.dot_dimension_numbers<[1], [1], [0], [0], [0, 0, 1, 0], [], []>} : vector<8x8xbf16>, vector<8x8xbf16>, vector<8x8xf32> -> vector<8x8xf32>
    %cst_131 = arith.constant 0.353553385 : f32
    %269 = vector.broadcast %cst_131 : f32 to vector<8x8xf32>
    %270 = arith.mulf %268, %269 : vector<8x8xf32>
    %cst_132 = arith.constant -1.000000e+09 : f32
    %271 = vector.broadcast %cst_132 : f32 to vector<8x8xf32>
    %272 = arith.select %12, %271, %270 : vector<8x8xi1>, vector<8x8xf32>
    %cst_133 = arith.constant dense<0xFF800000> : vector<8xf32>
    %273 = vector.multi_reduction <maximumf>, %272, %cst_133 [1] : vector<8x8xf32> to vector<8xf32>
    %274 = vector.shape_cast %273 : vector<8xf32> to vector<8x1xf32>
    %275 = vector.broadcast %274 : vector<8x1xf32> to vector<8x8xf32>
    %276 = arith.subf %272, %275 : vector<8x8xf32>
    %277 = math.exp %276 : vector<8x8xf32>
    %cst_134 = arith.constant dense<0.000000e+00> : vector<8xf32>
    %278 = vector.multi_reduction <add>, %277, %cst_134 [1] : vector<8x8xf32> to vector<8xf32>
    %279 = vector.shape_cast %278 : vector<8xf32> to vector<8x1xf32>
    %280 = tpu.reciprocal %279 {approx = true} : vector<8x1xf32> -> vector<8x1xf32>
    %281 = vector.broadcast %280 : vector<8x1xf32> to vector<8x8xf32>
    %282 = arith.mulf %277, %281 : vector<8x8xf32>
    %c0_135 = arith.constant 0 : index
    %c3_136 = arith.constant 3 : index
    %c0_137 = arith.constant 0 : index
    %c0_138 = arith.constant 0 : index
    %283 = vector.load %arg16[%c0_135, %c3_136, %c0_137, %c0_138] : memref<1x4x8x8xf32, #tpu.memory_space<vmem>>, vector<1x1x8x8xf32>
    %284 = vector.shape_cast %283 : vector<1x1x8x8xf32> to vector<8x8xf32>
    %285 = vector.shape_cast %282 : vector<8x8xf32> to vector<1x1x8x8xf32>
    tpu.vector_store %arg16[%c0_135, %c3_136, %c0_137, %c0_138], %285 {strides = array<i32>} : memref<1x4x8x8xf32, #tpu.memory_space<vmem>>, vector<1x1x8x8xf32>,
    %286 = arith.truncf %282 : vector<8x8xf32> to vector<8x8xbf16>
    %287 = arith.truncf %265 : vector<8x8xf32> to vector<8x8xbf16>
    %cst_139 = arith.constant dense<0.000000e+00> : vector<8x8xf32>
    %288 = tpu.matmul %286, %287, %cst_139 {dimension_numbers = #tpu.dot_dimension_numbers<[1], [0], [0], [1], [0, 0, 1, 1], [], []>} : vector<8x8xbf16>, vector<8x8xbf16>, vector<8x8xf32> -> vector<8x8xf32>
    %289 = arith.truncf %288 : vector<8x8xf32> to vector<8x8xbf16>
    %c0_140 = arith.constant 0 : index
    %c3_141 = arith.constant 3 : index
    %c0_142 = arith.constant 0 : index
    %c0_143 = arith.constant 0 : index
    %290 = vector.load %arg9[%c0_140, %c3_141, %c0_142, %c0_143] : memref<2x4x8x32xbf16, #tpu.memory_space<vmem>>, vector<1x1x8x32xbf16>
    %291 = vector.shape_cast %290 : vector<1x1x8x32xbf16> to vector<8x32xbf16>
    %cst_144 = arith.constant dense<0.000000e+00> : vector<8x32xf32>
    %292 = tpu.matmul %289, %291, %cst_144 {dimension_numbers = #tpu.dot_dimension_numbers<[1], [0], [0], [1], [0, 0, 1, 1], [], []>} : vector<8x8xbf16>, vector<8x32xbf16>, vector<8x32xf32> -> vector<8x32xf32>
    %293 = arith.addf %262, %292 : vector<8x32xf32>
    %294 = arith.addf %293, %161 : vector<8x32xf32>
    %cst_145 = arith.constant dense<0.000000e+00> : vector<8xf32>
    %295 = vector.multi_reduction <add>, %294, %cst_145 [1] : vector<8x32xf32> to vector<8xf32>
    %296 = vector.shape_cast %295 : vector<8xf32> to vector<8x1xf32>
    %cst_146 = arith.constant 3.200000e+01 : f32
    %297 = vector.broadcast %cst_146 : f32 to vector<8x1xf32>
    %298 = arith.divf %296, %297 : vector<8x1xf32>
    %299 = vector.broadcast %298 : vector<8x1xf32> to vector<8x32xf32>
    %300 = arith.subf %294, %299 : vector<8x32xf32>
    %301 = arith.mulf %300, %300 : vector<8x32xf32>
    %cst_147 = arith.constant dense<0.000000e+00> : vector<8xf32>
    %302 = vector.multi_reduction <add>, %301, %cst_147 [1] : vector<8x32xf32> to vector<8xf32>
    %303 = vector.shape_cast %302 : vector<8xf32> to vector<8x1xf32>
    %cst_148 = arith.constant 3.200000e+01 : f32
    %304 = vector.broadcast %cst_148 : f32 to vector<8x1xf32>
    %305 = arith.divf %303, %304 : vector<8x1xf32>
    %306 = vector.broadcast %298 : vector<8x1xf32> to vector<8x32xf32>
    %307 = arith.subf %294, %306 : vector<8x32xf32>
    %cst_149 = arith.constant 9.99999974E-6 : f32
    %308 = vector.broadcast %cst_149 : f32 to vector<8x1xf32>
    %309 = arith.addf %305, %308 : vector<8x1xf32>
    %310 = math.rsqrt %309 : vector<8x1xf32>
    %311 = vector.broadcast %310 : vector<8x1xf32> to vector<8x32xf32>
    %312 = arith.mulf %307, %311 : vector<8x32xf32>
    %313 = arith.truncf %312 : vector<8x32xf32> to vector<8x32xbf16>
    %c0_150 = arith.constant 0 : index
    %c0_151 = arith.constant 0 : index
    %c0_152 = arith.constant 0 : index
    %314 = vector.load %arg10[%c0_150, %c0_151, %c0_152] : memref<2x32x64xbf16, #tpu.memory_space<vmem>>, vector<1x32x64xbf16>
    %315 = vector.shape_cast %314 : vector<1x32x64xbf16> to vector<32x64xbf16>
    %cst_153 = arith.constant dense<0.000000e+00> : vector<8x64xf32>
    %316 = tpu.matmul %313, %315, %cst_153 {dimension_numbers = #tpu.dot_dimension_numbers<[1], [0], [0], [1], [0, 0, 1, 1], [], []>} : vector<8x32xbf16>, vector<32x64xbf16>, vector<8x64xf32> -> vector<8x64xf32>
    %cst_154 = arith.constant 0.000000e+00 : f32
    %317 = vector.broadcast %cst_154 : f32 to vector<8x64xf32>
    %318 = arith.maximumf %316, %317 : vector<8x64xf32>
    %319 = arith.truncf %318 : vector<8x64xf32> to vector<8x64xbf16>
    %c0_155 = arith.constant 0 : index
    %c0_156 = arith.constant 0 : index
    %c0_157 = arith.constant 0 : index
    %320 = vector.load %arg11[%c0_155, %c0_156, %c0_157] : memref<2x64x32xbf16, #tpu.memory_space<vmem>>, vector<1x64x32xbf16>
    %321 = vector.shape_cast %320 : vector<1x64x32xbf16> to vector<64x32xbf16>
    %cst_158 = arith.constant dense<0.000000e+00> : vector<8x32xf32>
    %322 = tpu.matmul %319, %321, %cst_158 {dimension_numbers = #tpu.dot_dimension_numbers<[1], [0], [0], [1], [0, 0, 1, 1], [], []>} : vector<8x64xbf16>, vector<64x32xbf16>, vector<8x32xf32> -> vector<8x32xf32>
    %323 = arith.addf %322, %312 : vector<8x32xf32>
    %cst_159 = arith.constant dense<0.000000e+00> : vector<8xf32>
    %324 = vector.multi_reduction <add>, %323, %cst_159 [1] : vector<8x32xf32> to vector<8xf32>
    %325 = vector.shape_cast %324 : vector<8xf32> to vector<8x1xf32>
    %cst_160 = arith.constant 3.200000e+01 : f32
    %326 = vector.broadcast %cst_160 : f32 to vector<8x1xf32>
    %327 = arith.divf %325, %326 : vector<8x1xf32>
    %328 = vector.broadcast %327 : vector<8x1xf32> to vector<8x32xf32>
    %329 = arith.subf %323, %328 : vector<8x32xf32>
    %330 = arith.mulf %329, %329 : vector<8x32xf32>
    %cst_161 = arith.constant dense<0.000000e+00> : vector<8xf32>
    %331 = vector.multi_reduction <add>, %330, %cst_161 [1] : vector<8x32xf32> to vector<8xf32>
    %332 = vector.shape_cast %331 : vector<8xf32> to vector<8x1xf32>
    %cst_162 = arith.constant 3.200000e+01 : f32
    %333 = vector.broadcast %cst_162 : f32 to vector<8x1xf32>
    %334 = arith.divf %332, %333 : vector<8x1xf32>
    %335 = vector.broadcast %327 : vector<8x1xf32> to vector<8x32xf32>
    %336 = arith.subf %323, %335 : vector<8x32xf32>
    %cst_163 = arith.constant 9.99999974E-6 : f32
    %337 = vector.broadcast %cst_163 : f32 to vector<8x1xf32>
    %338 = arith.addf %334, %337 : vector<8x1xf32>
    %339 = math.rsqrt %338 : vector<8x1xf32>
    %340 = vector.broadcast %339 : vector<8x1xf32> to vector<8x32xf32>
    %341 = arith.mulf %336, %340 : vector<8x32xf32>
    %342 = arith.truncf %341 : vector<8x32xf32> to vector<8x32xbf16>
    %c1_164 = arith.constant 1 : index
    %c0_165 = arith.constant 0 : index
    %c0_166 = arith.constant 0 : index
    %343 = vector.load %arg5[%c1_164, %c0_165, %c0_166] : memref<2x32x96xbf16, #tpu.memory_space<vmem>>, vector<1x32x96xbf16>
    %344 = vector.shape_cast %343 : vector<1x32x96xbf16> to vector<32x96xbf16>
    %cst_167 = arith.constant dense<0.000000e+00> : vector<8x96xf32>
    %345 = tpu.matmul %342, %344, %cst_167 {dimension_numbers = #tpu.dot_dimension_numbers<[1], [0], [0], [1], [0, 0, 1, 1], [], []>} : vector<8x32xbf16>, vector<32x96xbf16>, vector<8x96xf32> -> vector<8x96xf32>
    %346 = vector.extract_strided_slice %345 {offsets = [0, 0], sizes = [8, 32], strides = [1, 1]} : vector<8x96xf32> to vector<8x32xf32>
    %347 = vector.extract_strided_slice %345 {offsets = [0, 32], sizes = [8, 32], strides = [1, 1]} : vector<8x96xf32> to vector<8x32xf32>
    %348 = vector.extract_strided_slice %345 {offsets = [0, 64], sizes = [8, 32], strides = [1, 1]} : vector<8x96xf32> to vector<8x32xf32>
    %349 = vector.extract_strided_slice %346 {offsets = [0, 0], sizes = [8, 8], strides = [1, 1]} : vector<8x32xf32> to vector<8x8xf32>
    %350 = vector.extract_strided_slice %347 {offsets = [0, 0], sizes = [8, 8], strides = [1, 1]} : vector<8x32xf32> to vector<8x8xf32>
    %351 = vector.extract_strided_slice %348 {offsets = [0, 0], sizes = [8, 8], strides = [1, 1]} : vector<8x32xf32> to vector<8x8xf32>
    %352 = arith.truncf %349 : vector<8x8xf32> to vector<8x8xbf16>
    %353 = arith.truncf %350 : vector<8x8xf32> to vector<8x8xbf16>
    %cst_168 = arith.constant dense<0.000000e+00> : vector<8x8xf32>
    %354 = tpu.matmul %352, %353, %cst_168 {dimension_numbers = #tpu.dot_dimension_numbers<[1], [1], [0], [0], [0, 0, 1, 0], [], []>} : vector<8x8xbf16>, vector<8x8xbf16>, vector<8x8xf32> -> vector<8x8xf32>
    %cst_169 = arith.constant 0.353553385 : f32
    %355 = vector.broadcast %cst_169 : f32 to vector<8x8xf32>
    %356 = arith.mulf %354, %355 : vector<8x8xf32>
    %cst_170 = arith.constant -1.000000e+09 : f32
    %357 = vector.broadcast %cst_170 : f32 to vector<8x8xf32>
    %358 = arith.select %8, %357, %356 : vector<8x8xi1>, vector<8x8xf32>
    %cst_171 = arith.constant dense<0xFF800000> : vector<8xf32>
    %359 = vector.multi_reduction <maximumf>, %358, %cst_171 [1] : vector<8x8xf32> to vector<8xf32>
    %360 = vector.shape_cast %359 : vector<8xf32> to vector<8x1xf32>
    %361 = vector.broadcast %360 : vector<8x1xf32> to vector<8x8xf32>
    %362 = arith.subf %358, %361 : vector<8x8xf32>
    %363 = math.exp %362 : vector<8x8xf32>
    %cst_172 = arith.constant dense<0.000000e+00> : vector<8xf32>
    %364 = vector.multi_reduction <add>, %363, %cst_172 [1] : vector<8x8xf32> to vector<8xf32>
    %365 = vector.shape_cast %364 : vector<8xf32> to vector<8x1xf32>
    %366 = tpu.reciprocal %365 {approx = true} : vector<8x1xf32> -> vector<8x1xf32>
    %367 = vector.broadcast %366 : vector<8x1xf32> to vector<8x8xf32>
    %368 = arith.mulf %363, %367 : vector<8x8xf32>
    %c0_173 = arith.constant 0 : index
    %c0_174 = arith.constant 0 : index
    %c0_175 = arith.constant 0 : index
    %c0_176 = arith.constant 0 : index
    %369 = vector.load %arg15[%c0_173, %c0_174, %c0_175, %c0_176] : memref<1x4x8x8xf32, #tpu.memory_space<vmem>>, vector<1x1x8x8xf32>
    %370 = vector.shape_cast %369 : vector<1x1x8x8xf32> to vector<8x8xf32>
    %371 = vector.shape_cast %368 : vector<8x8xf32> to vector<1x1x8x8xf32>
    tpu.vector_store %arg15[%c0_173, %c0_174, %c0_175, %c0_176], %371 {strides = array<i32>} : memref<1x4x8x8xf32, #tpu.memory_space<vmem>>, vector<1x1x8x8xf32>,
    %372 = arith.truncf %368 : vector<8x8xf32> to vector<8x8xbf16>
    %373 = arith.truncf %351 : vector<8x8xf32> to vector<8x8xbf16>
    %cst_177 = arith.constant dense<0.000000e+00> : vector<8x8xf32>
    %374 = tpu.matmul %372, %373, %cst_177 {dimension_numbers = #tpu.dot_dimension_numbers<[1], [0], [0], [1], [0, 0, 1, 1], [], []>} : vector<8x8xbf16>, vector<8x8xbf16>, vector<8x8xf32> -> vector<8x8xf32>
    %375 = arith.truncf %374 : vector<8x8xf32> to vector<8x8xbf16>
    %c1_178 = arith.constant 1 : index
    %c0_179 = arith.constant 0 : index
    %c0_180 = arith.constant 0 : index
    %c0_181 = arith.constant 0 : index
    %376 = vector.load %arg6[%c1_178, %c0_179, %c0_180, %c0_181] : memref<2x4x8x32xbf16, #tpu.memory_space<vmem>>, vector<1x1x8x32xbf16>
    %377 = vector.shape_cast %376 : vector<1x1x8x32xbf16> to vector<8x32xbf16>
    %cst_182 = arith.constant dense<0.000000e+00> : vector<8x32xf32>
    %378 = tpu.matmul %375, %377, %cst_182 {dimension_numbers = #tpu.dot_dimension_numbers<[1], [0], [0], [1], [0, 0, 1, 1], [], []>} : vector<8x8xbf16>, vector<8x32xbf16>, vector<8x32xf32> -> vector<8x32xf32>
    %379 = vector.extract_strided_slice %346 {offsets = [0, 8], sizes = [8, 8], strides = [1, 1]} : vector<8x32xf32> to vector<8x8xf32>
    %380 = vector.extract_strided_slice %347 {offsets = [0, 8], sizes = [8, 8], strides = [1, 1]} : vector<8x32xf32> to vector<8x8xf32>
    %381 = vector.extract_strided_slice %348 {offsets = [0, 8], sizes = [8, 8], strides = [1, 1]} : vector<8x32xf32> to vector<8x8xf32>
    %382 = arith.truncf %379 : vector<8x8xf32> to vector<8x8xbf16>
    %383 = arith.truncf %380 : vector<8x8xf32> to vector<8x8xbf16>
    %cst_183 = arith.constant dense<0.000000e+00> : vector<8x8xf32>
    %384 = tpu.matmul %382, %383, %cst_183 {dimension_numbers = #tpu.dot_dimension_numbers<[1], [1], [0], [0], [0, 0, 1, 0], [], []>} : vector<8x8xbf16>, vector<8x8xbf16>, vector<8x8xf32> -> vector<8x8xf32>
    %cst_184 = arith.constant 0.353553385 : f32
    %385 = vector.broadcast %cst_184 : f32 to vector<8x8xf32>
    %386 = arith.mulf %384, %385 : vector<8x8xf32>
    %cst_185 = arith.constant -1.000000e+09 : f32
    %387 = vector.broadcast %cst_185 : f32 to vector<8x8xf32>
    %388 = arith.select %8, %387, %386 : vector<8x8xi1>, vector<8x8xf32>
    %cst_186 = arith.constant dense<0xFF800000> : vector<8xf32>
    %389 = vector.multi_reduction <maximumf>, %388, %cst_186 [1] : vector<8x8xf32> to vector<8xf32>
    %390 = vector.shape_cast %389 : vector<8xf32> to vector<8x1xf32>
    %391 = vector.broadcast %390 : vector<8x1xf32> to vector<8x8xf32>
    %392 = arith.subf %388, %391 : vector<8x8xf32>
    %393 = math.exp %392 : vector<8x8xf32>
    %cst_187 = arith.constant dense<0.000000e+00> : vector<8xf32>
    %394 = vector.multi_reduction <add>, %393, %cst_187 [1] : vector<8x8xf32> to vector<8xf32>
    %395 = vector.shape_cast %394 : vector<8xf32> to vector<8x1xf32>
    %396 = tpu.reciprocal %395 {approx = true} : vector<8x1xf32> -> vector<8x1xf32>
    %397 = vector.broadcast %396 : vector<8x1xf32> to vector<8x8xf32>
    %398 = arith.mulf %393, %397 : vector<8x8xf32>
    %c0_188 = arith.constant 0 : index
    %c1_189 = arith.constant 1 : index
    %c0_190 = arith.constant 0 : index
    %c0_191 = arith.constant 0 : index
    %399 = vector.load %arg15[%c0_188, %c1_189, %c0_190, %c0_191] : memref<1x4x8x8xf32, #tpu.memory_space<vmem>>, vector<1x1x8x8xf32>
    %400 = vector.shape_cast %399 : vector<1x1x8x8xf32> to vector<8x8xf32>
    %401 = vector.shape_cast %398 : vector<8x8xf32> to vector<1x1x8x8xf32>
    tpu.vector_store %arg15[%c0_188, %c1_189, %c0_190, %c0_191], %401 {strides = array<i32>} : memref<1x4x8x8xf32, #tpu.memory_space<vmem>>, vector<1x1x8x8xf32>,
    %402 = arith.truncf %398 : vector<8x8xf32> to vector<8x8xbf16>
    %403 = arith.truncf %381 : vector<8x8xf32> to vector<8x8xbf16>
    %cst_192 = arith.constant dense<0.000000e+00> : vector<8x8xf32>
    %404 = tpu.matmul %402, %403, %cst_192 {dimension_numbers = #tpu.dot_dimension_numbers<[1], [0], [0], [1], [0, 0, 1, 1], [], []>} : vector<8x8xbf16>, vector<8x8xbf16>, vector<8x8xf32> -> vector<8x8xf32>
    %405 = arith.truncf %404 : vector<8x8xf32> to vector<8x8xbf16>
    %c1_193 = arith.constant 1 : index
    %c1_194 = arith.constant 1 : index
    %c0_195 = arith.constant 0 : index
    %c0_196 = arith.constant 0 : index
    %406 = vector.load %arg6[%c1_193, %c1_194, %c0_195, %c0_196] : memref<2x4x8x32xbf16, #tpu.memory_space<vmem>>, vector<1x1x8x32xbf16>
    %407 = vector.shape_cast %406 : vector<1x1x8x32xbf16> to vector<8x32xbf16>
    %cst_197 = arith.constant dense<0.000000e+00> : vector<8x32xf32>
    %408 = tpu.matmul %405, %407, %cst_197 {dimension_numbers = #tpu.dot_dimension_numbers<[1], [0], [0], [1], [0, 0, 1, 1], [], []>} : vector<8x8xbf16>, vector<8x32xbf16>, vector<8x32xf32> -> vector<8x32xf32>
    %409 = arith.addf %378, %408 : vector<8x32xf32>
    %410 = vector.extract_strided_slice %346 {offsets = [0, 16], sizes = [8, 8], strides = [1, 1]} : vector<8x32xf32> to vector<8x8xf32>
    %411 = vector.extract_strided_slice %347 {offsets = [0, 16], sizes = [8, 8], strides = [1, 1]} : vector<8x32xf32> to vector<8x8xf32>
    %412 = vector.extract_strided_slice %348 {offsets = [0, 16], sizes = [8, 8], strides = [1, 1]} : vector<8x32xf32> to vector<8x8xf32>
    %413 = arith.truncf %410 : vector<8x8xf32> to vector<8x8xbf16>
    %414 = arith.truncf %411 : vector<8x8xf32> to vector<8x8xbf16>
    %cst_198 = arith.constant dense<0.000000e+00> : vector<8x8xf32>
    %415 = tpu.matmul %413, %414, %cst_198 {dimension_numbers = #tpu.dot_dimension_numbers<[1], [1], [0], [0], [0, 0, 1, 0], [], []>} : vector<8x8xbf16>, vector<8x8xbf16>, vector<8x8xf32> -> vector<8x8xf32>
    %cst_199 = arith.constant 0.353553385 : f32
    %416 = vector.broadcast %cst_199 : f32 to vector<8x8xf32>
    %417 = arith.mulf %415, %416 : vector<8x8xf32>
    %cst_200 = arith.constant -1.000000e+09 : f32
    %418 = vector.broadcast %cst_200 : f32 to vector<8x8xf32>
    %419 = arith.select %8, %418, %417 : vector<8x8xi1>, vector<8x8xf32>
    %cst_201 = arith.constant dense<0xFF800000> : vector<8xf32>
    %420 = vector.multi_reduction <maximumf>, %419, %cst_201 [1] : vector<8x8xf32> to vector<8xf32>
    %421 = vector.shape_cast %420 : vector<8xf32> to vector<8x1xf32>
    %422 = vector.broadcast %421 : vector<8x1xf32> to vector<8x8xf32>
    %423 = arith.subf %419, %422 : vector<8x8xf32>
    %424 = math.exp %423 : vector<8x8xf32>
    %cst_202 = arith.constant dense<0.000000e+00> : vector<8xf32>
    %425 = vector.multi_reduction <add>, %424, %cst_202 [1] : vector<8x8xf32> to vector<8xf32>
    %426 = vector.shape_cast %425 : vector<8xf32> to vector<8x1xf32>
    %427 = tpu.reciprocal %426 {approx = true} : vector<8x1xf32> -> vector<8x1xf32>
    %428 = vector.broadcast %427 : vector<8x1xf32> to vector<8x8xf32>
    %429 = arith.mulf %424, %428 : vector<8x8xf32>
    %c0_203 = arith.constant 0 : index
    %c2_204 = arith.constant 2 : index
    %c0_205 = arith.constant 0 : index
    %c0_206 = arith.constant 0 : index
    %430 = vector.load %arg15[%c0_203, %c2_204, %c0_205, %c0_206] : memref<1x4x8x8xf32, #tpu.memory_space<vmem>>, vector<1x1x8x8xf32>
    %431 = vector.shape_cast %430 : vector<1x1x8x8xf32> to vector<8x8xf32>
    %432 = vector.shape_cast %429 : vector<8x8xf32> to vector<1x1x8x8xf32>
    tpu.vector_store %arg15[%c0_203, %c2_204, %c0_205, %c0_206], %432 {strides = array<i32>} : memref<1x4x8x8xf32, #tpu.memory_space<vmem>>, vector<1x1x8x8xf32>,
    %433 = arith.truncf %429 : vector<8x8xf32> to vector<8x8xbf16>
    %434 = arith.truncf %412 : vector<8x8xf32> to vector<8x8xbf16>
    %cst_207 = arith.constant dense<0.000000e+00> : vector<8x8xf32>
    %435 = tpu.matmul %433, %434, %cst_207 {dimension_numbers = #tpu.dot_dimension_numbers<[1], [0], [0], [1], [0, 0, 1, 1], [], []>} : vector<8x8xbf16>, vector<8x8xbf16>, vector<8x8xf32> -> vector<8x8xf32>
    %436 = arith.truncf %435 : vector<8x8xf32> to vector<8x8xbf16>
    %c1_208 = arith.constant 1 : index
    %c2_209 = arith.constant 2 : index
    %c0_210 = arith.constant 0 : index
    %c0_211 = arith.constant 0 : index
    %437 = vector.load %arg6[%c1_208, %c2_209, %c0_210, %c0_211] : memref<2x4x8x32xbf16, #tpu.memory_space<vmem>>, vector<1x1x8x32xbf16>
    %438 = vector.shape_cast %437 : vector<1x1x8x32xbf16> to vector<8x32xbf16>
    %cst_212 = arith.constant dense<0.000000e+00> : vector<8x32xf32>
    %439 = tpu.matmul %436, %438, %cst_212 {dimension_numbers = #tpu.dot_dimension_numbers<[1], [0], [0], [1], [0, 0, 1, 1], [], []>} : vector<8x8xbf16>, vector<8x32xbf16>, vector<8x32xf32> -> vector<8x32xf32>
    %440 = arith.addf %409, %439 : vector<8x32xf32>
    %441 = vector.extract_strided_slice %346 {offsets = [0, 24], sizes = [8, 8], strides = [1, 1]} : vector<8x32xf32> to vector<8x8xf32>
    %442 = vector.extract_strided_slice %347 {offsets = [0, 24], sizes = [8, 8], strides = [1, 1]} : vector<8x32xf32> to vector<8x8xf32>
    %443 = vector.extract_strided_slice %348 {offsets = [0, 24], sizes = [8, 8], strides = [1, 1]} : vector<8x32xf32> to vector<8x8xf32>
    %444 = arith.truncf %441 : vector<8x8xf32> to vector<8x8xbf16>
    %445 = arith.truncf %442 : vector<8x8xf32> to vector<8x8xbf16>
    %cst_213 = arith.constant dense<0.000000e+00> : vector<8x8xf32>
    %446 = tpu.matmul %444, %445, %cst_213 {dimension_numbers = #tpu.dot_dimension_numbers<[1], [1], [0], [0], [0, 0, 1, 0], [], []>} : vector<8x8xbf16>, vector<8x8xbf16>, vector<8x8xf32> -> vector<8x8xf32>
    %cst_214 = arith.constant 0.353553385 : f32
    %447 = vector.broadcast %cst_214 : f32 to vector<8x8xf32>
    %448 = arith.mulf %446, %447 : vector<8x8xf32>
    %cst_215 = arith.constant -1.000000e+09 : f32
    %449 = vector.broadcast %cst_215 : f32 to vector<8x8xf32>
    %450 = arith.select %8, %449, %448 : vector<8x8xi1>, vector<8x8xf32>
    %cst_216 = arith.constant dense<0xFF800000> : vector<8xf32>
    %451 = vector.multi_reduction <maximumf>, %450, %cst_216 [1] : vector<8x8xf32> to vector<8xf32>
    %452 = vector.shape_cast %451 : vector<8xf32> to vector<8x1xf32>
    %453 = vector.broadcast %452 : vector<8x1xf32> to vector<8x8xf32>
    %454 = arith.subf %450, %453 : vector<8x8xf32>
    %455 = math.exp %454 : vector<8x8xf32>
    %cst_217 = arith.constant dense<0.000000e+00> : vector<8xf32>
    %456 = vector.multi_reduction <add>, %455, %cst_217 [1] : vector<8x8xf32> to vector<8xf32>
    %457 = vector.shape_cast %456 : vector<8xf32> to vector<8x1xf32>
    %458 = tpu.reciprocal %457 {approx = true} : vector<8x1xf32> -> vector<8x1xf32>
    %459 = vector.broadcast %458 : vector<8x1xf32> to vector<8x8xf32>
    %460 = arith.mulf %455, %459 : vector<8x8xf32>
    %c0_218 = arith.constant 0 : index
    %c3_219 = arith.constant 3 : index
    %c0_220 = arith.constant 0 : index
    %c0_221 = arith.constant 0 : index
    %461 = vector.load %arg15[%c0_218, %c3_219, %c0_220, %c0_221] : memref<1x4x8x8xf32, #tpu.memory_space<vmem>>, vector<1x1x8x8xf32>
    %462 = vector.shape_cast %461 : vector<1x1x8x8xf32> to vector<8x8xf32>
    %463 = vector.shape_cast %460 : vector<8x8xf32> to vector<1x1x8x8xf32>
    tpu.vector_store %arg15[%c0_218, %c3_219, %c0_220, %c0_221], %463 {strides = array<i32>} : memref<1x4x8x8xf32, #tpu.memory_space<vmem>>, vector<1x1x8x8xf32>,
    %464 = arith.truncf %460 : vector<8x8xf32> to vector<8x8xbf16>
    %465 = arith.truncf %443 : vector<8x8xf32> to vector<8x8xbf16>
    %cst_222 = arith.constant dense<0.000000e+00> : vector<8x8xf32>
    %466 = tpu.matmul %464, %465, %cst_222 {dimension_numbers = #tpu.dot_dimension_numbers<[1], [0], [0], [1], [0, 0, 1, 1], [], []>} : vector<8x8xbf16>, vector<8x8xbf16>, vector<8x8xf32> -> vector<8x8xf32>
    %467 = arith.truncf %466 : vector<8x8xf32> to vector<8x8xbf16>
    %c1_223 = arith.constant 1 : index
    %c3_224 = arith.constant 3 : index
    %c0_225 = arith.constant 0 : index
    %c0_226 = arith.constant 0 : index
    %468 = vector.load %arg6[%c1_223, %c3_224, %c0_225, %c0_226] : memref<2x4x8x32xbf16, #tpu.memory_space<vmem>>, vector<1x1x8x32xbf16>
    %469 = vector.shape_cast %468 : vector<1x1x8x32xbf16> to vector<8x32xbf16>
    %cst_227 = arith.constant dense<0.000000e+00> : vector<8x32xf32>
    %470 = tpu.matmul %467, %469, %cst_227 {dimension_numbers = #tpu.dot_dimension_numbers<[1], [0], [0], [1], [0, 0, 1, 1], [], []>} : vector<8x8xbf16>, vector<8x32xbf16>, vector<8x32xf32> -> vector<8x32xf32>
    %471 = arith.addf %440, %470 : vector<8x32xf32>
    %472 = arith.addf %471, %341 : vector<8x32xf32>
    %cst_228 = arith.constant dense<0.000000e+00> : vector<8xf32>
    %473 = vector.multi_reduction <add>, %472, %cst_228 [1] : vector<8x32xf32> to vector<8xf32>
    %474 = vector.shape_cast %473 : vector<8xf32> to vector<8x1xf32>
    %cst_229 = arith.constant 3.200000e+01 : f32
    %475 = vector.broadcast %cst_229 : f32 to vector<8x1xf32>
    %476 = arith.divf %474, %475 : vector<8x1xf32>
    %477 = vector.broadcast %476 : vector<8x1xf32> to vector<8x32xf32>
    %478 = arith.subf %472, %477 : vector<8x32xf32>
    %479 = arith.mulf %478, %478 : vector<8x32xf32>
    %cst_230 = arith.constant dense<0.000000e+00> : vector<8xf32>
    %480 = vector.multi_reduction <add>, %479, %cst_230 [1] : vector<8x32xf32> to vector<8xf32>
    %481 = vector.shape_cast %480 : vector<8xf32> to vector<8x1xf32>
    %cst_231 = arith.constant 3.200000e+01 : f32
    %482 = vector.broadcast %cst_231 : f32 to vector<8x1xf32>
    %483 = arith.divf %481, %482 : vector<8x1xf32>
    %484 = vector.broadcast %476 : vector<8x1xf32> to vector<8x32xf32>
    %485 = arith.subf %472, %484 : vector<8x32xf32>
    %cst_232 = arith.constant 9.99999974E-6 : f32
    %486 = vector.broadcast %cst_232 : f32 to vector<8x1xf32>
    %487 = arith.addf %483, %486 : vector<8x1xf32>
    %488 = math.rsqrt %487 : vector<8x1xf32>
    %489 = vector.broadcast %488 : vector<8x1xf32> to vector<8x32xf32>
    %490 = arith.mulf %485, %489 : vector<8x32xf32>
    %491 = arith.truncf %490 : vector<8x32xf32> to vector<8x32xbf16>
    %c1_233 = arith.constant 1 : index
    %c0_234 = arith.constant 0 : index
    %c0_235 = arith.constant 0 : index
    %492 = vector.load %arg7[%c1_233, %c0_234, %c0_235] : memref<2x32x32xbf16, #tpu.memory_space<vmem>>, vector<1x32x32xbf16>
    %493 = vector.shape_cast %492 : vector<1x32x32xbf16> to vector<32x32xbf16>
    %cst_236 = arith.constant dense<0.000000e+00> : vector<8x32xf32>
    %494 = tpu.matmul %491, %493, %cst_236 {dimension_numbers = #tpu.dot_dimension_numbers<[1], [0], [0], [1], [0, 0, 1, 1], [], []>} : vector<8x32xbf16>, vector<32x32xbf16>, vector<8x32xf32> -> vector<8x32xf32>
    %c1_237 = arith.constant 1 : index
    %c0_238 = arith.constant 0 : index
    %c0_239 = arith.constant 0 : index
    %495 = vector.load %arg8[%c1_237, %c0_238, %c0_239] : memref<2x32x64xbf16, #tpu.memory_space<vmem>>, vector<1x32x64xbf16>
    %496 = vector.shape_cast %495 : vector<1x32x64xbf16> to vector<32x64xbf16>
    %cst_240 = arith.constant dense<0.000000e+00> : vector<8x64xf32>
    %497 = tpu.matmul %4, %496, %cst_240 {dimension_numbers = #tpu.dot_dimension_numbers<[1], [0], [0], [1], [0, 0, 1, 1], [], []>} : vector<8x32xbf16>, vector<32x64xbf16>, vector<8x64xf32> -> vector<8x64xf32>
    %498 = vector.extract_strided_slice %497 {offsets = [0, 0], sizes = [8, 32], strides = [1, 1]} : vector<8x64xf32> to vector<8x32xf32>
    %499 = vector.extract_strided_slice %497 {offsets = [0, 32], sizes = [8, 32], strides = [1, 1]} : vector<8x64xf32> to vector<8x32xf32>
    %500 = vector.extract_strided_slice %494 {offsets = [0, 0], sizes = [8, 8], strides = [1, 1]} : vector<8x32xf32> to vector<8x8xf32>
    %501 = vector.extract_strided_slice %498 {offsets = [0, 0], sizes = [8, 8], strides = [1, 1]} : vector<8x32xf32> to vector<8x8xf32>
    %502 = vector.extract_strided_slice %499 {offsets = [0, 0], sizes = [8, 8], strides = [1, 1]} : vector<8x32xf32> to vector<8x8xf32>
    %503 = arith.truncf %500 : vector<8x8xf32> to vector<8x8xbf16>
    %504 = arith.truncf %501 : vector<8x8xf32> to vector<8x8xbf16>
    %cst_241 = arith.constant dense<0.000000e+00> : vector<8x8xf32>
    %505 = tpu.matmul %503, %504, %cst_241 {dimension_numbers = #tpu.dot_dimension_numbers<[1], [1], [0], [0], [0, 0, 1, 0], [], []>} : vector<8x8xbf16>, vector<8x8xbf16>, vector<8x8xf32> -> vector<8x8xf32>
    %cst_242 = arith.constant 0.353553385 : f32
    %506 = vector.broadcast %cst_242 : f32 to vector<8x8xf32>
    %507 = arith.mulf %505, %506 : vector<8x8xf32>
    %cst_243 = arith.constant -1.000000e+09 : f32
    %508 = vector.broadcast %cst_243 : f32 to vector<8x8xf32>
    %509 = arith.select %12, %508, %507 : vector<8x8xi1>, vector<8x8xf32>
    %cst_244 = arith.constant dense<0xFF800000> : vector<8xf32>
    %510 = vector.multi_reduction <maximumf>, %509, %cst_244 [1] : vector<8x8xf32> to vector<8xf32>
    %511 = vector.shape_cast %510 : vector<8xf32> to vector<8x1xf32>
    %512 = vector.broadcast %511 : vector<8x1xf32> to vector<8x8xf32>
    %513 = arith.subf %509, %512 : vector<8x8xf32>
    %514 = math.exp %513 : vector<8x8xf32>
    %cst_245 = arith.constant dense<0.000000e+00> : vector<8xf32>
    %515 = vector.multi_reduction <add>, %514, %cst_245 [1] : vector<8x8xf32> to vector<8xf32>
    %516 = vector.shape_cast %515 : vector<8xf32> to vector<8x1xf32>
    %517 = tpu.reciprocal %516 {approx = true} : vector<8x1xf32> -> vector<8x1xf32>
    %518 = vector.broadcast %517 : vector<8x1xf32> to vector<8x8xf32>
    %519 = arith.mulf %514, %518 : vector<8x8xf32>
    %c0_246 = arith.constant 0 : index
    %c0_247 = arith.constant 0 : index
    %c0_248 = arith.constant 0 : index
    %c0_249 = arith.constant 0 : index
    %520 = vector.load %arg17[%c0_246, %c0_247, %c0_248, %c0_249] : memref<1x4x8x8xf32, #tpu.memory_space<vmem>>, vector<1x1x8x8xf32>
    %521 = vector.shape_cast %520 : vector<1x1x8x8xf32> to vector<8x8xf32>
    %522 = vector.shape_cast %519 : vector<8x8xf32> to vector<1x1x8x8xf32>
    tpu.vector_store %arg17[%c0_246, %c0_247, %c0_248, %c0_249], %522 {strides = array<i32>} : memref<1x4x8x8xf32, #tpu.memory_space<vmem>>, vector<1x1x8x8xf32>,
    %523 = arith.truncf %519 : vector<8x8xf32> to vector<8x8xbf16>
    %524 = arith.truncf %502 : vector<8x8xf32> to vector<8x8xbf16>
    %cst_250 = arith.constant dense<0.000000e+00> : vector<8x8xf32>
    %525 = tpu.matmul %523, %524, %cst_250 {dimension_numbers = #tpu.dot_dimension_numbers<[1], [0], [0], [1], [0, 0, 1, 1], [], []>} : vector<8x8xbf16>, vector<8x8xbf16>, vector<8x8xf32> -> vector<8x8xf32>
    %526 = arith.truncf %525 : vector<8x8xf32> to vector<8x8xbf16>
    %c1_251 = arith.constant 1 : index
    %c0_252 = arith.constant 0 : index
    %c0_253 = arith.constant 0 : index
    %c0_254 = arith.constant 0 : index
    %527 = vector.load %arg9[%c1_251, %c0_252, %c0_253, %c0_254] : memref<2x4x8x32xbf16, #tpu.memory_space<vmem>>, vector<1x1x8x32xbf16>
    %528 = vector.shape_cast %527 : vector<1x1x8x32xbf16> to vector<8x32xbf16>
    %cst_255 = arith.constant dense<0.000000e+00> : vector<8x32xf32>
    %529 = tpu.matmul %526, %528, %cst_255 {dimension_numbers = #tpu.dot_dimension_numbers<[1], [0], [0], [1], [0, 0, 1, 1], [], []>} : vector<8x8xbf16>, vector<8x32xbf16>, vector<8x32xf32> -> vector<8x32xf32>
    %530 = vector.extract_strided_slice %494 {offsets = [0, 8], sizes = [8, 8], strides = [1, 1]} : vector<8x32xf32> to vector<8x8xf32>
    %531 = vector.extract_strided_slice %498 {offsets = [0, 8], sizes = [8, 8], strides = [1, 1]} : vector<8x32xf32> to vector<8x8xf32>
    %532 = vector.extract_strided_slice %499 {offsets = [0, 8], sizes = [8, 8], strides = [1, 1]} : vector<8x32xf32> to vector<8x8xf32>
    %533 = arith.truncf %530 : vector<8x8xf32> to vector<8x8xbf16>
    %534 = arith.truncf %531 : vector<8x8xf32> to vector<8x8xbf16>
    %cst_256 = arith.constant dense<0.000000e+00> : vector<8x8xf32>
    %535 = tpu.matmul %533, %534, %cst_256 {dimension_numbers = #tpu.dot_dimension_numbers<[1], [1], [0], [0], [0, 0, 1, 0], [], []>} : vector<8x8xbf16>, vector<8x8xbf16>, vector<8x8xf32> -> vector<8x8xf32>
    %cst_257 = arith.constant 0.353553385 : f32
    %536 = vector.broadcast %cst_257 : f32 to vector<8x8xf32>
    %537 = arith.mulf %535, %536 : vector<8x8xf32>
    %cst_258 = arith.constant -1.000000e+09 : f32
    %538 = vector.broadcast %cst_258 : f32 to vector<8x8xf32>
    %539 = arith.select %12, %538, %537 : vector<8x8xi1>, vector<8x8xf32>
    %cst_259 = arith.constant dense<0xFF800000> : vector<8xf32>
    %540 = vector.multi_reduction <maximumf>, %539, %cst_259 [1] : vector<8x8xf32> to vector<8xf32>
    %541 = vector.shape_cast %540 : vector<8xf32> to vector<8x1xf32>
    %542 = vector.broadcast %541 : vector<8x1xf32> to vector<8x8xf32>
    %543 = arith.subf %539, %542 : vector<8x8xf32>
    %544 = math.exp %543 : vector<8x8xf32>
    %cst_260 = arith.constant dense<0.000000e+00> : vector<8xf32>
    %545 = vector.multi_reduction <add>, %544, %cst_260 [1] : vector<8x8xf32> to vector<8xf32>
    %546 = vector.shape_cast %545 : vector<8xf32> to vector<8x1xf32>
    %547 = tpu.reciprocal %546 {approx = true} : vector<8x1xf32> -> vector<8x1xf32>
    %548 = vector.broadcast %547 : vector<8x1xf32> to vector<8x8xf32>
    %549 = arith.mulf %544, %548 : vector<8x8xf32>
    %c0_261 = arith.constant 0 : index
    %c1_262 = arith.constant 1 : index
    %c0_263 = arith.constant 0 : index
    %c0_264 = arith.constant 0 : index
    %550 = vector.load %arg17[%c0_261, %c1_262, %c0_263, %c0_264] : memref<1x4x8x8xf32, #tpu.memory_space<vmem>>, vector<1x1x8x8xf32>
    %551 = vector.shape_cast %550 : vector<1x1x8x8xf32> to vector<8x8xf32>
    %552 = vector.shape_cast %549 : vector<8x8xf32> to vector<1x1x8x8xf32>
    tpu.vector_store %arg17[%c0_261, %c1_262, %c0_263, %c0_264], %552 {strides = array<i32>} : memref<1x4x8x8xf32, #tpu.memory_space<vmem>>, vector<1x1x8x8xf32>,
    %553 = arith.truncf %549 : vector<8x8xf32> to vector<8x8xbf16>
    %554 = arith.truncf %532 : vector<8x8xf32> to vector<8x8xbf16>
    %cst_265 = arith.constant dense<0.000000e+00> : vector<8x8xf32>
    %555 = tpu.matmul %553, %554, %cst_265 {dimension_numbers = #tpu.dot_dimension_numbers<[1], [0], [0], [1], [0, 0, 1, 1], [], []>} : vector<8x8xbf16>, vector<8x8xbf16>, vector<8x8xf32> -> vector<8x8xf32>
    %556 = arith.truncf %555 : vector<8x8xf32> to vector<8x8xbf16>
    %c1_266 = arith.constant 1 : index
    %c1_267 = arith.constant 1 : index
    %c0_268 = arith.constant 0 : index
    %c0_269 = arith.constant 0 : index
    %557 = vector.load %arg9[%c1_266, %c1_267, %c0_268, %c0_269] : memref<2x4x8x32xbf16, #tpu.memory_space<vmem>>, vector<1x1x8x32xbf16>
    %558 = vector.shape_cast %557 : vector<1x1x8x32xbf16> to vector<8x32xbf16>
    %cst_270 = arith.constant dense<0.000000e+00> : vector<8x32xf32>
    %559 = tpu.matmul %556, %558, %cst_270 {dimension_numbers = #tpu.dot_dimension_numbers<[1], [0], [0], [1], [0, 0, 1, 1], [], []>} : vector<8x8xbf16>, vector<8x32xbf16>, vector<8x32xf32> -> vector<8x32xf32>
    %560 = arith.addf %529, %559 : vector<8x32xf32>
    %561 = vector.extract_strided_slice %494 {offsets = [0, 16], sizes = [8, 8], strides = [1, 1]} : vector<8x32xf32> to vector<8x8xf32>
    %562 = vector.extract_strided_slice %498 {offsets = [0, 16], sizes = [8, 8], strides = [1, 1]} : vector<8x32xf32> to vector<8x8xf32>
    %563 = vector.extract_strided_slice %499 {offsets = [0, 16], sizes = [8, 8], strides = [1, 1]} : vector<8x32xf32> to vector<8x8xf32>
    %564 = arith.truncf %561 : vector<8x8xf32> to vector<8x8xbf16>
    %565 = arith.truncf %562 : vector<8x8xf32> to vector<8x8xbf16>
    %cst_271 = arith.constant dense<0.000000e+00> : vector<8x8xf32>
    %566 = tpu.matmul %564, %565, %cst_271 {dimension_numbers = #tpu.dot_dimension_numbers<[1], [1], [0], [0], [0, 0, 1, 0], [], []>} : vector<8x8xbf16>, vector<8x8xbf16>, vector<8x8xf32> -> vector<8x8xf32>
    %cst_272 = arith.constant 0.353553385 : f32
    %567 = vector.broadcast %cst_272 : f32 to vector<8x8xf32>
    %568 = arith.mulf %566, %567 : vector<8x8xf32>
    %cst_273 = arith.constant -1.000000e+09 : f32
    %569 = vector.broadcast %cst_273 : f32 to vector<8x8xf32>
    %570 = arith.select %12, %569, %568 : vector<8x8xi1>, vector<8x8xf32>
    %cst_274 = arith.constant dense<0xFF800000> : vector<8xf32>
    %571 = vector.multi_reduction <maximumf>, %570, %cst_274 [1] : vector<8x8xf32> to vector<8xf32>
    %572 = vector.shape_cast %571 : vector<8xf32> to vector<8x1xf32>
    %573 = vector.broadcast %572 : vector<8x1xf32> to vector<8x8xf32>
    %574 = arith.subf %570, %573 : vector<8x8xf32>
    %575 = math.exp %574 : vector<8x8xf32>
    %cst_275 = arith.constant dense<0.000000e+00> : vector<8xf32>
    %576 = vector.multi_reduction <add>, %575, %cst_275 [1] : vector<8x8xf32> to vector<8xf32>
    %577 = vector.shape_cast %576 : vector<8xf32> to vector<8x1xf32>
    %578 = tpu.reciprocal %577 {approx = true} : vector<8x1xf32> -> vector<8x1xf32>
    %579 = vector.broadcast %578 : vector<8x1xf32> to vector<8x8xf32>
    %580 = arith.mulf %575, %579 : vector<8x8xf32>
    %c0_276 = arith.constant 0 : index
    %c2_277 = arith.constant 2 : index
    %c0_278 = arith.constant 0 : index
    %c0_279 = arith.constant 0 : index
    %581 = vector.load %arg17[%c0_276, %c2_277, %c0_278, %c0_279] : memref<1x4x8x8xf32, #tpu.memory_space<vmem>>, vector<1x1x8x8xf32>
    %582 = vector.shape_cast %581 : vector<1x1x8x8xf32> to vector<8x8xf32>
    %583 = vector.shape_cast %580 : vector<8x8xf32> to vector<1x1x8x8xf32>
    tpu.vector_store %arg17[%c0_276, %c2_277, %c0_278, %c0_279], %583 {strides = array<i32>} : memref<1x4x8x8xf32, #tpu.memory_space<vmem>>, vector<1x1x8x8xf32>,
    %584 = arith.truncf %580 : vector<8x8xf32> to vector<8x8xbf16>
    %585 = arith.truncf %563 : vector<8x8xf32> to vector<8x8xbf16>
    %cst_280 = arith.constant dense<0.000000e+00> : vector<8x8xf32>
    %586 = tpu.matmul %584, %585, %cst_280 {dimension_numbers = #tpu.dot_dimension_numbers<[1], [0], [0], [1], [0, 0, 1, 1], [], []>} : vector<8x8xbf16>, vector<8x8xbf16>, vector<8x8xf32> -> vector<8x8xf32>
    %587 = arith.truncf %586 : vector<8x8xf32> to vector<8x8xbf16>
    %c1_281 = arith.constant 1 : index
    %c2_282 = arith.constant 2 : index
    %c0_283 = arith.constant 0 : index
    %c0_284 = arith.constant 0 : index
    %588 = vector.load %arg9[%c1_281, %c2_282, %c0_283, %c0_284] : memref<2x4x8x32xbf16, #tpu.memory_space<vmem>>, vector<1x1x8x32xbf16>
    %589 = vector.shape_cast %588 : vector<1x1x8x32xbf16> to vector<8x32xbf16>
    %cst_285 = arith.constant dense<0.000000e+00> : vector<8x32xf32>
    %590 = tpu.matmul %587, %589, %cst_285 {dimension_numbers = #tpu.dot_dimension_numbers<[1], [0], [0], [1], [0, 0, 1, 1], [], []>} : vector<8x8xbf16>, vector<8x32xbf16>, vector<8x32xf32> -> vector<8x32xf32>
    %591 = arith.addf %560, %590 : vector<8x32xf32>
    %592 = vector.extract_strided_slice %494 {offsets = [0, 24], sizes = [8, 8], strides = [1, 1]} : vector<8x32xf32> to vector<8x8xf32>
    %593 = vector.extract_strided_slice %498 {offsets = [0, 24], sizes = [8, 8], strides = [1, 1]} : vector<8x32xf32> to vector<8x8xf32>
    %594 = vector.extract_strided_slice %499 {offsets = [0, 24], sizes = [8, 8], strides = [1, 1]} : vector<8x32xf32> to vector<8x8xf32>
    %595 = arith.truncf %592 : vector<8x8xf32> to vector<8x8xbf16>
    %596 = arith.truncf %593 : vector<8x8xf32> to vector<8x8xbf16>
    %cst_286 = arith.constant dense<0.000000e+00> : vector<8x8xf32>
    %597 = tpu.matmul %595, %596, %cst_286 {dimension_numbers = #tpu.dot_dimension_numbers<[1], [1], [0], [0], [0, 0, 1, 0], [], []>} : vector<8x8xbf16>, vector<8x8xbf16>, vector<8x8xf32> -> vector<8x8xf32>
    %cst_287 = arith.constant 0.353553385 : f32
    %598 = vector.broadcast %cst_287 : f32 to vector<8x8xf32>
    %599 = arith.mulf %597, %598 : vector<8x8xf32>
    %cst_288 = arith.constant -1.000000e+09 : f32
    %600 = vector.broadcast %cst_288 : f32 to vector<8x8xf32>
    %601 = arith.select %12, %600, %599 : vector<8x8xi1>, vector<8x8xf32>
    %cst_289 = arith.constant dense<0xFF800000> : vector<8xf32>
    %602 = vector.multi_reduction <maximumf>, %601, %cst_289 [1] : vector<8x8xf32> to vector<8xf32>
    %603 = vector.shape_cast %602 : vector<8xf32> to vector<8x1xf32>
    %604 = vector.broadcast %603 : vector<8x1xf32> to vector<8x8xf32>
    %605 = arith.subf %601, %604 : vector<8x8xf32>
    %606 = math.exp %605 : vector<8x8xf32>
    %cst_290 = arith.constant dense<0.000000e+00> : vector<8xf32>
    %607 = vector.multi_reduction <add>, %606, %cst_290 [1] : vector<8x8xf32> to vector<8xf32>
    %608 = vector.shape_cast %607 : vector<8xf32> to vector<8x1xf32>
    %609 = tpu.reciprocal %608 {approx = true} : vector<8x1xf32> -> vector<8x1xf32>
    %610 = vector.broadcast %609 : vector<8x1xf32> to vector<8x8xf32>
    %611 = arith.mulf %606, %610 : vector<8x8xf32>
    %c0_291 = arith.constant 0 : index
    %c3_292 = arith.constant 3 : index
    %c0_293 = arith.constant 0 : index
    %c0_294 = arith.constant 0 : index
    %612 = vector.load %arg17[%c0_291, %c3_292, %c0_293, %c0_294] : memref<1x4x8x8xf32, #tpu.memory_space<vmem>>, vector<1x1x8x8xf32>
    %613 = vector.shape_cast %612 : vector<1x1x8x8xf32> to vector<8x8xf32>
    %614 = vector.shape_cast %611 : vector<8x8xf32> to vector<1x1x8x8xf32>
    tpu.vector_store %arg17[%c0_291, %c3_292, %c0_293, %c0_294], %614 {strides = array<i32>} : memref<1x4x8x8xf32, #tpu.memory_space<vmem>>, vector<1x1x8x8xf32>,
    %615 = arith.truncf %611 : vector<8x8xf32> to vector<8x8xbf16>
    %616 = arith.truncf %594 : vector<8x8xf32> to vector<8x8xbf16>
    %cst_295 = arith.constant dense<0.000000e+00> : vector<8x8xf32>
    %617 = tpu.matmul %615, %616, %cst_295 {dimension_numbers = #tpu.dot_dimension_numbers<[1], [0], [0], [1], [0, 0, 1, 1], [], []>} : vector<8x8xbf16>, vector<8x8xbf16>, vector<8x8xf32> -> vector<8x8xf32>
    %618 = arith.truncf %617 : vector<8x8xf32> to vector<8x8xbf16>
    %c1_296 = arith.constant 1 : index
    %c3_297 = arith.constant 3 : index
    %c0_298 = arith.constant 0 : index
    %c0_299 = arith.constant 0 : index
    %619 = vector.load %arg9[%c1_296, %c3_297, %c0_298, %c0_299] : memref<2x4x8x32xbf16, #tpu.memory_space<vmem>>, vector<1x1x8x32xbf16>
    %620 = vector.shape_cast %619 : vector<1x1x8x32xbf16> to vector<8x32xbf16>
    %cst_300 = arith.constant dense<0.000000e+00> : vector<8x32xf32>
    %621 = tpu.matmul %618, %620, %cst_300 {dimension_numbers = #tpu.dot_dimension_numbers<[1], [0], [0], [1], [0, 0, 1, 1], [], []>} : vector<8x8xbf16>, vector<8x32xbf16>, vector<8x32xf32> -> vector<8x32xf32>
    %622 = arith.addf %591, %621 : vector<8x32xf32>
    %623 = arith.addf %622, %490 : vector<8x32xf32>
    %cst_301 = arith.constant dense<0.000000e+00> : vector<8xf32>
    %624 = vector.multi_reduction <add>, %623, %cst_301 [1] : vector<8x32xf32> to vector<8xf32>
    %625 = vector.shape_cast %624 : vector<8xf32> to vector<8x1xf32>
    %cst_302 = arith.constant 3.200000e+01 : f32
    %626 = vector.broadcast %cst_302 : f32 to vector<8x1xf32>
    %627 = arith.divf %625, %626 : vector<8x1xf32>
    %628 = vector.broadcast %627 : vector<8x1xf32> to vector<8x32xf32>
    %629 = arith.subf %623, %628 : vector<8x32xf32>
    %630 = arith.mulf %629, %629 : vector<8x32xf32>
    %cst_303 = arith.constant dense<0.000000e+00> : vector<8xf32>
    %631 = vector.multi_reduction <add>, %630, %cst_303 [1] : vector<8x32xf32> to vector<8xf32>
    %632 = vector.shape_cast %631 : vector<8xf32> to vector<8x1xf32>
    %cst_304 = arith.constant 3.200000e+01 : f32
    %633 = vector.broadcast %cst_304 : f32 to vector<8x1xf32>
    %634 = arith.divf %632, %633 : vector<8x1xf32>
    %635 = vector.broadcast %627 : vector<8x1xf32> to vector<8x32xf32>
    %636 = arith.subf %623, %635 : vector<8x32xf32>
    %cst_305 = arith.constant 9.99999974E-6 : f32
    %637 = vector.broadcast %cst_305 : f32 to vector<8x1xf32>
    %638 = arith.addf %634, %637 : vector<8x1xf32>
    %639 = math.rsqrt %638 : vector<8x1xf32>
    %640 = vector.broadcast %639 : vector<8x1xf32> to vector<8x32xf32>
    %641 = arith.mulf %636, %640 : vector<8x32xf32>
    %642 = arith.truncf %641 : vector<8x32xf32> to vector<8x32xbf16>
    %c1_306 = arith.constant 1 : index
    %c0_307 = arith.constant 0 : index
    %c0_308 = arith.constant 0 : index
    %643 = vector.load %arg10[%c1_306, %c0_307, %c0_308] : memref<2x32x64xbf16, #tpu.memory_space<vmem>>, vector<1x32x64xbf16>
    %644 = vector.shape_cast %643 : vector<1x32x64xbf16> to vector<32x64xbf16>
    %cst_309 = arith.constant dense<0.000000e+00> : vector<8x64xf32>
    %645 = tpu.matmul %642, %644, %cst_309 {dimension_numbers = #tpu.dot_dimension_numbers<[1], [0], [0], [1], [0, 0, 1, 1], [], []>} : vector<8x32xbf16>, vector<32x64xbf16>, vector<8x64xf32> -> vector<8x64xf32>
    %cst_310 = arith.constant 0.000000e+00 : f32
    %646 = vector.broadcast %cst_310 : f32 to vector<8x64xf32>
    %647 = arith.maximumf %645, %646 : vector<8x64xf32>
    %648 = arith.truncf %647 : vector<8x64xf32> to vector<8x64xbf16>
    %c1_311 = arith.constant 1 : index
    %c0_312 = arith.constant 0 : index
    %c0_313 = arith.constant 0 : index
    %649 = vector.load %arg11[%c1_311, %c0_312, %c0_313] : memref<2x64x32xbf16, #tpu.memory_space<vmem>>, vector<1x64x32xbf16>
    %650 = vector.shape_cast %649 : vector<1x64x32xbf16> to vector<64x32xbf16>
    %cst_314 = arith.constant dense<0.000000e+00> : vector<8x32xf32>
    %651 = tpu.matmul %648, %650, %cst_314 {dimension_numbers = #tpu.dot_dimension_numbers<[1], [0], [0], [1], [0, 0, 1, 1], [], []>} : vector<8x64xbf16>, vector<64x32xbf16>, vector<8x32xf32> -> vector<8x32xf32>
    %652 = arith.addf %651, %641 : vector<8x32xf32>
    %cst_315 = arith.constant dense<0.000000e+00> : vector<8xf32>
    %653 = vector.multi_reduction <add>, %652, %cst_315 [1] : vector<8x32xf32> to vector<8xf32>
    %654 = vector.shape_cast %653 : vector<8xf32> to vector<8x1xf32>
    %cst_316 = arith.constant 3.200000e+01 : f32
    %655 = vector.broadcast %cst_316 : f32 to vector<8x1xf32>
    %656 = arith.divf %654, %655 : vector<8x1xf32>
    %657 = vector.broadcast %656 : vector<8x1xf32> to vector<8x32xf32>
    %658 = arith.subf %652, %657 : vector<8x32xf32>
    %659 = arith.mulf %658, %658 : vector<8x32xf32>
    %cst_317 = arith.constant dense<0.000000e+00> : vector<8xf32>
    %660 = vector.multi_reduction <add>, %659, %cst_317 [1] : vector<8x32xf32> to vector<8xf32>
    %661 = vector.shape_cast %660 : vector<8xf32> to vector<8x1xf32>
    %cst_318 = arith.constant 3.200000e+01 : f32
    %662 = vector.broadcast %cst_318 : f32 to vector<8x1xf32>
    %663 = arith.divf %661, %662 : vector<8x1xf32>
    %664 = vector.broadcast %656 : vector<8x1xf32> to vector<8x32xf32>
    %665 = arith.subf %652, %664 : vector<8x32xf32>
    %cst_319 = arith.constant 9.99999974E-6 : f32
    %666 = vector.broadcast %cst_319 : f32 to vector<8x1xf32>
    %667 = arith.addf %663, %666 : vector<8x1xf32>
    %668 = math.rsqrt %667 : vector<8x1xf32>
    %669 = vector.broadcast %668 : vector<8x1xf32> to vector<8x32xf32>
    %670 = arith.mulf %665, %669 : vector<8x32xf32>
    %671 = arith.truncf %670 : vector<8x32xf32> to vector<8x32xbf16>
    %c0_320 = arith.constant 0 : index
    %c0_321 = arith.constant 0 : index
    %672 = vector.load %arg12[%c0_320, %c0_321] : memref<32x16xbf16, #tpu.memory_space<vmem>>, vector<32x16xbf16>
    %cst_322 = arith.constant dense<0.000000e+00> : vector<8x16xf32>
    %673 = tpu.matmul %671, %672, %cst_322 {dimension_numbers = #tpu.dot_dimension_numbers<[1], [0], [0], [1], [0, 0, 1, 1], [], []>} : vector<8x32xbf16>, vector<32x16xbf16>, vector<8x16xf32> -> vector<8x16xf32>
    %c0_323 = arith.constant 0 : index
    %c0_324 = arith.constant 0 : index
    %c0_325 = arith.constant 0 : index
    %674 = vector.load %arg13[%c0_323, %c0_324, %c0_325] : memref<1x8x16xf32, #tpu.memory_space<vmem>>, vector<1x8x16xf32>
    %675 = vector.shape_cast %674 : vector<1x8x16xf32> to vector<8x16xf32>
    %676 = vector.shape_cast %673 : vector<8x16xf32> to vector<1x8x16xf32>
    tpu.vector_store %arg13[%c0_323, %c0_324, %c0_325], %676 {strides = array<i32>} : memref<1x8x16xf32, #tpu.memory_space<vmem>>, vector<1x8x16xf32>,
    return
  }
  func.func @transform_0(%arg0: i32) -> (i32, i32, i32) {
    %c0_i32 = arith.constant 0 : i32
    %c0_i32_0 = arith.constant 0 : i32
    %c0_i32_1 = arith.constant 0 : i32
    return %arg0, %c0_i32, %c0_i32_0 : i32, i32, i32
  }
  func.func @transform_1(%arg0: i32) -> (i32, i32, i32) {
    %c0_i32 = arith.constant 0 : i32
    %c0_i32_0 = arith.constant 0 : i32
    %c0_i32_1 = arith.constant 0 : i32
    return %arg0, %c0_i32, %c0_i32_0 : i32, i32, i32
  }
  func.func @transform_2(%arg0: i32) -> (i32, i32, i32) {
    %c0_i32 = arith.constant 0 : i32
    %c0_i32_0 = arith.constant 0 : i32
    %c0_i32_1 = arith.constant 0 : i32
    return %arg0, %c0_i32, %c0_i32_0 : i32, i32, i32
  }
  func.func @transform_3(%arg0: i32) -> (i32, i32, i32) {
    %c0_i32 = arith.constant 0 : i32
    %c0_i32_0 = arith.constant 0 : i32
    %c0_i32_1 = arith.constant 0 : i32
    return %arg0, %c0_i32, %c0_i32_0 : i32, i32, i32
  }
  func.func @transform_4(%arg0: i32) -> (i32, i32, i32) {
    %c0_i32 = arith.constant 0 : i32
    %c0_i32_0 = arith.constant 0 : i32
    %c0_i32_1 = arith.constant 0 : i32
    %c0_i32_2 = arith.constant 0 : i32
    return %c0_i32, %c0_i32_0, %c0_i32_1 : i32, i32, i32
  }
  func.func @transform_5(%arg0: i32) -> (i32, i32, i32, i32) {
    %c0_i32 = arith.constant 0 : i32
    %c0_i32_0 = arith.constant 0 : i32
    %c0_i32_1 = arith.constant 0 : i32
    %c0_i32_2 = arith.constant 0 : i32
    %c0_i32_3 = arith.constant 0 : i32
    return %c0_i32, %c0_i32_0, %c0_i32_1, %c0_i32_2 : i32, i32, i32, i32
  }
  func.func @transform_6(%arg0: i32) -> (i32, i32, i32) {
    %c0_i32 = arith.constant 0 : i32
    %c0_i32_0 = arith.constant 0 : i32
    %c0_i32_1 = arith.constant 0 : i32
    %c0_i32_2 = arith.constant 0 : i32
    return %c0_i32, %c0_i32_0, %c0_i32_1 : i32, i32, i32
  }
  func.func @transform_7(%arg0: i32) -> (i32, i32, i32) {
    %c0_i32 = arith.constant 0 : i32
    %c0_i32_0 = arith.constant 0 : i32
    %c0_i32_1 = arith.constant 0 : i32
    %c0_i32_2 = arith.constant 0 : i32
    return %c0_i32, %c0_i32_0, %c0_i32_1 : i32, i32, i32
  }
  func.func @transform_8(%arg0: i32) -> (i32, i32, i32, i32) {
    %c0_i32 = arith.constant 0 : i32
    %c0_i32_0 = arith.constant 0 : i32
    %c0_i32_1 = arith.constant 0 : i32
    %c0_i32_2 = arith.constant 0 : i32
    %c0_i32_3 = arith.constant 0 : i32
    return %c0_i32, %c0_i32_0, %c0_i32_1, %c0_i32_2 : i32, i32, i32, i32
  }
  func.func @transform_9(%arg0: i32) -> (i32, i32, i32) {
    %c0_i32 = arith.constant 0 : i32
    %c0_i32_0 = arith.constant 0 : i32
    %c0_i32_1 = arith.constant 0 : i32
    %c0_i32_2 = arith.constant 0 : i32
    return %c0_i32, %c0_i32_0, %c0_i32_1 : i32, i32, i32
  }
  func.func @transform_10(%arg0: i32) -> (i32, i32, i32) {
    %c0_i32 = arith.constant 0 : i32
    %c0_i32_0 = arith.constant 0 : i32
    %c0_i32_1 = arith.constant 0 : i32
    %c0_i32_2 = arith.constant 0 : i32
    return %c0_i32, %c0_i32_0, %c0_i32_1 : i32, i32, i32
  }
  func.func @transform_11(%arg0: i32) -> (i32, i32) {
    %c0_i32 = arith.constant 0 : i32
    %c0_i32_0 = arith.constant 0 : i32
    %c0_i32_1 = arith.constant 0 : i32
    return %c0_i32, %c0_i32_0 : i32, i32
  }
  func.func @transform_12(%arg0: i32) -> (i32, i32, i32) {
    %c0_i32 = arith.constant 0 : i32
    %c0_i32_0 = arith.constant 0 : i32
    %c0_i32_1 = arith.constant 0 : i32
    return %arg0, %c0_i32, %c0_i32_0 : i32, i32, i32
  }
  func.func @transform_13(%arg0: i32) -> (i32, i32, i32, i32) {
    %c0_i32 = arith.constant 0 : i32
    %c0_i32_0 = arith.constant 0 : i32
    %c0_i32_1 = arith.constant 0 : i32
    %c0_i32_2 = arith.constant 0 : i32
    return %arg0, %c0_i32, %c0_i32_0, %c0_i32_1 : i32, i32, i32, i32
  }
  func.func @transform_14(%arg0: i32) -> (i32, i32, i32, i32) {
    %c0_i32 = arith.constant 0 : i32
    %c0_i32_0 = arith.constant 0 : i32
    %c0_i32_1 = arith.constant 0 : i32
    %c0_i32_2 = arith.constant 0 : i32
    return %arg0, %c0_i32, %c0_i32_0, %c0_i32_1 : i32, i32, i32, i32
  }
  func.func @transform_15(%arg0: i32) -> (i32, i32, i32, i32) {
    %c0_i32 = arith.constant 0 : i32
    %c0_i32_0 = arith.constant 0 : i32
    %c0_i32_1 = arith.constant 0 : i32
    %c0_i32_2 = arith.constant 0 : i32
    return %arg0, %c0_i32, %c0_i32_0, %c0_i32_1 : i32, i32, i32, i32
  }
  func.func @transform_16(%arg0: i32) -> (i32, i32, i32, i32) {
    %c0_i32 = arith.constant 0 : i32
    %c0_i32_0 = arith.constant 0 : i32
    %c0_i32_1 = arith.constant 0 : i32
    %c0_i32_2 = arith.constant 0 : i32
    return %arg0, %c0_i32, %c0_i32_0, %c0_i32_1 : i32, i32, i32, i32
  }
}

</mosaic_0001>

<bundles_post_ra>
// kernel: transformer_forward.2
= control target key start
LH: loop header
LB: loop body
LE: loop exit
PB: predicated region body
PF: predicated region fallthrough
CT: control target
= control target key end

     0   :  { %s3431_s0 = inlined_call_operand.vmem [shape: f32[2,8,32], index: 0, kind: input, shape index: {}]   ;;  %s3432_s1 = inlined_call_operand.vmem [shape: s32[2,8,8], index: 1, kind: input, shape index: {}]   ;;  %s3433_s2 = inlined_call_operand.vmem [shape: bf16[2,32,96], index: 2, kind: input, shape index: {}]   ;;  %s3434_s3 = inlined_call_operand.vmem [shape: bf16[2,4,8,32], index: 3, kind: input, shape index: {}]   ;;  %s3435_s4 = inlined_call_operand.vmem [shape: bf16[2,32,64], index: 4, kind: input, shape index: {}]   ;;  %s3436_s5 = inlined_call_operand.vmem [shape: bf16[2,64,32], index: 5, kind: input, shape index: {}]   ;;  %s3437_s6 = inlined_call_operand.vmem [shape: f32[2,8,32], index: 6, kind: output, shape index: {0}]   ;;  %s3438_s7 = inlined_call_operand.hbm [shape: f32[2,4,8,8], index: 7, kind: output, shape index: {1}]   ;;  %s3439_s8 = inlined_call_operand.hbm [shape: f32[2,4,8,8], index: 8, kind: output, shape index: {2}]  }
   0x1   :  { %3451 = sst [smem:[#allocation8_spill]] %s3431_s0 }
   0x2   :  { %3452 = sst [smem:[#allocation9_spill]] %s3432_s1 }
   0x3   :  { %3453 = sst [smem:[#allocation10_spill]] %s3433_s2 }
   0x4   :  { %14 = vsyncpa [#allocation3], 0 }
   0x5   :  { %16 = vsyncpa [#allocation3 + $0x1], 0 }
   0x6   :  { %17 = vsyncpa [#allocation5], 0 }
   0x7   :  { %19 = vsyncpa [#allocation5 + $0x1], 0  ;;  %s2910_s27 = smov 0   ;;  %s2912_s28 = smov 0  }
   0x8   :  { %s2914_s29 = smov 0   ;;  %s2916_s30 = smov 0  }
   0x9 LB: > { %s2931_s9 = sadd.s32 4294967295, %s2846_s30   ;;  %s2277_s10 = sadd.s32 4294967294, %s2846_s30   ;;  %s2846_s30 = sphi %s2916_s30, %s3474_s30   ;;  %s2842_s29 = sphi %s2914_s29, %s3473_s29   ;;  %s2838_s28 = sphi %s2912_s28, %s3472_s28   ;;  %s2834_s27 = sphi %s2910_s27, %s3471_s27  }
   0xa   : > { %s2935_s11 = sadd.s32 1, %s2846_s30   ;;  %s194_s12 = sadd.s32 1, %s2842_s29 }
   0xb   : > { %s191_s13 = ssub.s32 %s2846_s30, %s2935_s11  ;;  %p204_p0 = scmp.ne.s32.totalorder %s2842_s29, %s2838_s28 }
   0xc   : > { %p192_p1 = scmp.eq.s32.totalorder %s191_s13, 0  ;;  %p205_p2 = scmp.eq.s32.totalorder %s2931_s9, 1 }
   0xd   : > { %p210_p3 = scmp.ne.s32.totalorder %s2838_s28, %s2834_s27  ;;  %p211_p4 = scmp.eq.s32.totalorder %s2277_s10, 1 }
   0xe   : > { %s2946_s14 = scalar_select %p192_p1, %s2842_s29, %s194_s12  }
   0xf   : > { %p2948_p5 = por %p205_p2, %p204_p0  ;;  %p2952_p6 = por %p211_p4, %p210_p3 }
  0x10   : > { %p2280_p7 = scmp.ge.s32.totalorder %s2846_s30, 1  ;;  %p281_p8 = scmp.lt.s32.totalorder %s2846_s30, 3 }
  0x12   : > { %p282_p9 = pnand %p2280_p7, %p281_p8 }
  0x13   : > { %s3456_s2 = sld [smem:[#allocation10_spill]] (!%p282_p9)  ;;  %p327_p10 = scmp.lt.s32.totalorder (!%p282_p9), %s2931_s9, 1 }
  0x14   : > { %285 = sbr.rel (%p282_p9) target bundleno = 6959 (0x1b2f), region = 44  ;;  %s3457_s0 = sld [smem:[#allocation8_spill]] (!%p282_p9) }
  0x15   : > { %s3449_s26 = smov (!%p282_p9), 120   ;;  %s2851_s10 = smov (!%p282_p9), 96  }
  0x16   : > { %s2852_s12 = smov (!%p282_p9), 88   ;;  %s3458_s1 = sld [smem:[#allocation9_spill]] (!%p282_p9) }
  0x17   : > { %s3446_s19 = smov (!%p282_p9), 64   ;;  %s3448_s20 = smov (!%p282_p9), 56  }
  0x18   : > { %s3441_s23 = smov (!%p282_p9), 80   ;;  %s3032_s24 = sand.u32 (!%p282_p9), 1, %s2838_s28  }
  0x19   : > { %v2700_v0 = vld [vmem:[%s3456_s2 + $0x8] sm:$0xff]   ;;  %v2848_v1 = vmov 0.0   ;;  %v2701_v2 = vld [vmem:[%s3456_s2] sm:$0xff]   ;;  %vm2849_vm0 = vmmov 0   ;;  %s328_s21 = scalar_select %p327_p10, %s2931_s9, 1  ;;  %vm360_vm1 = vcmask 261120  }
  0x1a   : > { %2441 = vmatprep.subr.bf16.mxu1 %v2848_v1  ;;  %2455 = vmatprep.subr.bf16.mxu0 %v2848_v1  ;;  %vm408_vm2 = vcmask 64512   ;;  %vm475_vm4 = vcmask 1043456   ;;  %v520_v52 = vld [vmem:[%s3434_s3] sm:$0xf]  ;;  %v2294_v54 = vld [vmem:[%s3434_s3 + $0x4] sm:$0xf] }
  0x1b   : > { %2442 = vmatpush3.bf16.msra.mxu1 %v2700_v0  ;;  %2445 = vmatprep.mubr.msk.bf16.mxu1 %vm2849_vm0, %v2848_v1  ;;  %s2973_s22 = sshll.u32 %s328_s21, 3  ;;  %s3447_s21 = smov 112   ;;  %v688_v53 = vsel %vm475_vm4, %v520_v52, 0  ;;  %v642_v55 = vsel %vm475_vm4, %v2294_v54, 0  ;;  %vm1167_vm5 = vcmask 523264  }
  0x1c   : > { %2443 = vmatprep.subr.bf16.mxu1 %v2848_v1  ;;  %2457 = vmatprep.mubr.msk.bf16.mxu0 %vm2849_vm0, %v2848_v1  ;;  %s330_s25 = scalar_lea.vmem %s3457_s0, %s2973_s22  ;;  %s334_s18 = scalar_lea.vmem %s3458_s1, %s2973_s22 }
  0x1d   : > { %v2980_v3 = vld [vmem:[%s330_s25] sm:$0xff]  ;;  %s3440_s25 = sshll.u32 %s3032_s24, 5  ;;  %s3445_s17 = smov 48  }
  0x1e   : > { %v343_v4 = vpack.c.bf16 %v2980_v3, %v2980_v3  ;;  %v3010_v15 = vld [vmem:[%s334_s18] sm:$0xff]  ;;  %s3037_s13 = scalar_lea.vmem [#allocation2], %s3440_s25  ;;  %s3444_s25 = smov 104  }
  0x1f   : > { %2444 = vmatpush3.bf16.msra.mxu1 %v2701_v2  ;;  %vm342_vm3 = vcmp.gt.s32.totalorder %v3010_v15, 0 }
  0x20   : > { %2449 = vmatprep.subr.bf16.mxu1 %v2848_v1 }
  0x22   : > { %2446 = vmatmul.mubr.msk.bf16.vlgmr.msra.gmra.mxu1 %vm360_vm1, %v343_v4 }
  0x23   : > { %2451 = vmatprep.mubr.msk.bf16.mxu1 %vm2849_vm0, %v2848_v1 }
  0xe2   : > { %v398_v5 = vpop.f32.mrf.mxu1 }
  0xe3   : > { %v2987_v6 = vpack.c.bf16 %v398_v5, %v398_v5 }
  0xe4   : > { %v2447_v7 = vpop.f32.mrf.mxu1 }
  0xe5   : > { %521 = vrot.lane.b32.xlu1 %v2987_v6, %s3449_s26  ;;  %406 = vrot.lane.b32.xlu0 %v2987_v6, %s2851_s10  ;;  %s3463_s26 = smov 80  }
  0xe6   : > { %v401_v8 = vpop.f32.mrf.mxu1 }
  0xe8   : > { %v2448_v9 = vpop.f32.mrf.mxu1 }
  0xe9   : > { %523 = vrot.lane.b32.xlu0 %v2987_v6, %s2852_s12 }
 0x157   : > { %v407_v10 = vpop.permute.xlu0 %406  ;;  %v522_v14 = vpop.permute.xlu1 %521 }
 0x158   : > { %v413_v11 = vsel %vm408_vm2, %v407_v10, 0 }
 0x159   : > { %2450 = vmatpush3.bf16.xpose.msra.mxu1 %v413_v11 }
 0x15a   : > { %2461 = vmatprep.subr.bf16.mxu1 %v2848_v1 }
 0x15b   : > { %v524_v12 = vpop.permute.xlu0 %523 }
 0x15c   : > { %v529_v13 = vsel %vm408_vm2, %v524_v12, 0 }
 0x160   : > { %2452 = vmatmul.mubr.msk.bf16.vlgmr.msra.gmra.mxu1 %vm408_vm2, %v2987_v6 }
 0x161   : > { %2462 = vmatpush3.bf16.xpose.msra.mxu1 %v529_v13  ;;  %2463 = vmatprep.mubr.msk.bf16.mxu1 %vm2849_vm0, %v2848_v1 }
 0x162   : > { %2473 = vmatprep.subr.bf16.mxu1 %v2848_v1 }
 0x168   : > { %2464 = vmatmul.mubr.msk.bf16.vlgmr.msra.gmra.mxu1 %vm408_vm2, %v522_v14 }
 0x169   : > { %2475 = vmatprep.mubr.msk.bf16.mxu1 %vm2849_vm0, %v2848_v1  ;;  %2474 = vmatpush3.bf16.msra.mxu1 %v642_v55 }
 0x16a   : > { %2485 = vmatprep.subr.bf16.mxu1 %v2848_v1 }
 0x220   : > { %v449_v16 = vpop.f32.mrf.mxu1 }
 0x221   : > { %v455_v17 = vmul.f32 0.35355338, %v449_v16 }
 0x222   : > { %v2453_v18 = vpop.f32.mrf.mxu1 }
 0x223   : > { %v456_v19 = vsel %vm342_vm3, -1e+09, %v455_v17 }
 0x224   : > { %v452_v20 = vpop.f32.mrf.mxu1  ;;  %v457_v21 = vsel %vm408_vm2, %v456_v19, -inf }
 0x225   : > { %458 = vmax.xlane.f32.xlu1 %v457_v21 }
 0x226   : > { %v2454_v22 = vpop.f32.mrf.mxu1 }
 0x228   : > { %v565_v23 = vpop.f32.mrf.mxu1 }
 0x229   : > { %v571_v24 = vmul.f32 0.35355338, %v565_v23 }
 0x22a   : > { %v2465_v25 = vpop.f32.mrf.mxu1 }
 0x22b   : > { %v572_v26 = vsel %vm342_vm3, -1e+09, %v571_v24 }
 0x22c   : > { %v568_v27 = vpop.f32.mrf.mxu1  ;;  %v573_v28 = vsel %vm408_vm2, %v572_v26, -inf }
 0x22d   : > { %574 = vmax.xlane.f32.xlu0 %v573_v28 }
 0x22e   : > { %v2466_v29 = vpop.f32.mrf.mxu1 }
 0x2ae   : > { %v459_v30 = vpop.xlane.xlu1 %458 }
 0x2af   : > { %v460_v31 = vsub.f32 %v456_v19, %v459_v30 }
 0x2b1   : > { %v461_v32 = vmul.f32 1.442695, %v460_v31 }
 0x2b3   : > { %2716 = vpow2.f32 %v461_v32 }
 0x2b6   : > { %v575_v33 = vpop.xlane.xlu0 %574 }
 0x2b7   : > { %v576_v34 = vsub.f32 %v572_v26, %v575_v33 }
 0x2b9   : > { %v577_v35 = vmul.f32 1.442695, %v576_v34 }
 0x2bb   : > { %2718 = vpow2.f32 %v577_v35 }
 0x2c0   : > { %v2717_v36 = vpop.eup %2716 }
 0x2c1   : > { %v463_v37 = vsel %vm408_vm2, %v2717_v36, 0.0 }
 0x2c2   : > { %464 = vadd.xlane.f32.xlu0 %v463_v37 }
 0x2c8   : > { %v2719_v38 = vpop.eup %2718 }
 0x2c9   : > { %v579_v39 = vsel %vm408_vm2, %v2719_v38, 0.0 }
 0x2ca   : > { %580 = vadd.xlane.f32.xlu1 %v579_v39  ;;  %v2300_v39 = vld [vmem:[%s3434_s3 + $0x8] sm:$0xf] }
 0x2d8   : > { %470 = vrot.lane.b32.xlu0 %v2987_v6, %s3446_s19  ;;  %s3464_s19 = sshll.u32 %s3032_s24, 5 }
 0x2db   : > { %587 = vrot.lane.b32.xlu1 %v2987_v6, %s3448_s20  ;;  %s3215_s20 = scalar_lea.vmem [#allocation4], %s3464_s19 }
 0x2dc   : > { %730 = vrot.lane.b32.xlu0 %v2987_v6, %s3447_s21  ;;  %s3468_s21 = smov 40  }
 0x2df   : > { %732 = vrot.lane.b32.xlu1 %v2987_v6, %s3441_s23  ;;  %s3442_s23 = smov 72  }
 0x34b   : > { %v465_v40 = vpop.xlane.xlu0 %464 }
 0x34c   : > { %2720 = vrcp.f32 %v465_v40  ;;  %v851_v40 = vsel %vm475_vm4, %v2300_v39, 0 }
 0x34f   : > { %v471_v41 = vpop.permute.xlu0 %470 }
 0x350   : > { %v477_v42 = vsel %vm475_vm4, %v471_v41, 0 }
 0x351   : > { %2456 = vmatpush3.bf16.msra.mxu0 %v477_v42 }
 0x352   : > { %2467 = vmatprep.subr.bf16.mxu0 %v2848_v1 }
 0x353   : > { %v581_v43 = vpop.xlane.xlu1 %580  ;;  %v731_v7 = vpop.permute.xlu0 %730 }
 0x354   : > { %2722 = vrcp.f32 %v581_v43 }
 0x357   : > { %v588_v46 = vpop.permute.xlu1 %587 }
 0x358   : > { %v593_v48 = vsel %vm475_vm4, %v588_v46, 0 }
 0x359   : > { %v2721_v44 = vpop.eup %2720 }
 0x35a   : > { %v467_v45 = vmul.f32 %v2721_v44, %v2717_v36 }
 0x35b   : > { %v733_v61 = vpop.permute.xlu1 %732 }
 0x35c   : > { %468 = vst.msk [vmem:[%s3037_s13] sm:$0xff] %vm408_vm2, %v467_v45  ;;  %v469_v47 = vpack.c.bf16 %v467_v45, %v467_v45  ;;  %v738_v2 = vsel %vm408_vm2, %v733_v61, 0 }
 0x35e   : > { %2458 = vmatmul.mubr.msk.bf16.vlgmr.msra.gmra.mxu0 %vm408_vm2, %v469_v47 }
 0x35f   : > { %2468 = vmatpush3.bf16.msra.mxu0 %v593_v48  ;;  %2469 = vmatprep.mubr.msk.bf16.mxu0 %vm2849_vm0, %v2848_v1 }
 0x360   : > { %2479 = vmatprep.subr.bf16.mxu0 %v2848_v1 }
 0x361   : > { %v2723_v49 = vpop.eup %2722 }
 0x362   : > { %v583_v50 = vmul.f32 %v2723_v49, %v2719_v38 }
 0x364   : > { %2292 = vst.msk [vmem:[%s3037_s13 + $0x8] sm:$0xff] %vm408_vm2, %v583_v50  ;;  %v586_v51 = vpack.c.bf16 %v583_v50, %v583_v50 }
 0x366   : > { %2470 = vmatmul.mubr.msk.bf16.vlgmr.msra.gmra.mxu0 %vm408_vm2, %v586_v51 }
 0x367   : > { %2481 = vmatprep.mubr.msk.bf16.mxu0 %vm2849_vm0, %v2848_v1  ;;  %2480 = vmatpush3.bf16.msra.mxu0 %v688_v53 }
 0x368   : > { %2491 = vmatprep.subr.bf16.mxu0 %v2848_v1 }
 0x41e   : > { %v513_v56 = vpop.f32.mrf.mxu0 }
 0x41f   : > { %v519_v57 = vpack.c.bf16 %v513_v56, %v513_v56 }
 0x420   : > { %v2459_v58 = vpop.f32.mrf.mxu0 }
 0x421   : > { %2482 = vmatmul.mubr.msk.bf16.vlgmr.msra.gmra.mxu0 %vm408_vm2, %v519_v57 }
 0x422   : > { %v516_v59 = vpop.f32.mrf.mxu0  ;;  %2493 = vmatprep.mubr.msk.bf16.mxu0 %vm2849_vm0, %v2848_v1 }
 0x424   : > { %v2460_v60 = vpop.f32.mrf.mxu0 }
 0x426   : > { %v629_v62 = vpop.f32.mrf.mxu0 }
 0x427   : > { %v635_v63 = vpack.c.bf16 %v629_v62, %v629_v62 }
 0x428   : > { %v2471_v0 = vpop.f32.mrf.mxu0 }
 0x429   : > { %2476 = vmatmul.mubr.msk.bf16.vlgmr.msra.gmra.mxu1 %vm408_vm2, %v635_v63 }
 0x42a   : > { %2486 = vmatpush3.bf16.xpose.msra.mxu1 %v738_v2  ;;  %v632_v4 = vpop.f32.mrf.mxu0  ;;  %2487 = vmatprep.mubr.msk.bf16.mxu1 %vm2849_vm0, %v2848_v1 }
 0x42b   : > { %2497 = vmatprep.subr.bf16.mxu1 %v2848_v1 }
 0x42c   : > { %v2472_v5 = vpop.f32.mrf.mxu0 }
 0x431   : > { %2488 = vmatmul.mubr.msk.bf16.vlgmr.msra.gmra.mxu1 %vm408_vm2, %v731_v7 }
 0x432   : > { %2499 = vmatprep.mubr.msk.bf16.mxu1 %vm2849_vm0, %v2848_v1  ;;  %2498 = vmatpush3.bf16.msra.mxu1 %v851_v40 }
 0x433   : > { %2509 = vmatprep.subr.bf16.mxu1 %v2848_v1 }
 0x4e1   : > { %v724_v8 = vpop.f32.mrf.mxu0 }
 0x4e3   : > { %v2483_v9 = vpop.f32.mrf.mxu0 }
 0x4e5   : > { %v727_v10 = vpop.f32.mrf.mxu0 }
 0x4e7   : > { %v2484_v11 = vpop.f32.mrf.mxu0 }
 0x4e9   : > { %v678_v12 = vpop.f32.mrf.mxu1 }
 0x4ea   : > { %v3072_v13 = vadd.f32 %v724_v8, %v678_v12 }
 0x4eb   : > { %v2477_v14 = vpop.f32.mrf.mxu1 }
 0x4ed   : > { %v681_v16 = vpop.f32.mrf.mxu1 }
 0x4ef   : > { %v2478_v17 = vpop.f32.mrf.mxu1 }
 0x4f1   : > { %v774_v18 = vpop.f32.mrf.mxu1 }
 0x4f2   : > { %v780_v19 = vmul.f32 0.35355338, %v774_v18 }
 0x4f3   : > { %v2489_v20 = vpop.f32.mrf.mxu1 }
 0x4f4   : > { %v781_v21 = vsel %vm342_vm3, -1e+09, %v780_v19 }
 0x4f5   : > { %v777_v22 = vpop.f32.mrf.mxu1  ;;  %v782_v23 = vsel %vm408_vm2, %v781_v21, -inf }
 0x4f6   : > { %783 = vmax.xlane.f32.xlu1 %v782_v23 }
 0x4f7   : > { %v2490_v24 = vpop.f32.mrf.mxu1 }
 0x507   : > { %896 = vrot.lane.b32.xlu1 %v2987_v6, %s3442_s23  ;;  %s3443_s23 = smov 40  }
 0x50b   : > { %894 = vrot.lane.b32.xlu1 %v2987_v6, %s3444_s25  ;;  %s3462_s25 = smov 64  }
 0x57f   : > { %v784_v25 = vpop.xlane.xlu1 %783 }
 0x580   : > { %v785_v26 = vsub.f32 %v781_v21, %v784_v25 }
 0x582   : > { %v786_v27 = vmul.f32 1.442695, %v785_v26 }
 0x583   : > { %v897_v35 = vpop.permute.xlu1 %896 }
 0x584   : > { %2724 = vpow2.f32 %v786_v27  ;;  %v902_v37 = vsel %vm408_vm2, %v897_v35, 0  ;;  %v2702_v27 = vld [vmem:[%s3435_s4 + $0x8] sm:$0xff]  }
 0x587   : > { %v895_v38 = vpop.permute.xlu1 %894 }
 0x591   : > { %v2725_v28 = vpop.eup %2724 }
 0x592   : > { %v788_v29 = vsel %vm408_vm2, %v2725_v28, 0.0 }
 0x593   : > { %789 = vadd.xlane.f32.xlu0 %v788_v29  ;;  %v2705_v29 = vld [vmem:[%s3436_s5 + $0x10] sm:$0xff]  }
 0x5a9   : > { %796 = vrot.lane.b32.xlu0 %v2987_v6, %s3445_s17 }
 0x61c   : > { %v790_v30 = vpop.xlane.xlu0 %789 }
 0x61d   : > { %2726 = vrcp.f32 %v790_v30  ;;  %v2706_v30 = vld [vmem:[%s3436_s5 + $0x8] sm:$0xff]  }
 0x620   : > { %v797_v31 = vpop.permute.xlu0 %796 }
 0x621   : > { %v802_v32 = vsel %vm475_vm4, %v797_v31, 0 }
 0x622   : > { %2492 = vmatpush3.bf16.msra.mxu0 %v802_v32 }
 0x623   : > { %2503 = vmatprep.subr.bf16.mxu0 %v2848_v1 }
 0x62a   : > { %v2727_v33 = vpop.eup %2726 }
 0x62b   : > { %v792_v34 = vmul.f32 %v2727_v33, %v2725_v28  ;;  %v2704_v28 = vld [vmem:[%s3436_s5 + $0x18] sm:$0xff]  }
 0x62d   : > { %2298 = vst.msk [vmem:[%s3037_s13 + $0x10] sm:$0xff] %vm408_vm2, %v792_v34  ;;  %v795_v36 = vpack.c.bf16 %v792_v34, %v792_v34 }
 0x62f   : > { %2494 = vmatmul.mubr.msk.bf16.vlgmr.msra.gmra.mxu0 %vm408_vm2, %v795_v36 }
 0x630   : > { %2504 = vmatpush3.bf16.xpose.msra.mxu0 %v902_v37  ;;  %2505 = vmatprep.mubr.msk.bf16.mxu0 %vm2849_vm0, %v2848_v1  ;;  %v2707_v37 = vld [vmem:[%s3436_s5] sm:$0xff]  }
 0x631   : > { %2515 = vmatprep.subr.bf16.mxu0 %v2848_v1 }
 0x637   : > { %2506 = vmatmul.mubr.msk.bf16.vlgmr.msra.gmra.mxu0 %vm408_vm2, %v895_v38 }
 0x638   : > { %2517 = vmatprep.mubr.msk.bf16.mxu0 %vm2849_vm0, %v2848_v1 }
 0x6ef   : > { %v838_v41 = vpop.f32.mrf.mxu0 }
 0x6f0   : > { %v844_v42 = vpack.c.bf16 %v838_v41, %v838_v41 }
 0x6f1   : > { %v2495_v43 = vpop.f32.mrf.mxu0 }
 0x6f2   : > { %2500 = vmatmul.mubr.msk.bf16.vlgmr.msra.gmra.mxu1 %vm408_vm2, %v844_v42 }
 0x6f3   : > { %v841_v44 = vpop.f32.mrf.mxu0  ;;  %2511 = vmatprep.mubr.msk.bf16.mxu1 %vm2849_vm0, %v2848_v1 }
 0x6f5   : > { %v2496_v45 = vpop.f32.mrf.mxu0 }
 0x6f7   : > { %v938_v46 = vpop.f32.mrf.mxu0 }
 0x6f8   : > { %v944_v47 = vmul.f32 0.35355338, %v938_v46 }
 0x6f9   : > { %v2507_v48 = vpop.f32.mrf.mxu0 }
 0x6fa   : > { %v945_v49 = vsel %vm342_vm3, -1e+09, %v944_v47 }
 0x6fb   : > { %v941_v50 = vpop.f32.mrf.mxu0  ;;  %v946_v51 = vsel %vm408_vm2, %v945_v49, -inf }
 0x6fc   : > { %947 = vmax.xlane.f32.xlu0 %v946_v51 }
 0x6fd   : > { %v2508_v52 = vpop.f32.mrf.mxu0 }
 0x712   : > { %960 = vrot.lane.b32.xlu0 %v2987_v6, %s3443_s23  ;;  %v2305_v6 = vld [vmem:[%s3434_s3 + $0xc] sm:$0xf]  ;;  %s3459_s23 = smov 120  }
 0x713   : > { %v1015_v0 = vsel %vm475_vm4, %v2305_v6, 0 }
 0x714   : > { %2516 = vmatpush3.bf16.msra.mxu0 %v1015_v0 }
 0x715   : > { %2529 = vmatprep.subr.bf16.mxu0 %v2848_v1 }
 0x785   : > { %v948_v53 = vpop.xlane.xlu0 %947 }
 0x786   : > { %v949_v54 = vsub.f32 %v945_v49, %v948_v53 }
 0x788   : > { %v950_v55 = vmul.f32 1.442695, %v949_v54 }
 0x789   : > { %v961_v56 = vpop.permute.xlu0 %960 }
 0x78a   : > { %2728 = vpow2.f32 %v950_v55  ;;  %v966_v57 = vsel %vm475_vm4, %v961_v56, 0  ;;  %v2708_v55 = vld [vmem:[%s3456_s2 + $0x18] sm:$0xff]   ;;  %v2709_v56 = vld [vmem:[%s3456_s2 + $0x10] sm:$0xff]  }
 0x78b   : > { %2510 = vmatpush3.bf16.msra.mxu1 %v966_v57 }
 0x78c   : > { %2521 = vmatprep.subr.bf16.mxu1 %v2848_v1 }
 0x797   : > { %v2729_v58 = vpop.eup %2728 }
 0x798   : > { %v952_v59 = vsel %vm408_vm2, %v2729_v58, 0.0 }
 0x799   : > { %953 = vadd.xlane.f32.xlu1 %v952_v59 }
 0x7b2   : > { %v887_v60 = vpop.f32.mrf.mxu1 }
 0x7b3   : > { %v893_v61 = vadd.f32 %v887_v60, %v3072_v13 }
 0x7b4   : > { %v2501_v62 = vpop.f32.mrf.mxu1 }
 0x7b6   : > { %v890_v63 = vpop.f32.mrf.mxu1 }
 0x7b8   : > { %v2502_v2 = vpop.f32.mrf.mxu1 }
 0x822   : > { %v954_v4 = vpop.xlane.xlu1 %953 }
 0x823   : > { %2730 = vrcp.f32 %v954_v4 }
 0x830   : > { %v2731_v5 = vpop.eup %2730 }
 0x831   : > { %v956_v7 = vmul.f32 %v2731_v5, %v2729_v58 }
 0x833   : > { %2303 = vst.msk [vmem:[%s3037_s13 + $0x18] sm:$0xff] %vm408_vm2, %v956_v7  ;;  %v959_v8 = vpack.c.bf16 %v956_v7, %v956_v7 }
 0x835   : > { %2512 = vmatmul.mubr.msk.bf16.vlgmr.msra.gmra.mxu1 %vm408_vm2, %v959_v8 }
 0x836   : > { %2525 = vmatprep.mubr.msk.bf16.mxu1 %vm2849_vm0, %v2848_v1  ;;  %2522 = vmatpush3.bf16.msra.mxu1 %v2702_v27 }
 0x837   : > { %2523 = vmatprep.subr.bf16.mxu1 %v2848_v1 }
 0x8f5   : > { %v1002_v9 = vpop.f32.mrf.mxu1 }
 0x8f6   : > { %v1008_v10 = vpack.c.bf16 %v1002_v9, %v1002_v9 }
 0x8f7   : > { %v2513_v11 = vpop.f32.mrf.mxu1 }
 0x8f8   : > { %2518 = vmatmul.mubr.msk.bf16.vlgmr.msra.gmra.mxu0 %vm408_vm2, %v1008_v10 }
 0x8f9   : > { %v1005_v12 = vpop.f32.mrf.mxu1  ;;  %2537 = vmatprep.mubr.msk.bf16.mxu0 %vm2849_vm0, %v2848_v1  ;;  %2530 = vmatpush3.bf16.msra.mxu0 %v2704_v28 }
 0x8fa   : > { %2531 = vmatprep.subr.bf16.mxu0 %v2848_v1 }
 0x8fb   : > { %v2514_v13 = vpop.f32.mrf.mxu1 }
 0x8fd   : > { %2532 = vmatpush3.bf16.msra.mxu0 %v2705_v29 }
 0x8fe   : > { %2533 = vmatprep.subr.bf16.mxu0 %v2848_v1 }
 0x901   : > { %2534 = vmatpush3.bf16.msra.mxu0 %v2706_v30 }
 0x902   : > { %2535 = vmatprep.subr.bf16.mxu0 %v2848_v1 }
 0x905   : > { %2536 = vmatpush3.bf16.msra.mxu0 %v2707_v37 }
 0x906   : > { %2555 = vmatprep.subr.bf16.mxu0 %v2848_v1 }
 0x9b8   : > { %v1051_v14 = vpop.f32.mrf.mxu0 }
 0x9b9   : > { %v1057_v16 = vadd.f32 %v1051_v14, %v893_v61 }
 0x9ba   : > { %v2519_v17 = vpop.f32.mrf.mxu0 }
 0x9bb   : > { %v1058_v18 = vadd.f32 %v1057_v16, %v2980_v3  ;;  %v2703_v3 = vld [vmem:[%s3435_s4] sm:$0xff]  }
 0x9bc   : > { %v1054_v19 = vpop.f32.mrf.mxu0  ;;  %2524 = vmatpush3.bf16.msra.mxu1 %v2703_v3 }
 0x9bd   : > { %v1059_v20 = vsel %vm360_vm1, %v1058_v18, 0.0  ;;  %2541 = vmatprep.subr.bf16.mxu1 %v2848_v1 }
 0x9be   : > { %1060 = vadd.xlane.f32.xlu1 %v1059_v20  ;;  %v2520_v21 = vpop.f32.mrf.mxu0 }
 0xa47   : > { %v1061_v22 = vpop.xlane.xlu1 %1060 }
 0xa48   : > { %v1063_v23 = vmul.f32 0.03125, %v1061_v22 }
 0xa4a   : > { %v1064_v24 = vsub.f32 %v1058_v18, %v1063_v23 }
 0xa4c   : > { %v1065_v25 = vmul.f32 %v1064_v24, %v1064_v24 }
 0xa4e   : > { %v1066_v26 = vsel %vm360_vm1, %v1065_v25, 0.0 }
 0xa4f   : > { %1067 = vadd.xlane.f32.xlu1 %v1066_v26 }
 0xad8   : > { %v1068_v31 = vpop.xlane.xlu1 %1067 }
 0xad9   : > { %v1069_v32 = vmul.f32 0.03125, %v1068_v31 }
 0xadb   : > { %v1070_v33 = vadd.f32 1e-05, %v1069_v32 }
 0xadd   : > { %2732 = vrsqrt.f32 %v1070_v33 }
 0xaea   : > { %v2733_v34 = vpop.eup %2732 }
 0xaeb   : > { %v1072_v35 = vmul.f32 %v2733_v34, %v1064_v24 }
 0xaed   : > { %v1073_v36 = vpack.c.bf16 %v1072_v35, %v1072_v35 }
 0xaef   : > { %2526 = vmatmul.mubr.msk.bf16.vlgmr.msra.gmra.mxu1 %vm360_vm1, %v1073_v36 }
 0xaf0   : > { %2545 = vmatprep.mubr.msk.bf16.mxu1 %vm2849_vm0, %v2848_v1  ;;  %2542 = vmatpush3.bf16.msra.mxu1 %v2708_v55 }
 0xaf1   : > { %2543 = vmatprep.subr.bf16.mxu1 %v2848_v1 }
 0xaf4   : > { %2544 = vmatpush3.bf16.msra.mxu1 %v2709_v56 }
 0xaf5   : > { %2549 = vmatprep.subr.bf16.mxu1 %v2848_v1 }
 0xbaf   : > { %v1127_v38 = vpop.f32.mrf.mxu1 }
 0xbb0   : > { %v1133_v39 = vmax.f32 %v1127_v38, 0.0 }
 0xbb1   : > { %v2527_v40 = vpop.f32.mrf.mxu1 }
 0xbb2   : > { %v1134_v41 = vpack.c.bf16 %v1133_v39, %v1133_v39 }
 0xbb3   : > { %v1130_v42 = vpop.f32.mrf.mxu1 }
 0xbb4   : > { %2538 = vmatmul.mubr.msk.bf16.vlgmr.msra.gmra.mxu0 %vm1167_vm5, %v1134_v41 }
 0xbb5   : > { %v2528_v43 = vpop.f32.mrf.mxu1  ;;  %2557 = vmatprep.mubr.msk.bf16.mxu0 %vm2849_vm0, %v2848_v1 }
 0xc74   : > { %v1205_v44 = vpop.f32.mrf.mxu0 }
 0xc75   : > { %v1206_v45 = vadd.f32 %v1205_v44, %v1072_v35 }
 0xc76   : > { %v2539_v46 = vpop.f32.mrf.mxu0 }
 0xc77   : > { %v1211_v47 = vsel %vm360_vm1, %v1206_v45, 0.0 }
 0xc78   : > { %1212 = vadd.xlane.f32.xlu1 %v1211_v47  ;;  %v1208_v48 = vpop.f32.mrf.mxu0  ;;  %v2324_v47 = vld [vmem:[%s3434_s3 + $0x10] sm:$0xf] }
 0xc79   : > { %v1568_v48 = vsel %vm475_vm4, %v2324_v47, 0 }
 0xc7a   : > { %v2540_v49 = vpop.f32.mrf.mxu0 }
 0xc7b   : > { %v2328_v49 = vld [vmem:[%s3434_s3 + $0x14] sm:$0xf] }
 0xd01   : > { %v1213_v50 = vpop.xlane.xlu1 %1212 }
 0xd02   : > { %v1214_v51 = vmul.f32 0.03125, %v1213_v50  ;;  %v1522_v50 = vsel %vm475_vm4, %v2328_v49, 0 }
 0xd04   : > { %v1215_v52 = vsub.f32 %v1206_v45, %v1214_v51 }
 0xd06   : > { %v1216_v53 = vmul.f32 %v1215_v52, %v1215_v52 }
 0xd08   : > { %v1217_v54 = vsel %vm360_vm1, %v1216_v53, 0.0 }
 0xd09   : > { %1218 = vadd.xlane.f32.xlu1 %v1217_v54 }
 0xd92   : > { %v1219_v57 = vpop.xlane.xlu1 %1218 }
 0xd93   : > { %v1220_v58 = vmul.f32 0.03125, %v1219_v57 }
 0xd95   : > { %v1221_v59 = vadd.f32 1e-05, %v1220_v58 }
 0xd97   : > { %2734 = vrsqrt.f32 %v1221_v59 }
 0xda4   : > { %v2735_v60 = vpop.eup %2734 }
 0xda5   : > { %v3169_v61 = vmul.f32 %v2735_v60, %v1215_v52 }
 0xda7   : > { %v1224_v62 = vpack.c.bf16 %v3169_v61, %v3169_v61 }
 0xda9   : > { %2546 = vmatmul.mubr.msk.bf16.vlgmr.msra.gmra.mxu1 %vm360_vm1, %v1224_v62 }
 0xdaa   : > { %2551 = vmatprep.mubr.msk.bf16.mxu1 %vm2849_vm0, %v2848_v1 }
 0xe69   : > { %v1279_v6 = vpop.f32.mrf.mxu1 }
 0xe6a   : > { %v3176_v63 = vpack.c.bf16 %v1279_v6, %v1279_v6 }
 0xe6b   : > { %v2547_v0 = vpop.f32.mrf.mxu1 }
 0xe6c   : > { %1403 = vrot.lane.b32.xlu0 %v3176_v63, %s2852_s12  ;;  %1287 = vrot.lane.b32.xlu1 %v3176_v63, %s2851_s10  ;;  %s3460_s10 = smov 56   ;;  %s3461_s12 = smov 112  }
 0xe6d   : > { %v1282_v2 = vpop.f32.mrf.mxu1 }
 0xe6f   : > { %v2548_v4 = vpop.f32.mrf.mxu1 }
 0xe70   : > { %1401 = vrot.lane.b32.xlu0 %v3176_v63, %s3459_s23 }
 0xede   : > { %v1288_v5 = vpop.permute.xlu1 %1287  ;;  %v1404_v8 = vpop.permute.xlu0 %1403 }
 0xedf   : > { %v1293_v7 = vsel %vm408_vm2, %v1288_v5, 0  ;;  %v1409_v9 = vsel %vm408_vm2, %v1404_v8, 0 }
 0xee0   : > { %2550 = vmatpush3.bf16.xpose.msra.mxu1 %v1293_v7 }
 0xee1   : > { %2561 = vmatprep.subr.bf16.mxu1 %v2848_v1 }
 0xee2   : > { %v1402_v10 = vpop.permute.xlu0 %1401 }
 0xee7   : > { %2552 = vmatmul.mubr.msk.bf16.vlgmr.msra.gmra.mxu1 %vm408_vm2, %v3176_v63 }
 0xee8   : > { %2562 = vmatpush3.bf16.xpose.msra.mxu1 %v1409_v9  ;;  %2563 = vmatprep.mubr.msk.bf16.mxu1 %vm2849_vm0, %v2848_v1 }
 0xee9   : > { %2573 = vmatprep.subr.bf16.mxu1 %v2848_v1 }
 0xeef   : > { %2564 = vmatmul.mubr.msk.bf16.vlgmr.msra.gmra.mxu1 %vm408_vm2, %v1402_v10 }
 0xef0   : > { %2575 = vmatprep.mubr.msk.bf16.mxu1 %vm2849_vm0, %v2848_v1  ;;  %2574 = vmatpush3.bf16.msra.mxu1 %v1522_v50 }
 0xef1   : > { %2585 = vmatprep.subr.bf16.mxu1 %v2848_v1 }
 0xfa7   : > { %v1329_v11 = vpop.f32.mrf.mxu1 }
 0xfa8   : > { %v1335_v12 = vmul.f32 0.35355338, %v1329_v11 }
 0xfa9   : > { %v2553_v13 = vpop.f32.mrf.mxu1 }
 0xfaa   : > { %v1336_v14 = vsel %vm342_vm3, -1e+09, %v1335_v12 }
 0xfab   : > { %v1332_v16 = vpop.f32.mrf.mxu1  ;;  %v1337_v17 = vsel %vm408_vm2, %v1336_v14, -inf }
 0xfac   : > { %1338 = vmax.xlane.f32.xlu0 %v1337_v17 }
 0xfad   : > { %v2554_v18 = vpop.f32.mrf.mxu1 }
 0xfaf   : > { %v1445_v19 = vpop.f32.mrf.mxu1 }
 0xfb0   : > { %v1451_v20 = vmul.f32 0.35355338, %v1445_v19 }
 0xfb1   : > { %v2565_v21 = vpop.f32.mrf.mxu1 }
 0xfb2   : > { %v1452_v22 = vsel %vm342_vm3, -1e+09, %v1451_v20 }
 0xfb3   : > { %v1448_v23 = vpop.f32.mrf.mxu1  ;;  %v1453_v24 = vsel %vm408_vm2, %v1452_v22, -inf }
 0xfb4   : > { %1454 = vmax.xlane.f32.xlu1 %v1453_v24 }
 0xfb5   : > { %v2566_v25 = vpop.f32.mrf.mxu1 }
 0xfc5   : > { %1467 = vrot.lane.b32.xlu1 %v3176_v63, %s3460_s10  ;;  %s3465_s10 = smov 48  }
 0xfc9   : > { %1610 = vrot.lane.b32.xlu1 %v3176_v63, %s3461_s12  ;;  %s3466_s12 = smov 104  }
0x1035   : > { %v1339_v26 = vpop.xlane.xlu0 %1338 }
0x1036   : > { %v1340_v27 = vsub.f32 %v1336_v14, %v1339_v26 }
0x1038   : > { %v1341_v3 = vmul.f32 1.442695, %v1340_v27 }
0x103a   : > { %2736 = vpow2.f32 %v1341_v3 }
0x103d   : > { %v1455_v28 = vpop.xlane.xlu1 %1454 }
0x103e   : > { %v1456_v29 = vsub.f32 %v1452_v22, %v1455_v28 }
0x1040   : > { %v1457_v30 = vmul.f32 1.442695, %v1456_v29 }
0x1041   : > { %v1468_v41 = vpop.permute.xlu1 %1467 }
0x1042   : > { %2738 = vpow2.f32 %v1457_v30  ;;  %v1473_v43 = vsel %vm475_vm4, %v1468_v41, 0 }
0x1045   : > { %v1611_v0 = vpop.permute.xlu1 %1610 }
0x1047   : > { %v2737_v31 = vpop.eup %2736 }
0x1048   : > { %v1343_v32 = vsel %vm408_vm2, %v2737_v31, 0.0 }
0x1049   : > { %1344 = vadd.xlane.f32.xlu0 %v1343_v32 }
0x104f   : > { %v2739_v33 = vpop.eup %2738 }
0x1050   : > { %v1459_v34 = vsel %vm408_vm2, %v2739_v33, 0.0 }
0x1051   : > { %1460 = vadd.xlane.f32.xlu0 %v1459_v34  ;;  %v2334_v34 = vld [vmem:[%s3434_s3 + $0x18] sm:$0xf] }
0x1067   : > { %1350 = vrot.lane.b32.xlu0 %v3176_v63, %s3462_s25  ;;  %s3467_s25 = smov 72  }
0x106b   : > { %1612 = vrot.lane.b32.xlu0 %v3176_v63, %s3463_s26  ;;  %s2131_s26 = sshll.u32 %s3037_s13, 4  ;;  %s3346_s26 = int_to_ptr.vmem [resolvable:$true] %s2131_s26 }
0x106c   : > { %s2756_s23 = scalar_lea.vmem %s3346_s26, 512 }
0x106d   : > { %p2757_p11 = scmp.ne.s32.totalorder %s3346_s26, %s2756_s23 }
0x106f   : > { %p2758_p12 = pnand %p2757_p11, %p2948_p5 }
0x1071   : > { %p2759_p13 = pneg %p2758_p12 }
0x10d2   : > { %v1345_v35 = vpop.xlane.xlu0 %1344 }
0x10d3   : > { %2740 = vrcp.f32 %v1345_v35  ;;  %v1731_v35 = vsel %vm475_vm4, %v2334_v34, 0 }
0x10da   : > { %v1461_v36 = vpop.xlane.xlu0 %1460 }
0x10db   : > { %2742 = vrcp.f32 %v1461_v36 }
0x10de   : > { %v1351_v37 = vpop.permute.xlu0 %1350 }
0x10df   : > { %v1356_v38 = vsel %vm475_vm4, %v1351_v37, 0 }
0x10e0   : > { %v2741_v39 = vpop.eup %2740  ;;  %2556 = vmatpush3.bf16.msra.mxu0 %v1356_v38 }
0x10e1   : > { %2567 = vmatprep.subr.bf16.mxu0 %v2848_v1  ;;  %v1347_v40 = vmul.f32 %v2741_v39, %v2737_v31 }
0x10e2   : > { %v1613_v56 = vpop.permute.xlu0 %1612 }
0x10e3   : > { %1348 = vst.msk [vmem:[%s3215_s20] sm:$0xff] %vm408_vm2, %v1347_v40  ;;  %v1349_v42 = vpack.c.bf16 %v1347_v40, %v1347_v40  ;;  %v1618_v60 = vsel %vm408_vm2, %v1613_v56, 0 }
0x10e5   : > { %2558 = vmatmul.mubr.msk.bf16.vlgmr.msra.gmra.mxu0 %vm408_vm2, %v1349_v42 }
0x10e6   : > { %2568 = vmatpush3.bf16.msra.mxu0 %v1473_v43  ;;  %2569 = vmatprep.mubr.msk.bf16.mxu0 %vm2849_vm0, %v2848_v1 }
0x10e7   : > { %2579 = vmatprep.subr.bf16.mxu0 %v2848_v1 }
0x10e8   : > { %v2743_v44 = vpop.eup %2742 }
0x10e9   : > { %v1463_v45 = vmul.f32 %v2743_v44, %v2739_v33 }
0x10eb   : > { %2326 = vst.msk [vmem:[%s3215_s20 + $0x8] sm:$0xff] %vm408_vm2, %v1463_v45  ;;  %v1466_v46 = vpack.c.bf16 %v1463_v45, %v1463_v45 }
0x10ed   : > { %2570 = vmatmul.mubr.msk.bf16.vlgmr.msra.gmra.mxu0 %vm408_vm2, %v1466_v46 }
0x10ee   : > { %2581 = vmatprep.mubr.msk.bf16.mxu0 %vm2849_vm0, %v2848_v1  ;;  %2580 = vmatpush3.bf16.msra.mxu0 %v1568_v48 }
0x10ef   : > { %2591 = vmatprep.subr.bf16.mxu0 %v2848_v1 }
0x11a5   : > { %v1392_v51 = vpop.f32.mrf.mxu0 }
0x11a6   : > { %v1398_v52 = vpack.c.bf16 %v1392_v51, %v1392_v51 }
0x11a7   : > { %v2559_v53 = vpop.f32.mrf.mxu0 }
0x11a8   : > { %2582 = vmatmul.mubr.msk.bf16.vlgmr.msra.gmra.mxu0 %vm408_vm2, %v1398_v52 }
0x11a9   : > { %v1395_v54 = vpop.f32.mrf.mxu0  ;;  %2593 = vmatprep.mubr.msk.bf16.mxu0 %vm2849_vm0, %v2848_v1 }
0x11ab   : > { %v2560_v55 = vpop.f32.mrf.mxu0 }
0x11ac   : > { %v2339_v55 = vld [vmem:[%s3434_s3 + $0x1c] sm:$0xf] }
0x11ad   : > { %v1509_v57 = vpop.f32.mrf.mxu0 }
0x11ae   : > { %v1515_v58 = vpack.c.bf16 %v1509_v57, %v1509_v57  ;;  %v1895_v57 = vsel %vm475_vm4, %v2339_v55, 0 }
0x11af   : > { %v2571_v59 = vpop.f32.mrf.mxu0 }
0x11b0   : > { %2576 = vmatmul.mubr.msk.bf16.vlgmr.msra.gmra.mxu1 %vm408_vm2, %v1515_v58 }
0x11b1   : > { %2586 = vmatpush3.bf16.xpose.msra.mxu1 %v1618_v60  ;;  %v1512_v62 = vpop.f32.mrf.mxu0  ;;  %2587 = vmatprep.mubr.msk.bf16.mxu1 %vm2849_vm0, %v2848_v1 }
0x11b2   : > { %2597 = vmatprep.subr.bf16.mxu1 %v2848_v1 }
0x11b3   : > { %v2572_v6 = vpop.f32.mrf.mxu0 }
0x11b8   : > { %2588 = vmatmul.mubr.msk.bf16.vlgmr.msra.gmra.mxu1 %vm408_vm2, %v1611_v0 }
0x11b9   : > { %2599 = vmatprep.mubr.msk.bf16.mxu1 %vm2849_vm0, %v2848_v1  ;;  %2598 = vmatpush3.bf16.msra.mxu1 %v1731_v35 }
0x11ba   : > { %2609 = vmatprep.subr.bf16.mxu1 %v2848_v1 }
0x1268   : > { %v1604_v2 = vpop.f32.mrf.mxu0 }
0x126a   : > { %v2583_v4 = vpop.f32.mrf.mxu0 }
0x126c   : > { %v1607_v5 = vpop.f32.mrf.mxu0 }
0x126e   : > { %v2584_v7 = vpop.f32.mrf.mxu0 }
0x1270   : > { %v1558_v8 = vpop.f32.mrf.mxu1 }
0x1271   : > { %v3250_v9 = vadd.f32 %v1604_v2, %v1558_v8 }
0x1272   : > { %v2577_v10 = vpop.f32.mrf.mxu1 }
0x1274   : > { %v1561_v11 = vpop.f32.mrf.mxu1 }
0x1276   : > { %v2578_v12 = vpop.f32.mrf.mxu1 }
0x1278   : > { %v1654_v13 = vpop.f32.mrf.mxu1 }
0x1279   : > { %v1660_v14 = vmul.f32 0.35355338, %v1654_v13 }
0x127a   : > { %v2589_v16 = vpop.f32.mrf.mxu1 }
0x127b   : > { %v1661_v17 = vsel %vm342_vm3, -1e+09, %v1660_v14 }
0x127c   : > { %v1657_v18 = vpop.f32.mrf.mxu1  ;;  %v1662_v19 = vsel %vm408_vm2, %v1661_v17, -inf }
0x127d   : > { %1663 = vmax.xlane.f32.xlu0 %v1662_v19 }
0x127e   : > { %v2590_v20 = vpop.f32.mrf.mxu1 }
0x1293   : > { %1676 = vrot.lane.b32.xlu0 %v3176_v63, %s3465_s10  ;;  %s2861_s10 = smov [#allocation2]  }
0x1297   : > { %1774 = vrot.lane.b32.xlu0 %v3176_v63, %s3466_s12  ;;  %s2760_s12 = sshll.u32 %s2861_s10, 4  ;;  %s2761_s12 = int_to_ptr.vmem [resolvable:$false] %s2760_s12 }
0x1298   : > { %s2762_s13 = scalar_lea.vmem %s2761_s12, 1024  ;;  %p2763_p0 = scmp.lt.s32.totalorder %s3346_s26, %s2761_s12 }
0x1299   : > { %p2764_p1 = scmp.lt.s32.totalorder %s2762_s13, %s2756_s23 }
0x129b   : > { %p2765_p2 = por %p2764_p1, %p2763_p0 }
0x129d   : > { %p2766_p3 = pnand %p2765_p2, %p2759_p13 }
0x1306   : > { %v1664_v21 = vpop.xlane.xlu0 %1663 }
0x1307   : > { %v1665_v22 = vsub.f32 %v1661_v17, %v1664_v21 }
0x1309   : > { %v1666_v23 = vmul.f32 1.442695, %v1665_v22  ;;  %v2710_v22 = vld [vmem:[%s3435_s4 + $0x18] sm:$0xff]  }
0x130a   : > { %v1677_v24 = vpop.permute.xlu0 %1676 }
0x130b   : > { %2744 = vpow2.f32 %v1666_v23  ;;  %v1682_v25 = vsel %vm475_vm4, %v1677_v24, 0  ;;  %v2712_v23 = vld [vmem:[%s3436_s5 + $0x38] sm:$0xff]   ;;  %v2713_v24 = vld [vmem:[%s3436_s5 + $0x30] sm:$0xff]  }
0x130c   : > { %2592 = vmatpush3.bf16.msra.mxu0 %v1682_v25  ;;  %v2714_v25 = vld [vmem:[%s3436_s5 + $0x28] sm:$0xff]  }
0x130d   : > { %2603 = vmatprep.subr.bf16.mxu0 %v2848_v1 }
0x130e   : > { %v1775_v33 = vpop.permute.xlu0 %1774 }
0x1318   : > { %v2745_v26 = vpop.eup %2744 }
0x1319   : > { %v1668_v27 = vsel %vm408_vm2, %v2745_v26, 0.0 }
0x131a   : > { %1669 = vadd.xlane.f32.xlu1 %v1668_v27 }
0x132b   : > { %1776 = vrot.lane.b32.xlu1 %v3176_v63, %s3467_s25  ;;  %s3450_s25 = sshll.u32 %s2931_s9, 9 }
0x132c   : > { %s3344_s17 = scalar_lea.hbm %s3438_s7, %s3450_s25 }
0x13a3   : > { %v1670_v3 = vpop.xlane.xlu1 %1669 }
0x13a4   : > { %2746 = vrcp.f32 %v1670_v3 }
0x13a7   : > { %v1777_v30 = vpop.permute.xlu1 %1776 }
0x13a8   : > { %v1782_v32 = vsel %vm408_vm2, %v1777_v30, 0 }
0x13b1   : > { %v2747_v28 = vpop.eup %2746 }
0x13b2   : > { %v1672_v29 = vmul.f32 %v2747_v28, %v2745_v26 }
0x13b4   : > { %2332 = vst.msk [vmem:[%s3215_s20 + $0x10] sm:$0xff] %vm408_vm2, %v1672_v29  ;;  %v1675_v31 = vpack.c.bf16 %v1672_v29, %v1672_v29 }
0x13b6   : > { %2594 = vmatmul.mubr.msk.bf16.vlgmr.msra.gmra.mxu0 %vm408_vm2, %v1675_v31  ;;  %v2715_v31 = vld [vmem:[%s3436_s5 + $0x20] sm:$0xff]  }
0x13b7   : > { %2604 = vmatpush3.bf16.xpose.msra.mxu0 %v1782_v32  ;;  %2605 = vmatprep.mubr.msk.bf16.mxu0 %vm2849_vm0, %v2848_v1 }
0x13b8   : > { %2615 = vmatprep.subr.bf16.mxu0 %v2848_v1 }
0x13be   : > { %2606 = vmatmul.mubr.msk.bf16.vlgmr.msra.gmra.mxu0 %vm408_vm2, %v1775_v33 }
0x13bf   : > { %2617 = vmatprep.mubr.msk.bf16.mxu0 %vm2849_vm0, %v2848_v1  ;;  %2616 = vmatpush3.bf16.msra.mxu0 %v1895_v57 }
0x13c0   : > { %2629 = vmatprep.subr.bf16.mxu0 %v2848_v1 }
0x1476   : > { %v1718_v36 = vpop.f32.mrf.mxu0 }
0x1477   : > { %v1724_v37 = vpack.c.bf16 %v1718_v36, %v1718_v36 }
0x1478   : > { %v2595_v38 = vpop.f32.mrf.mxu0 }
0x1479   : > { %2600 = vmatmul.mubr.msk.bf16.vlgmr.msra.gmra.mxu1 %vm408_vm2, %v1724_v37 }
0x147a   : > { %v1721_v39 = vpop.f32.mrf.mxu0  ;;  %2611 = vmatprep.mubr.msk.bf16.mxu1 %vm2849_vm0, %v2848_v1 }
0x147c   : > { %v2596_v40 = vpop.f32.mrf.mxu0 }
0x147e   : > { %v1818_v41 = vpop.f32.mrf.mxu0 }
0x147f   : > { %v1824_v42 = vmul.f32 0.35355338, %v1818_v41 }
0x1480   : > { %v2607_v43 = vpop.f32.mrf.mxu0 }
0x1481   : > { %v1825_v44 = vsel %vm342_vm3, -1e+09, %v1824_v42 }
0x1482   : > { %v1821_v45 = vpop.f32.mrf.mxu0  ;;  %v1826_v46 = vsel %vm408_vm2, %v1825_v44, -inf }
0x1483   : > { %1827 = vmax.xlane.f32.xlu1 %v1826_v46 }
0x1484   : > { %v2608_v47 = vpop.f32.mrf.mxu0 }
0x150c   : > { %v1828_v48 = vpop.xlane.xlu1 %1827 }
0x150d   : > { %v1829_v49 = vsub.f32 %v1825_v44, %v1828_v48 }
0x150f   : > { %v1830_v50 = vmul.f32 1.442695, %v1829_v49 }
0x1511   : > { %2748 = vpow2.f32 %v1830_v50 }
0x151e   : > { %v2749_v51 = vpop.eup %2748 }
0x151f   : > { %v1832_v52 = vsel %vm408_vm2, %v2749_v51, 0.0 }
0x1520   : > { %1833 = vadd.xlane.f32.xlu0 %v1832_v52 }
0x1536   : > { %1840 = vrot.lane.b32.xlu0 %v3176_v63, %s3468_s21 }
0x1539   : > { %v1767_v53 = vpop.f32.mrf.mxu1 }
0x153a   : > { %v1773_v15 = vadd.f32 %v1767_v53, %v3250_v9 }
0x153b   : > { %v2601_v54 = vpop.f32.mrf.mxu1 }
0x153d   : > { %v1770_v56 = vpop.f32.mrf.mxu1 }
0x153f   : > { %v2602_v58 = vpop.f32.mrf.mxu1 }
0x15a9   : > { %v1834_v59 = vpop.xlane.xlu0 %1833 }
0x15aa   : > { %2750 = vrcp.f32 %v1834_v59 }
0x15ad   : > { %v1841_v60 = vpop.permute.xlu0 %1840 }
0x15ae   : > { %v1846_v63 = vsel %vm475_vm4, %v1841_v60, 0 }
0x15af   : > { %2610 = vmatpush3.bf16.msra.mxu1 %v1846_v63 }
0x15b0   : > { %2621 = vmatprep.subr.bf16.mxu1 %v2848_v1 }
0x15b7   : > { %v2751_v62 = vpop.eup %2750 }
0x15b8   : > { %v1836_v6 = vmul.f32 %v2751_v62, %v2749_v51 }
0x15ba   : > { %2337 = vst.msk [vmem:[%s3215_s20 + $0x18] sm:$0xff] %vm408_vm2, %v1836_v6  ;;  %v1839_v0 = vpack.c.bf16 %v1836_v6, %v1836_v6 }
0x15bc   : > { %2612 = vmatmul.mubr.msk.bf16.vlgmr.msra.gmra.mxu1 %vm408_vm2, %v1839_v0 }
0x15bd   : > { %2625 = vmatprep.mubr.msk.bf16.mxu1 %vm2849_vm0, %v2848_v1  ;;  %2622 = vmatpush3.bf16.msra.mxu1 %v2710_v22 }
0x15be   : > { %2623 = vmatprep.subr.bf16.mxu1 %v2848_v1 }
0x167c   : > { %v1882_v2 = vpop.f32.mrf.mxu1 }
0x167d   : > { %v1888_v4 = vpack.c.bf16 %v1882_v2, %v1882_v2 }
0x167e   : > { %v2613_v5 = vpop.f32.mrf.mxu1 }
0x167f   : > { %2618 = vmatmul.mubr.msk.bf16.vlgmr.msra.gmra.mxu0 %vm408_vm2, %v1888_v4 }
0x1680   : > { %v1885_v7 = vpop.f32.mrf.mxu1  ;;  %2637 = vmatprep.mubr.msk.bf16.mxu0 %vm2849_vm0, %v2848_v1  ;;  %2630 = vmatpush3.bf16.msra.mxu0 %v2712_v23 }
0x1681   : > { %2631 = vmatprep.subr.bf16.mxu0 %v2848_v1 }
0x1682   : > { %v2614_v8 = vpop.f32.mrf.mxu1 }
0x1684   : > { %2632 = vmatpush3.bf16.msra.mxu0 %v2713_v24 }
0x1685   : > { %2633 = vmatprep.subr.bf16.mxu0 %v2848_v1 }
0x1688   : > { %2634 = vmatpush3.bf16.msra.mxu0 %v2714_v25 }
0x1689   : > { %2635 = vmatprep.subr.bf16.mxu0 %v2848_v1 }
0x168c   : > { %2636 = vmatpush3.bf16.msra.mxu0 %v2715_v31 }
0x173f   : > { %v1931_v9 = vpop.f32.mrf.mxu0 }
0x1740   : > { %v1937_v10 = vadd.f32 %v1931_v9, %v1773_v15 }
0x1741   : > { %v2619_v11 = vpop.f32.mrf.mxu0 }
0x1742   : > { %v1938_v12 = vadd.f32 %v1937_v10, %v3169_v61  ;;  %v2711_v61 = vld [vmem:[%s3435_s4 + $0x10] sm:$0xff]  }
0x1743   : > { %v1934_v13 = vpop.f32.mrf.mxu0  ;;  %2624 = vmatpush3.bf16.msra.mxu1 %v2711_v61 }
0x1744   : > { %v1939_v14 = vsel %vm360_vm1, %v1938_v12, 0.0 }
0x1745   : > { %1940 = vadd.xlane.f32.xlu1 %v1939_v14  ;;  %v2620_v16 = vpop.f32.mrf.mxu0 }
0x17ce   : > { %v1941_v17 = vpop.xlane.xlu1 %1940 }
0x17cf   : > { %v1942_v18 = vmul.f32 0.03125, %v1941_v17 }
0x17d1   : > { %v1943_v19 = vsub.f32 %v1938_v12, %v1942_v18 }
0x17d3   : > { %v1944_v20 = vmul.f32 %v1943_v19, %v1943_v19 }
0x17d5   : > { %v1945_v21 = vsel %vm360_vm1, %v1944_v20, 0.0 }
0x17d6   : > { %1946 = vadd.xlane.f32.xlu1 %v1945_v21 }
0x185f   : > { %v1947_v26 = vpop.xlane.xlu1 %1946 }
0x1860   : > { %v1948_v27 = vmul.f32 0.03125, %v1947_v26 }
0x1862   : > { %v1949_v3 = vadd.f32 1e-05, %v1948_v27 }
0x1864   : > { %2752 = vrsqrt.f32 %v1949_v3 }
0x1871   : > { %v2753_v28 = vpop.eup %2752 }
0x1872   : > { %v1951_v29 = vmul.f32 %v2753_v28, %v1943_v19 }
0x1874   : > { %v1952_v30 = vpack.c.bf16 %v1951_v29, %v1951_v29 }
0x1876   : > { %2626 = vmatmul.mubr.msk.bf16.vlgmr.msra.gmra.mxu1 %vm360_vm1, %v1952_v30 }
0x1936   : > { %v2007_v32 = vpop.f32.mrf.mxu1 }
0x1937   : > { %v2013_v33 = vmax.f32 %v2007_v32, 0.0 }
0x1938   : > { %v2627_v34 = vpop.f32.mrf.mxu1 }
0x1939   : > { %v2014_v35 = vpack.c.bf16 %v2013_v33, %v2013_v33 }
0x193a   : > { %v2010_v36 = vpop.f32.mrf.mxu1 }
0x193b   : > { %2638 = vmatmul.mubr.msk.bf16.vlgmr.msra.gmra.mxu0 %vm1167_vm5, %v2014_v35 }
0x193c   : > { %v2628_v1 = vpop.f32.mrf.mxu1 }
0x19fb   : > { %v2085_v37 = vpop.f32.mrf.mxu0 }
0x19fc   : > { %v2086_v38 = vadd.f32 %v2085_v37, %v1951_v29 }
0x19fd   : > { %v2639_v39 = vpop.f32.mrf.mxu0 }
0x19fe   : > { %v2091_v40 = vsel %vm360_vm1, %v2086_v38, 0.0 }
0x19ff   : > { %2092 = vadd.xlane.f32.xlu1 %v2091_v40  ;;  %v2088_v41 = vpop.f32.mrf.mxu0 }
0x1a01   : > { %v2640_v42 = vpop.f32.mrf.mxu0 }
0x1a88   : > { %v2093_v43 = vpop.xlane.xlu1 %2092 }
0x1a89   : > { %v2094_v44 = vmul.f32 0.03125, %v2093_v43 }
0x1a8b   : > { %v3332_v45 = vsub.f32 %v2086_v38, %v2094_v44 }
0x1a8d   : > { %v2096_v46 = vmul.f32 %v3332_v45, %v3332_v45 }
0x1a8f   : > { %v2097_v47 = vsel %vm360_vm1, %v2096_v46, 0.0 }
0x1a90   : > { %2098 = vadd.xlane.f32.xlu1 %v2097_v47 }
0x1a91   : > { %2769 = shalt.err (!%p2766_p3)
}
0x1a92   : > { %s2770_s19 = scalar_lea.hbm %s3344_s17, 512  ;;  %s2774_s10 = scalar_lea.hbm %s3438_s7, 1024 }
0x1a93   : > { %p2771_p4 = scmp.ne.s32.totalorder %s3344_s17, %s2770_s19  ;;  %p2775_p9 = scmp.lt.s32.totalorder %s3344_s17, %s3438_s7 }
0x1a94   : > { %p2776_p10 = scmp.lt.s32.totalorder %s2774_s10, %s2770_s19 }
0x1a95   : > { %p2772_p7 = pnand %p2771_p4, %p2948_p5 }
0x1a96   : > { %p2777_p11 = por %p2776_p10, %p2775_p9 }
0x1a97   : > { %p2773_p8 = pneg %p2772_p7 }
0x1a99   : > { %p2778_p12 = pnand %p2777_p11, %p2773_p8 }
0x1a9b   : > { %2781 = shalt.err (!%p2778_p12)
}
0x1a9c   : > { %s2862_s23 = smov 128   ;;  %s2863_s12 = smov 8  }
0x1a9d   : > { %s3469_s0 = scalar_lea.sflag [#allocation3], %s3032_s24  ;;  %s3470_s25 = sshll.u32 %s2931_s9, 9 }
0x1a9e   : > { %2641 = dma.vmem_to_hbm [thread:$0]  (%p2948_p5), %s3346_s26, 512, %s3344_s17, %s3469_s0, %s2862_s23, %s2862_s23, %s2863_s12  }
0x1a9f   : > { %s3379_s19 = scalar_lea.hbm %s3439_s8, %s3470_s25  ;;  %s2147_s21 = sshll.u32 %s3215_s20, 4  ;;  %s3382_s21 = int_to_ptr.vmem [resolvable:$true] %s2147_s21 }
0x1aa0   : > { %s2115_s10 = scalar_lea.sflag [#allocation5], %s3032_s24  ;;  %s2782_s1 = scalar_lea.vmem %s3382_s21, 512 }
0x1aa1   : > { %p2783_p13 = scmp.ne.s32.totalorder %s3382_s21, %s2782_s1  ;;  %s2864_s2 = smov [#allocation4]  }
0x1aa2   : > { %s2786_s26 = sshll.u32 %s2864_s2, 4  ;;  %s2787_s26 = int_to_ptr.vmem [resolvable:$false] %s2786_s26 }
0x1aa3   : > { %p2784_p0 = pnand %p2783_p13, %p2948_p5  ;;  %s2788_s9 = scalar_lea.vmem %s2787_s26, 1024 }
0x1aa4   : > { %p2789_p2 = scmp.lt.s32.totalorder %s3382_s21, %s2787_s26  ;;  %p2790_p3 = scmp.lt.s32.totalorder %s2788_s9, %s2782_s1 }
0x1aa5   : > { %p2785_p1 = pneg %p2784_p0 }
0x1aa6   : > { %p2791_p4 = por %p2790_p3, %p2789_p2 }
0x1aa8   : > { %p2792_p7 = pnand %p2791_p4, %p2785_p1 }
0x1aaa   : > { %2795 = shalt.err (!%p2792_p7)
}
0x1aab   : > { %s2796_s20 = scalar_lea.hbm %s3379_s19, 512  ;;  %s2800_s2 = scalar_lea.hbm %s3439_s8, 1024 }
0x1aac   : > { %p2797_p8 = scmp.ne.s32.totalorder %s3379_s19, %s2796_s20  ;;  %p2801_p11 = scmp.lt.s32.totalorder %s3379_s19, %s3439_s8 }
0x1aad   : > { %p2802_p12 = scmp.lt.s32.totalorder %s2800_s2, %s2796_s20 }
0x1aae   : > { %p2798_p9 = pnand %p2797_p8, %p2948_p5 }
0x1aaf   : > { %p2803_p13 = por %p2802_p12, %p2801_p11 }
0x1ab0   : > { %p2799_p10 = pneg %p2798_p9 }
0x1ab2   : > { %p2804_p0 = pnand %p2803_p13, %p2799_p10 }
0x1ab4   : > { %2807 = shalt.err (!%p2804_p0)
}
0x1ab5   : > { %2642 = dma.vmem_to_hbm [thread:$0]  (%p2948_p5), %s3382_s21, 512, %s3379_s19, %s2115_s10, %s2862_s23, %s2862_s23, %s2863_s12  }
0x1ab6   : > { %s338_s13 = scalar_lea.vmem %s3437_s6, %s2973_s22 }
0x1b19   : > { %v2099_v48 = vpop.xlane.xlu1 %2098 }
0x1b1a   : > { %v2100_v49 = vmul.f32 0.03125, %v2099_v48 }
0x1b1c   : > { %v2101_v50 = vadd.f32 1e-05, %v2100_v49 }
0x1b1e   : > { %2754 = vrsqrt.f32 %v2101_v50 }
0x1b2b   : > { %v2755_v51 = vpop.eup %2754 }
0x1b2c   : > { %v2103_v52 = vmul.f32 %v2755_v51, %v3332_v45 }
0x1b2e   : > { %2104 = vst.msk [vmem:[%s338_s13] sm:$0xff] %vm360_vm1, %v2103_v52 }
0x1b2f PF: > { %p2652_p1 = scmp.ge.s32.totalorder %s2846_s30, 2  ;;  %s2169_s15 = sand.u32 1, %s2834_s27  }
0x1b30   : > { %s2170_s23 = scalar_lea.sflag [#allocation3], %s2169_s15 }
0x1b31   : > { %p2646_p5 = pnand %p2652_p1, %p2952_p6 }
0x1b33   : > { %p2647_p2 = pneg %p2646_p5 }
0x1b35   : > { %2825 = dma.done.wait (%p2647_p2), %s2170_s23, 512  }
0x1b36   : > { %2827 = vsyncadd (%p2647_p2), %s2170_s23, 4294966784  ;;  %s2179_s12 = scalar_lea.sflag [#allocation5], %s2169_s15 }
0x1b37   : > { %2829 = dma.done.wait (%p2647_p2), %s2179_s12, 512  }
0x1b38   : > { %2831 = vsyncadd (%p2647_p2), %s2179_s12, 4294966784  ;;  %p22_p3 = scmp.ge.s32.totalorder %s2935_s11, 4   ;;  %s3471_s27 = smov %s2838_s28 }
0x1b39   : > { %s3472_s28 = smov %s2842_s29  ;;  %s3473_s29 = smov %s2946_s14 }
0x1b3a   : > { %s3474_s30 = smov %s2935_s11  ;;  %24 = sbr.rel (!%p22_p3) target bundleno = 9 (0x9), region = 127 }
0x1b3f   :  { %2184 = vsyncpa [#allocation3], 1 }
0x1b40   :  { %2186 = vsyncpa [#allocation3 + $0x1], 1 }
0x1b41   :  { %2187 = vsyncpa [#allocation5], 1 }
0x1b42   :  { %2189 = vsyncpa [#allocation5 + $0x1], 1 }

// kernel: transformer_forward.3
= control target key start
LH: loop header
LB: loop body
LE: loop exit
PB: predicated region body
PF: predicated region fallthrough
CT: control target
= control target key end

     0   :  { %s6412_s0 = inlined_call_operand.vmem [shape: f32[2,8,32], index: 0, kind: input, shape index: {}]   ;;  %s6413_s1 = inlined_call_operand.vmem [shape: f32[2,8,32], index: 1, kind: input, shape index: {}]   ;;  %s6414_s2 = inlined_call_operand.vmem [shape: s32[2,8,8], index: 2, kind: input, shape index: {}]   ;;  %s6415_s3 = inlined_call_operand.vmem [shape: s32[2,8,8], index: 3, kind: input, shape index: {}]   ;;  %s6416_s4 = inlined_call_operand.vmem [shape: bf16[2,32,96], index: 4, kind: input, shape index: {}]   ;;  %s6417_s5 = inlined_call_operand.vmem [shape: bf16[2,4,8,32], index: 5, kind: input, shape index: {}]   ;;  %s6418_s6 = inlined_call_operand.vmem [shape: bf16[2,32,32], index: 6, kind: input, shape index: {}]   ;;  %s6419_s7 = inlined_call_operand.vmem [shape: bf16[2,32,64], index: 7, kind: input, shape index: {}]   ;;  %s6420_s8 = inlined_call_operand.vmem [shape: bf16[2,4,8,32], index: 8, kind: input, shape index: {}]   ;;  %s6421_s9 = inlined_call_operand.vmem [shape: bf16[2,32,64], index: 9, kind: input, shape index: {}]   ;;  %s6422_s10 = inlined_call_operand.vmem [shape: bf16[2,64,32], index: 10, kind: input, shape index: {}]   ;;  %s6423_s11 = inlined_call_operand.vmem [shape: bf16[32,16], index: 11, kind: input, shape index: {}]   ;;  %s6424_s12 = inlined_call_operand.hbm [shape: f32[2,8,16], index: 12, kind: output, shape index: {0}]   ;;  %s6425_s13 = inlined_call_operand.hbm [shape: f32[2,4,8,8], index: 13, kind: output, shape index: {1}]   ;;  %s6426_s14 = inlined_call_operand.hbm [shape: f32[2,4,8,8], index: 14, kind: output, shape index: {2}]   ;;  %s6427_s15 = inlined_call_operand.hbm [shape: f32[2,4,8,8], index: 15, kind: output, shape index: {3}]   ;;  %s6428_s16 = inlined_call_operand.hbm [shape: f32[2,4,8,8], index: 16, kind: output, shape index: {4}]  }
   0x1   :  { %6460 = sst [smem:[#allocation21_spill]] %s6412_s0 }
   0x2   :  { %6461 = sst [smem:[#allocation22_spill]] %s6413_s1 }
   0x3   :  { %6462 = sst [smem:[#allocation23_spill]] %s6414_s2 }
   0x4   :  { %6463 = sst [smem:[#allocation24_spill]] %s6415_s3 }
   0x5   :  { %6464 = sst [smem:[#allocation25_spill]] %s6416_s4 }
   0x6   :  { %6465 = sst [smem:[#allocation26_spill]] %s6424_s12 }
   0x7   :  { %6466 = sst [smem:[#allocation27_spill]] %s6428_s16 }
   0x8   :  { %22 = vsyncpa [#allocation3], 0 }
   0x9   :  { %24 = vsyncpa [#allocation3 + $0x1], 0 }
   0xa   :  { %25 = vsyncpa [#allocation5], 0 }
   0xb   :  { %27 = vsyncpa [#allocation5 + $0x1], 0 }
   0xc   :  { %28 = vsyncpa [#allocation8], 0 }
   0xd   :  { %30 = vsyncpa [#allocation8 + $0x1], 0  ;;  %s5459_s21 = smov 0   ;;  %s5461_s22 = smov 0  }
   0xe   :  { %s5463_s23 = smov 0   ;;  %s5465_s24 = smov 0  }
   0xf LB: > { %6467 = sst [smem:[#allocation13_spill]] %s5340_s21  ;;  %s5480_s25 = sadd.s32 4294967295, %s5352_s24   ;;  %s5352_s24 = sphi %s5465_s24, %s6501_s24   ;;  %s5348_s23 = sphi %s5463_s23, %s6504_s23   ;;  %s5344_s22 = sphi %s5461_s22, %s6503_s22   ;;  %s5340_s21 = sphi %s5459_s21, %s6502_s21  }
  0x10   : > { %6468 = sst [smem:[#allocation14_spill]] %s5344_s22  ;;  %s6429_s26 = sadd.s32 4294967294, %s5352_s24  }
  0x11   : > { %6469 = sst [smem:[#allocation15_spill]] %s5348_s23  ;;  %s5484_s27 = sadd.s32 1, %s5352_s24  }
  0x12   : > { %6470 = sst [smem:[#allocation16_spill]] %s5352_s24  ;;  %s315_s28 = sadd.s32 1, %s5348_s23 }
  0x13   : > { %6471 = sst [smem:[#allocation17_spill]] %s5484_s27  ;;  %s312_s29 = ssub.s32 %s5352_s24, %s5484_s27 }
  0x14   : > { %p325_p0 = scmp.ne.s32.totalorder %s5348_s23, %s5344_s22  ;;  %p313_p1 = scmp.eq.s32.totalorder %s312_s29, 0 }
  0x15   : > { %p326_p2 = scmp.eq.s32.totalorder %s5480_s25, 1  ;;  %p331_p3 = scmp.ne.s32.totalorder %s5344_s22, %s5340_s21 }
  0x16   : > { %p332_p4 = scmp.eq.s32.totalorder %s6429_s26, 1  ;;  %p4322_p7 = scmp.ge.s32.totalorder %s5352_s24, 1 }
  0x17   : > { %s5497_s30 = scalar_select %p313_p1, %s5348_s23, %s315_s28  }
  0x18   : > { %p5499_p5 = por %p326_p2, %p325_p0  ;;  %p5503_p6 = por %p332_p4, %p331_p3 }
  0x19   : > { %6472 = sst [smem:[#allocation18_spill]] %s5497_s30  ;;  %p506_p8 = scmp.lt.s32.totalorder %s5352_s24, 3 }
  0x1a   : > { %s6474_s17 = scalar_select %p5503_p6, 1, 0 }
  0x1b   : > { %p507_p9 = pnand %p4322_p7, %p506_p8 }
  0x1c   : > { %6475 = sst [smem:[#allocation19_spill]] %s6474_s17 }
  0x1d   : > { %510 = sbr.rel (%p507_p9) target bundleno = 12681 (0x3189), region = 68 }
  0x22   : > { %s6476_s4 = sld [smem:[#allocation25_spill]]  ;;  %v5354_v1 = vmov 0.0   ;;  %vm5355_vm0 = vmmov 0   ;;  %p587_p10 = scmp.lt.s32.totalorder %s5480_s25, 1  ;;  %vm628_vm1 = vcmask 261120   ;;  %vm676_vm2 = vcmask 64512  }
  0x23   : > { %4620 = vmatprep.subr.bf16.mxu0 %v5354_v1  ;;  %4628 = vmatprep.subr.bf16.mxu1 %v5354_v1  ;;  %s6477_s30 = sld [smem:[#allocation21_spill]]  ;;  %s6440_s28 = smov 120   ;;  %vm743_vm4 = vcmask 1043456   ;;  %v788_v52 = vld [vmem:[%s6417_s5] sm:$0xf]  ;;  %vm2220_vm6 = vcmask 523264  }
  0x24   : > { %4624 = vmatprep.mubr.msk.bf16.mxu0 %vm5355_vm0, %v5354_v1  ;;  %4630 = vmatprep.mubr.msk.bf16.mxu1 %vm5355_vm0, %v5354_v1  ;;  %s588_s29 = scalar_select %p587_p10, %s5480_s25, 1  ;;  %v956_v53 = vsel %vm743_vm4, %v788_v52, 0  ;;  %v4340_v54 = vld [vmem:[%s6417_s5 + $0x4] sm:$0xf] }
  0x25   : > { %s6430_s26 = smov 96   ;;  %s6478_s2 = sld [smem:[#allocation23_spill]]  ;;  %v910_v55 = vsel %vm743_vm4, %v4340_v54, 0 }
  0x26   : > { %s5524_s18 = sshll.u32 %s588_s29, 3  ;;  %s6432_s29 = smov 64  }
  0x27   : > { %s6433_s19 = smov 56   ;;  %s6480_s1 = sld [smem:[#allocation22_spill]] }
  0x28   : > { %v5078_v0 = vld [vmem:[%s6476_s4 + $0x8] sm:$0xff]   ;;  %v5079_v2 = vld [vmem:[%s6476_s4] sm:$0xff]   ;;  %s6481_s21 = smov 120   ;;  %s6482_s3 = sld [smem:[#allocation24_spill]] }
  0x29   : > { %4621 = vmatpush3.bf16.msra.mxu0 %v5078_v0  ;;  %s590_s20 = scalar_lea.vmem %s6477_s30, %s5524_s18  ;;  %s6438_s30 = smov 88  }
  0x2a   : > { %4622 = vmatprep.subr.bf16.mxu0 %v5354_v1  ;;  %v5531_v3 = vld [vmem:[%s590_s20] sm:$0xff]  ;;  %s6483_s17 = smov 88   ;;  %s6488_s23 = smov 72  }
  0x2b   : > { %v611_v4 = vpack.c.bf16 %v5531_v3, %v5531_v3  ;;  %s598_s20 = scalar_lea.vmem %s6478_s2, %s5524_s18  ;;  %s6444_s2 = smov 72  }
  0x2c   : > { %v5561_v15 = vld [vmem:[%s598_s20] sm:$0xff]  ;;  %s6436_s20 = smov 112   ;;  %s6492_s12 = smov 40  }
  0x2d   : > { %4623 = vmatpush3.bf16.msra.mxu0 %v5079_v2  ;;  %vm608_vm3 = vcmp.gt.s32.totalorder %v5561_v15, 0  ;;  %s594_s27 = scalar_lea.vmem %s6480_s1, %s5524_s18  ;;  %s6490_s1 = smov 64  }
  0x2e   : > { %4634 = vmatprep.subr.bf16.mxu0 %v5354_v1  ;;  %s4009_s16 = sand.u32 1, %s5480_s25   ;;  %s6237_s24 = sshll.u32 %s5480_s25, 9 }
  0x30   : > { %4625 = vmatmul.mubr.msk.bf16.vlgmr.msra.gmra.mxu0 %vm628_vm1, %v611_v4 }
  0x31   : > { %4636 = vmatprep.mubr.msk.bf16.mxu0 %vm5355_vm0, %v5354_v1 }
  0xf0   : > { %v666_v5 = vpop.f32.mrf.mxu0 }
  0xf1   : > { %v5538_v6 = vpack.c.bf16 %v666_v5, %v666_v5 }
  0xf2   : > { %v4626_v7 = vpop.f32.mrf.mxu0 }
  0xf3   : > { %789 = vrot.lane.b32.xlu1 %v5538_v6, %s6440_s28  ;;  %674 = vrot.lane.b32.xlu0 %v5538_v6, %s6430_s26  ;;  %s6434_s26 = smov 80   ;;  %s6446_s28 = smov 104  }
  0xf4   : > { %v669_v8 = vpop.f32.mrf.mxu0 }
  0xf6   : > { %v4627_v9 = vpop.f32.mrf.mxu0 }
  0xf7   : > { %791 = vrot.lane.b32.xlu0 %v5538_v6, %s6438_s30  ;;  %s6442_s30 = smov 48  }
 0x165   : > { %v675_v10 = vpop.permute.xlu0 %674  ;;  %v790_v14 = vpop.permute.xlu1 %789 }
 0x166   : > { %v681_v11 = vsel %vm676_vm2, %v675_v10, 0 }
 0x167   : > { %4629 = vmatpush3.bf16.xpose.msra.mxu1 %v681_v11 }
 0x168   : > { %4640 = vmatprep.subr.bf16.mxu1 %v5354_v1 }
 0x169   : > { %v792_v12 = vpop.permute.xlu0 %791 }
 0x16a   : > { %v797_v13 = vsel %vm676_vm2, %v792_v12, 0 }
 0x16e   : > { %4631 = vmatmul.mubr.msk.bf16.vlgmr.msra.gmra.mxu1 %vm676_vm2, %v5538_v6 }
 0x16f   : > { %4641 = vmatpush3.bf16.xpose.msra.mxu1 %v797_v13  ;;  %4642 = vmatprep.mubr.msk.bf16.mxu1 %vm5355_vm0, %v5354_v1 }
 0x170   : > { %4652 = vmatprep.subr.bf16.mxu1 %v5354_v1 }
 0x176   : > { %4643 = vmatmul.mubr.msk.bf16.vlgmr.msra.gmra.mxu1 %vm676_vm2, %v790_v14 }
 0x177   : > { %4654 = vmatprep.mubr.msk.bf16.mxu1 %vm5355_vm0, %v5354_v1  ;;  %4653 = vmatpush3.bf16.msra.mxu1 %v910_v55 }
 0x178   : > { %4664 = vmatprep.subr.bf16.mxu1 %v5354_v1 }
 0x22e   : > { %v717_v16 = vpop.f32.mrf.mxu1 }
 0x22f   : > { %v723_v17 = vmul.f32 0.35355338, %v717_v16 }
 0x230   : > { %v4632_v18 = vpop.f32.mrf.mxu1 }
 0x231   : > { %v724_v19 = vsel %vm608_vm3, -1e+09, %v723_v17 }
 0x232   : > { %v720_v20 = vpop.f32.mrf.mxu1  ;;  %v725_v21 = vsel %vm676_vm2, %v724_v19, -inf }
 0x233   : > { %726 = vmax.xlane.f32.xlu1 %v725_v21 }
 0x234   : > { %v4633_v22 = vpop.f32.mrf.mxu1 }
 0x236   : > { %v833_v23 = vpop.f32.mrf.mxu1 }
 0x237   : > { %v839_v24 = vmul.f32 0.35355338, %v833_v23 }
 0x238   : > { %v4644_v25 = vpop.f32.mrf.mxu1 }
 0x239   : > { %v840_v26 = vsel %vm608_vm3, -1e+09, %v839_v24 }
 0x23a   : > { %v836_v27 = vpop.f32.mrf.mxu1  ;;  %v841_v28 = vsel %vm676_vm2, %v840_v26, -inf }
 0x23b   : > { %842 = vmax.xlane.f32.xlu0 %v841_v28 }
 0x23c   : > { %v4645_v29 = vpop.f32.mrf.mxu1 }
 0x2bc   : > { %v727_v30 = vpop.xlane.xlu1 %726 }
 0x2bd   : > { %v728_v31 = vsub.f32 %v724_v19, %v727_v30 }
 0x2bf   : > { %v729_v32 = vmul.f32 1.442695, %v728_v31 }
 0x2c1   : > { %5104 = vpow2.f32 %v729_v32 }
 0x2c4   : > { %v843_v33 = vpop.xlane.xlu0 %842 }
 0x2c5   : > { %v844_v34 = vsub.f32 %v840_v26, %v843_v33 }
 0x2c7   : > { %v845_v35 = vmul.f32 1.442695, %v844_v34 }
 0x2c9   : > { %5106 = vpow2.f32 %v845_v35 }
 0x2ce   : > { %v5105_v36 = vpop.eup %5104 }
 0x2cf   : > { %v731_v37 = vsel %vm676_vm2, %v5105_v36, 0.0 }
 0x2d0   : > { %732 = vadd.xlane.f32.xlu0 %v731_v37 }
 0x2d6   : > { %v5107_v38 = vpop.eup %5106 }
 0x2d7   : > { %v847_v39 = vsel %vm676_vm2, %v5107_v38, 0.0 }
 0x2d8   : > { %848 = vadd.xlane.f32.xlu1 %v847_v39  ;;  %v4346_v39 = vld [vmem:[%s6417_s5 + $0x8] sm:$0xf] }
 0x2e6   : > { %738 = vrot.lane.b32.xlu0 %v5538_v6, %s6432_s29  ;;  %s5583_s29 = sand.u32 1, %s5344_s22   ;;  %s6491_s22 = smov 48  }
 0x2e7   : > { %6479 = sst [smem:[#allocation20_spill]] %s5583_s29 }
 0x2e9   : > { %855 = vrot.lane.b32.xlu1 %v5538_v6, %s6433_s19  ;;  %s5586_s19 = sshll.u32 %s5583_s29, 5 }
 0x2ea   : > { %998 = vrot.lane.b32.xlu0 %v5538_v6, %s6436_s20  ;;  %s6489_s20 = smov 56  }
 0x2ed   : > { %1000 = vrot.lane.b32.xlu1 %v5538_v6, %s6434_s26  ;;  %s5589_s26 = scalar_lea.vmem [#allocation4], %s5586_s19 }
 0x359   : > { %v733_v40 = vpop.xlane.xlu0 %732 }
 0x35a   : > { %5108 = vrcp.f32 %v733_v40  ;;  %v1119_v40 = vsel %vm743_vm4, %v4346_v39, 0 }
 0x35d   : > { %v739_v41 = vpop.permute.xlu0 %738 }
 0x35e   : > { %v745_v42 = vsel %vm743_vm4, %v739_v41, 0 }
 0x35f   : > { %4635 = vmatpush3.bf16.msra.mxu0 %v745_v42 }
 0x360   : > { %4646 = vmatprep.subr.bf16.mxu0 %v5354_v1 }
 0x361   : > { %v849_v43 = vpop.xlane.xlu1 %848  ;;  %v999_v7 = vpop.permute.xlu0 %998 }
 0x362   : > { %5110 = vrcp.f32 %v849_v43 }
 0x365   : > { %v856_v46 = vpop.permute.xlu1 %855 }
 0x366   : > { %v861_v48 = vsel %vm743_vm4, %v856_v46, 0 }
 0x367   : > { %v5109_v44 = vpop.eup %5108 }
 0x368   : > { %v735_v45 = vmul.f32 %v5109_v44, %v5105_v36 }
 0x369   : > { %v1001_v61 = vpop.permute.xlu1 %1000 }
 0x36a   : > { %v737_v47 = vpack.c.bf16 %v735_v45, %v735_v45  ;;  %736 = vst.msk [vmem:[%s5589_s26] sm:$0xff] %vm676_vm2, %v735_v45  ;;  %v1006_v2 = vsel %vm676_vm2, %v1001_v61, 0 }
 0x36c   : > { %4637 = vmatmul.mubr.msk.bf16.vlgmr.msra.gmra.mxu0 %vm676_vm2, %v737_v47 }
 0x36d   : > { %4647 = vmatpush3.bf16.msra.mxu0 %v861_v48  ;;  %4648 = vmatprep.mubr.msk.bf16.mxu0 %vm5355_vm0, %v5354_v1 }
 0x36e   : > { %4658 = vmatprep.subr.bf16.mxu0 %v5354_v1 }
 0x36f   : > { %v5111_v49 = vpop.eup %5110 }
 0x370   : > { %v851_v50 = vmul.f32 %v5111_v49, %v5107_v38 }
 0x372   : > { %v854_v51 = vpack.c.bf16 %v851_v50, %v851_v50  ;;  %4338 = vst.msk [vmem:[%s5589_s26 + $0x8] sm:$0xff] %vm676_vm2, %v851_v50 }
 0x374   : > { %4649 = vmatmul.mubr.msk.bf16.vlgmr.msra.gmra.mxu0 %vm676_vm2, %v854_v51 }
 0x375   : > { %4660 = vmatprep.mubr.msk.bf16.mxu0 %vm5355_vm0, %v5354_v1  ;;  %4659 = vmatpush3.bf16.msra.mxu0 %v956_v53 }
 0x376   : > { %4670 = vmatprep.subr.bf16.mxu0 %v5354_v1 }
 0x42c   : > { %v781_v56 = vpop.f32.mrf.mxu0 }
 0x42d   : > { %v787_v57 = vpack.c.bf16 %v781_v56, %v781_v56 }
 0x42e   : > { %v4638_v58 = vpop.f32.mrf.mxu0 }
 0x42f   : > { %4661 = vmatmul.mubr.msk.bf16.vlgmr.msra.gmra.mxu0 %vm676_vm2, %v787_v57 }
 0x430   : > { %v784_v59 = vpop.f32.mrf.mxu0  ;;  %4672 = vmatprep.mubr.msk.bf16.mxu0 %vm5355_vm0, %v5354_v1 }
 0x432   : > { %v4639_v60 = vpop.f32.mrf.mxu0 }
 0x434   : > { %v897_v62 = vpop.f32.mrf.mxu0 }
 0x435   : > { %v903_v63 = vpack.c.bf16 %v897_v62, %v897_v62 }
 0x436   : > { %v4650_v0 = vpop.f32.mrf.mxu0 }
 0x437   : > { %4655 = vmatmul.mubr.msk.bf16.vlgmr.msra.gmra.mxu1 %vm676_vm2, %v903_v63 }
 0x438   : > { %4665 = vmatpush3.bf16.xpose.msra.mxu1 %v1006_v2  ;;  %v900_v4 = vpop.f32.mrf.mxu0  ;;  %4666 = vmatprep.mubr.msk.bf16.mxu1 %vm5355_vm0, %v5354_v1 }
 0x439   : > { %4676 = vmatprep.subr.bf16.mxu1 %v5354_v1 }
 0x43a   : > { %v4651_v5 = vpop.f32.mrf.mxu0 }
 0x43f   : > { %4667 = vmatmul.mubr.msk.bf16.vlgmr.msra.gmra.mxu1 %vm676_vm2, %v999_v7 }
 0x440   : > { %4678 = vmatprep.mubr.msk.bf16.mxu1 %vm5355_vm0, %v5354_v1  ;;  %4677 = vmatpush3.bf16.msra.mxu1 %v1119_v40 }
 0x441   : > { %4688 = vmatprep.subr.bf16.mxu1 %v5354_v1 }
 0x4ef   : > { %v992_v8 = vpop.f32.mrf.mxu0 }
 0x4f1   : > { %v4662_v9 = vpop.f32.mrf.mxu0 }
 0x4f3   : > { %v995_v10 = vpop.f32.mrf.mxu0 }
 0x4f5   : > { %v4663_v11 = vpop.f32.mrf.mxu0 }
 0x4f7   : > { %v946_v12 = vpop.f32.mrf.mxu1 }
 0x4f8   : > { %v5624_v13 = vadd.f32 %v992_v8, %v946_v12 }
 0x4f9   : > { %v4656_v14 = vpop.f32.mrf.mxu1 }
 0x4fb   : > { %v949_v16 = vpop.f32.mrf.mxu1 }
 0x4fd   : > { %v4657_v17 = vpop.f32.mrf.mxu1 }
 0x4ff   : > { %v1042_v18 = vpop.f32.mrf.mxu1 }
 0x500   : > { %v1048_v19 = vmul.f32 0.35355338, %v1042_v18 }
 0x501   : > { %v4668_v20 = vpop.f32.mrf.mxu1 }
 0x502   : > { %v1049_v21 = vsel %vm608_vm3, -1e+09, %v1048_v19 }
 0x503   : > { %v1045_v22 = vpop.f32.mrf.mxu1  ;;  %v1050_v23 = vsel %vm676_vm2, %v1049_v21, -inf }
 0x504   : > { %1051 = vmax.xlane.f32.xlu1 %v1050_v23 }
 0x505   : > { %v4669_v24 = vpop.f32.mrf.mxu1 }
 0x515   : > { %1164 = vrot.lane.b32.xlu1 %v5538_v6, %s6444_s2  ;;  %s6485_s2 = smov 96  }
 0x519   : > { %1162 = vrot.lane.b32.xlu1 %v5538_v6, %s6446_s28  ;;  %s5758_s28 = scalar_lea.vmem [#allocation7], %s5586_s19 }
 0x58d   : > { %v1052_v25 = vpop.xlane.xlu1 %1051 }
 0x58e   : > { %v1053_v26 = vsub.f32 %v1049_v21, %v1052_v25 }
 0x590   : > { %v1054_v27 = vmul.f32 1.442695, %v1053_v26 }
 0x591   : > { %v1165_v35 = vpop.permute.xlu1 %1164 }
 0x592   : > { %5112 = vpow2.f32 %v1054_v27  ;;  %v1170_v37 = vsel %vm676_vm2, %v1165_v35, 0  ;;  %v5080_v27 = vld [vmem:[%s6419_s7 + $0x8] sm:$0xff]  }
 0x595   : > { %v1163_v38 = vpop.permute.xlu1 %1162 }
 0x59f   : > { %v5113_v28 = vpop.eup %5112 }
 0x5a0   : > { %v1056_v29 = vsel %vm676_vm2, %v5113_v28, 0.0 }
 0x5a1   : > { %1057 = vadd.xlane.f32.xlu0 %v1056_v29  ;;  %v605_v29 = vld [vmem:[%s594_s27] sm:$0xff]  ;;  %s602_s27 = scalar_lea.vmem %s6482_s3, %s5524_s18  ;;  %s6484_s18 = smov 112  }
 0x5a2   : > { %s5937_s3 = scalar_lea.vmem [#allocation6], %s5586_s19 }
 0x5b7   : > { %1064 = vrot.lane.b32.xlu0 %v5538_v6, %s6442_s30  ;;  %s6443_s30 = smov 40  }
 0x62a   : > { %v1058_v30 = vpop.xlane.xlu0 %1057 }
 0x62b   : > { %5114 = vrcp.f32 %v1058_v30  ;;  %v5695_v30 = vpack.c.bf16 %v605_v29, %v605_v29  ;;  %v4364_v29 = vld [vmem:[%s6420_s8 + $0x4] sm:$0xf] }
 0x62e   : > { %v1065_v31 = vpop.permute.xlu0 %1064 }
 0x62f   : > { %v1070_v32 = vsel %vm743_vm4, %v1065_v31, 0  ;;  %v5083_v31 = vld [vmem:[%s6418_s6] sm:$0xff]  }
 0x630   : > { %4671 = vmatpush3.bf16.msra.mxu0 %v1070_v32 }
 0x631   : > { %4682 = vmatprep.subr.bf16.mxu0 %v5354_v1 }
 0x638   : > { %v5115_v33 = vpop.eup %5114 }
 0x639   : > { %v1060_v34 = vmul.f32 %v5115_v33, %v5113_v28  ;;  %v5082_v28 = vld [vmem:[%s6418_s6 + $0x8] sm:$0xff]  }
 0x63b   : > { %v1063_v36 = vpack.c.bf16 %v1060_v34, %v1060_v34  ;;  %4344 = vst.msk [vmem:[%s5589_s26 + $0x10] sm:$0xff] %vm676_vm2, %v1060_v34 }
 0x63d   : > { %4673 = vmatmul.mubr.msk.bf16.vlgmr.msra.gmra.mxu0 %vm676_vm2, %v1063_v36 }
 0x63e   : > { %4683 = vmatpush3.bf16.xpose.msra.mxu0 %v1170_v37  ;;  %4684 = vmatprep.mubr.msk.bf16.mxu0 %vm5355_vm0, %v5354_v1 }
 0x63f   : > { %4694 = vmatprep.subr.bf16.mxu0 %v5354_v1 }
 0x645   : > { %4685 = vmatmul.mubr.msk.bf16.vlgmr.msra.gmra.mxu0 %vm676_vm2, %v1163_v38 }
 0x646   : > { %4696 = vmatprep.mubr.msk.bf16.mxu0 %vm5355_vm0, %v5354_v1 }
 0x6fd   : > { %v1106_v41 = vpop.f32.mrf.mxu0 }
 0x6fe   : > { %v1112_v42 = vpack.c.bf16 %v1106_v41, %v1106_v41 }
 0x6ff   : > { %v4674_v43 = vpop.f32.mrf.mxu0 }
 0x700   : > { %4679 = vmatmul.mubr.msk.bf16.vlgmr.msra.gmra.mxu1 %vm676_vm2, %v1112_v42 }
 0x701   : > { %v1109_v44 = vpop.f32.mrf.mxu0  ;;  %4690 = vmatprep.mubr.msk.bf16.mxu1 %vm5355_vm0, %v5354_v1 }
 0x703   : > { %v4675_v45 = vpop.f32.mrf.mxu0 }
 0x705   : > { %v1206_v46 = vpop.f32.mrf.mxu0 }
 0x706   : > { %v1212_v47 = vmul.f32 0.35355338, %v1206_v46 }
 0x707   : > { %v4686_v48 = vpop.f32.mrf.mxu0 }
 0x708   : > { %v1213_v49 = vsel %vm608_vm3, -1e+09, %v1212_v47 }
 0x709   : > { %v1209_v50 = vpop.f32.mrf.mxu0  ;;  %v1214_v51 = vsel %vm676_vm2, %v1213_v49, -inf }
 0x70a   : > { %1215 = vmax.xlane.f32.xlu0 %v1214_v51 }
 0x70b   : > { %v4687_v52 = vpop.f32.mrf.mxu0 }
 0x70c   : > { %v5738_v52 = vld [vmem:[%s602_s27] sm:$0xff]  ;;  %s6486_s27 = smov 104  }
 0x70d   : > { %vm610_vm5 = vcmp.gt.s32.totalorder %v5738_v52, 0 }
 0x720   : > { %1228 = vrot.lane.b32.xlu0 %v5538_v6, %s6443_s30  ;;  %v4351_v6 = vld [vmem:[%s6417_s5 + $0xc] sm:$0xf]  ;;  %s6487_s30 = smov 80  }
 0x721   : > { %v1283_v0 = vsel %vm743_vm4, %v4351_v6, 0 }
 0x722   : > { %4695 = vmatpush3.bf16.msra.mxu0 %v1283_v0 }
 0x723   : > { %4708 = vmatprep.subr.bf16.mxu0 %v5354_v1 }
 0x793   : > { %v1216_v53 = vpop.xlane.xlu0 %1215 }
 0x794   : > { %v1217_v54 = vsub.f32 %v1213_v49, %v1216_v53 }
 0x796   : > { %v1218_v55 = vmul.f32 1.442695, %v1217_v54 }
 0x797   : > { %v1229_v56 = vpop.permute.xlu0 %1228 }
 0x798   : > { %5116 = vpow2.f32 %v1218_v55  ;;  %v1234_v57 = vsel %vm743_vm4, %v1229_v56, 0 }
 0x799   : > { %4689 = vmatpush3.bf16.msra.mxu1 %v1234_v57 }
 0x79a   : > { %4700 = vmatprep.subr.bf16.mxu1 %v5354_v1 }
 0x7a5   : > { %v5117_v58 = vpop.eup %5116 }
 0x7a6   : > { %v1220_v59 = vsel %vm676_vm2, %v5117_v58, 0.0 }
 0x7a7   : > { %1221 = vadd.xlane.f32.xlu1 %v1220_v59 }
 0x7c0   : > { %v1155_v60 = vpop.f32.mrf.mxu1 }
 0x7c1   : > { %v1161_v61 = vadd.f32 %v1155_v60, %v5624_v13 }
 0x7c2   : > { %v4680_v62 = vpop.f32.mrf.mxu1 }
 0x7c4   : > { %v1158_v63 = vpop.f32.mrf.mxu1 }
 0x7c6   : > { %v4681_v2 = vpop.f32.mrf.mxu1 }
 0x830   : > { %v1222_v4 = vpop.xlane.xlu1 %1221 }
 0x831   : > { %5118 = vrcp.f32 %v1222_v4 }
 0x83e   : > { %v5119_v5 = vpop.eup %5118 }
 0x83f   : > { %v1224_v7 = vmul.f32 %v5119_v5, %v5117_v58 }
 0x841   : > { %v1227_v8 = vpack.c.bf16 %v1224_v7, %v1224_v7  ;;  %4349 = vst.msk [vmem:[%s5589_s26 + $0x18] sm:$0xff] %vm676_vm2, %v1224_v7 }
 0x843   : > { %4691 = vmatmul.mubr.msk.bf16.vlgmr.msra.gmra.mxu1 %vm676_vm2, %v1227_v8 }
 0x844   : > { %4704 = vmatprep.mubr.msk.bf16.mxu1 %vm5355_vm0, %v5354_v1  ;;  %4701 = vmatpush3.bf16.msra.mxu1 %v5082_v28 }
 0x845   : > { %4702 = vmatprep.subr.bf16.mxu1 %v5354_v1 }
 0x848   : > { %4703 = vmatpush3.bf16.msra.mxu1 %v5083_v31  ;;  %v1696_v31 = vsel %vm743_vm4, %v4364_v29, 0 }
 0x849   : > { %4716 = vmatprep.subr.bf16.mxu1 %v5354_v1 }
 0x903   : > { %v1270_v9 = vpop.f32.mrf.mxu1 }
 0x904   : > { %v1276_v10 = vpack.c.bf16 %v1270_v9, %v1270_v9 }
 0x905   : > { %v4692_v11 = vpop.f32.mrf.mxu1 }
 0x906   : > { %4697 = vmatmul.mubr.msk.bf16.vlgmr.msra.gmra.mxu0 %vm676_vm2, %v1276_v10 }
 0x907   : > { %v1273_v12 = vpop.f32.mrf.mxu1  ;;  %4712 = vmatprep.mubr.msk.bf16.mxu0 %vm5355_vm0, %v5354_v1  ;;  %4709 = vmatpush3.bf16.msra.mxu0 %v5080_v27 }
 0x908   : > { %4710 = vmatprep.subr.bf16.mxu0 %v5354_v1 }
 0x909   : > { %v4693_v13 = vpop.f32.mrf.mxu1 }
 0x9c6   : > { %v1319_v14 = vpop.f32.mrf.mxu0 }
 0x9c7   : > { %v1325_v16 = vadd.f32 %v1319_v14, %v1161_v61 }
 0x9c8   : > { %v4698_v17 = vpop.f32.mrf.mxu0 }
 0x9c9   : > { %v1326_v18 = vadd.f32 %v1325_v16, %v5531_v3  ;;  %v5081_v3 = vld [vmem:[%s6419_s7] sm:$0xff]  }
 0x9ca   : > { %v1322_v19 = vpop.f32.mrf.mxu0  ;;  %4711 = vmatpush3.bf16.msra.mxu0 %v5081_v3  ;;  %v1573_v3 = vld [vmem:[%s6420_s8] sm:$0xf] }
 0x9cb   : > { %v1327_v20 = vsel %vm628_vm1, %v1326_v18, 0.0  ;;  %4722 = vmatprep.subr.bf16.mxu0 %v5354_v1  ;;  %v1742_v28 = vsel %vm743_vm4, %v1573_v3, 0 }
 0x9cc   : > { %1328 = vadd.xlane.f32.xlu1 %v1327_v20  ;;  %v4699_v21 = vpop.f32.mrf.mxu0 }
 0x9cd   : > { %4713 = vmatmul.mubr.msk.bf16.vlgmr.msra.gmra.mxu0 %vm628_vm1, %v5695_v30 }
 0x9ce   : > { %4724 = vmatprep.mubr.msk.bf16.mxu0 %vm5355_vm0, %v5354_v1 }
 0xa55   : > { %v1329_v22 = vpop.xlane.xlu1 %1328 }
 0xa56   : > { %v1331_v23 = vmul.f32 0.03125, %v1329_v22 }
 0xa58   : > { %v1332_v24 = vsub.f32 %v1326_v18, %v1331_v23 }
 0xa5a   : > { %v1333_v25 = vmul.f32 %v1332_v24, %v1332_v24 }
 0xa5c   : > { %v1334_v26 = vsel %vm628_vm1, %v1333_v25, 0.0 }
 0xa5d   : > { %1335 = vadd.xlane.f32.xlu1 %v1334_v26 }
 0xa8d   : > { %v1454_v38 = vpop.f32.mrf.mxu0 }
 0xa8e   : > { %v5714_v39 = vpack.c.bf16 %v1454_v38, %v1454_v38 }
 0xa8f   : > { %v4714_v40 = vpop.f32.mrf.mxu0 }
 0xa90   : > { %1577 = vrot.lane.b32.xlu1 %v5714_v39, %s6481_s21  ;;  %v1466_v41 = vsel %vm676_vm2, %v5714_v39, 0 }
 0xa91   : > { %v1457_v42 = vpop.f32.mrf.mxu0 }
 0xa93   : > { %v4715_v43 = vpop.f32.mrf.mxu0 }
 0xae6   : > { %v1336_v32 = vpop.xlane.xlu1 %1335 }
 0xae7   : > { %v1337_v33 = vmul.f32 0.03125, %v1336_v32 }
 0xae9   : > { %v1338_v34 = vadd.f32 1e-05, %v1337_v33 }
 0xaeb   : > { %5120 = vrsqrt.f32 %v1338_v34 }
 0xaf8   : > { %v5121_v35 = vpop.eup %5120 }
 0xaf9   : > { %v5707_v36 = vmul.f32 %v5121_v35, %v1332_v24 }
 0xafb   : > { %v1341_v37 = vpack.c.bf16 %v5707_v36, %v5707_v36 }
 0xafd   : > { %4705 = vmatmul.mubr.msk.bf16.vlgmr.msra.gmra.mxu1 %vm628_vm1, %v1341_v37 }
 0xafe   : > { %4718 = vmatprep.mubr.msk.bf16.mxu1 %vm5355_vm0, %v5354_v1  ;;  %4717 = vmatpush3.bf16.xpose.msra.mxu1 %v1466_v41 }
 0xaff   : > { %4728 = vmatprep.subr.bf16.mxu1 %v5354_v1 }
 0xb02   : > { %v1578_v44 = vpop.permute.xlu1 %1577 }
 0xb03   : > { %v1583_v47 = vsel %vm676_vm2, %v1578_v44, 0 }
 0xbbd   : > { %v1395_v45 = vpop.f32.mrf.mxu1 }
 0xbbe   : > { %v5721_v46 = vpack.c.bf16 %v1395_v45, %v1395_v45 }
 0xbbf   : > { %v4706_v48 = vpop.f32.mrf.mxu1 }
 0xbc0   : > { %1575 = vrot.lane.b32.xlu0 %v5721_v46, %s6481_s21  ;;  %4719 = vmatmul.mubr.msk.bf16.vlgmr.msra.gmra.mxu1 %vm676_vm2, %v5721_v46 }
 0xbc1   : > { %v1398_v49 = vpop.f32.mrf.mxu1  ;;  %4729 = vmatpush3.bf16.xpose.msra.mxu1 %v1583_v47  ;;  %4730 = vmatprep.mubr.msk.bf16.mxu1 %vm5355_vm0, %v5354_v1 }
 0xbc2   : > { %4740 = vmatprep.subr.bf16.mxu1 %v5354_v1 }
 0xbc3   : > { %v4707_v50 = vpop.f32.mrf.mxu1 }
 0xc32   : > { %v1576_v51 = vpop.permute.xlu0 %1575 }
 0xc33   : > { %4731 = vmatmul.mubr.msk.bf16.vlgmr.msra.gmra.mxu1 %vm676_vm2, %v1576_v51 }
 0xc34   : > { %4742 = vmatprep.mubr.msk.bf16.mxu1 %vm5355_vm0, %v5354_v1  ;;  %4741 = vmatpush3.bf16.msra.mxu1 %v1696_v31 }
 0xc35   : > { %4752 = vmatprep.subr.bf16.mxu1 %v5354_v1 }
 0xc80   : > { %v1502_v53 = vpop.f32.mrf.mxu1 }
 0xc81   : > { %v1508_v54 = vmul.f32 0.35355338, %v1502_v53 }
 0xc82   : > { %v4720_v55 = vpop.f32.mrf.mxu1 }
 0xc83   : > { %v1509_v56 = vsel %vm610_vm5, -1e+09, %v1508_v54 }
 0xc84   : > { %v1505_v57 = vpop.f32.mrf.mxu1  ;;  %v1510_v58 = vsel %vm676_vm2, %v1509_v56, -inf }
 0xc85   : > { %1511 = vmax.xlane.f32.xlu0 %v1510_v58 }
 0xc86   : > { %v4721_v59 = vpop.f32.mrf.mxu1 }
 0xcf3   : > { %v1619_v60 = vpop.f32.mrf.mxu1 }
 0xcf4   : > { %v1625_v61 = vmul.f32 0.35355338, %v1619_v60 }
 0xcf5   : > { %v4732_v62 = vpop.f32.mrf.mxu1 }
 0xcf6   : > { %v1626_v6 = vsel %vm610_vm5, -1e+09, %v1625_v61 }
 0xcf7   : > { %v1622_v63 = vpop.f32.mrf.mxu1  ;;  %v1627_v0 = vsel %vm676_vm2, %v1626_v6, -inf }
 0xcf8   : > { %1628 = vmax.xlane.f32.xlu1 %v1627_v0 }
 0xcf9   : > { %v4733_v2 = vpop.f32.mrf.mxu1 }
 0xd09   : > { %1641 = vrot.lane.b32.xlu1 %v5714_v39, %s6483_s17 }
 0xd0d   : > { %1786 = vrot.lane.b32.xlu1 %v5714_v39, %s6484_s18 }
 0xd0e   : > { %v1512_v4 = vpop.xlane.xlu0 %1511 }
 0xd0f   : > { %v1513_v5 = vsub.f32 %v1509_v56, %v1512_v4 }
 0xd11   : > { %v1514_v7 = vmul.f32 1.442695, %v1513_v5 }
 0xd13   : > { %5122 = vpow2.f32 %v1514_v7 }
 0xd20   : > { %v5123_v8 = vpop.eup %5122 }
 0xd21   : > { %v1516_v9 = vsel %vm676_vm2, %v5123_v8, 0.0 }
 0xd22   : > { %1517 = vadd.xlane.f32.xlu0 %v1516_v9 }
 0xd81   : > { %v1629_v10 = vpop.xlane.xlu1 %1628 }
 0xd82   : > { %v1630_v11 = vsub.f32 %v1626_v6, %v1629_v10 }
 0xd84   : > { %v1631_v12 = vmul.f32 1.442695, %v1630_v11 }
 0xd85   : > { %v1642_v22 = vpop.permute.xlu1 %1641 }
 0xd86   : > { %5124 = vpow2.f32 %v1631_v12  ;;  %v1647_v24 = vsel %vm743_vm4, %v1642_v22, 0 }
 0xd89   : > { %v1787_v38 = vpop.permute.xlu1 %1786 }
 0xd8a   : > { %v1792_v43 = vsel %vm676_vm2, %v1787_v38, 0 }
 0xd93   : > { %v5125_v13 = vpop.eup %5124 }
 0xd94   : > { %v1633_v14 = vsel %vm676_vm2, %v5125_v13, 0.0 }
 0xd95   : > { %1634 = vadd.xlane.f32.xlu0 %v1633_v14 }
 0xdab   : > { %v1518_v16 = vpop.xlane.xlu0 %1517  ;;  %1524 = vrot.lane.b32.xlu0 %v5714_v39, %s6485_s2 }
 0xdac   : > { %5126 = vrcp.f32 %v1518_v16 }
 0xdaf   : > { %1784 = vrot.lane.b32.xlu0 %v5721_v46, %s6484_s18 }
 0xdb9   : > { %v5127_v17 = vpop.eup %5126 }
 0xdba   : > { %v1520_v18 = vmul.f32 %v5127_v17, %v5123_v8  ;;  %v4370_v17 = vld [vmem:[%s6420_s8 + $0x8] sm:$0xf] }
 0xdbc   : > { %1521 = vst.msk [vmem:[%s5758_s28] sm:$0xff] %vm676_vm2, %v1520_v18  ;;  %v1522_v23 = vpack.c.bf16 %v1520_v18, %v1520_v18  ;;  %v1905_v18 = vsel %vm743_vm4, %v4370_v17, 0  ;;  %v5089_v17 = vld [vmem:[%s6422_s10] sm:$0xff]  }
 0xe1e   : > { %v1635_v19 = vpop.xlane.xlu0 %1634 }
 0xe1f   : > { %5128 = vrcp.f32 %v1635_v19 }
 0xe22   : > { %v1525_v20 = vpop.permute.xlu0 %1524 }
 0xe23   : > { %v1530_v21 = vsel %vm743_vm4, %v1525_v20, 0 }
 0xe24   : > { %4723 = vmatpush3.bf16.msra.mxu0 %v1530_v21 }
 0xe25   : > { %4734 = vmatprep.subr.bf16.mxu0 %v5354_v1 }
 0xe26   : > { %v1785_v47 = vpop.permute.xlu0 %1784 }
 0xe27   : > { %4725 = vmatmul.mubr.msk.bf16.vlgmr.msra.gmra.mxu0 %vm676_vm2, %v1522_v23 }
 0xe28   : > { %4735 = vmatpush3.bf16.msra.mxu0 %v1647_v24  ;;  %4736 = vmatprep.mubr.msk.bf16.mxu0 %vm5355_vm0, %v5354_v1 }
 0xe29   : > { %4746 = vmatprep.subr.bf16.mxu0 %v5354_v1 }
 0xe2c   : > { %v5129_v25 = vpop.eup %5128 }
 0xe2d   : > { %v1637_v26 = vmul.f32 %v5129_v25, %v5125_v13 }
 0xe2f   : > { %v1640_v27 = vpack.c.bf16 %v1637_v26, %v1637_v26  ;;  %4362 = vst.msk [vmem:[%s5758_s28 + $0x8] sm:$0xff] %vm676_vm2, %v1637_v26 }
 0xe31   : > { %4737 = vmatmul.mubr.msk.bf16.vlgmr.msra.gmra.mxu0 %vm676_vm2, %v1640_v27 }
 0xe32   : > { %4748 = vmatprep.mubr.msk.bf16.mxu0 %vm5355_vm0, %v5354_v1  ;;  %4747 = vmatpush3.bf16.msra.mxu0 %v1742_v28 }
 0xe33   : > { %4758 = vmatprep.subr.bf16.mxu0 %v5354_v1 }
 0xee7   : > { %v1566_v32 = vpop.f32.mrf.mxu0 }
 0xee8   : > { %v1572_v33 = vpack.c.bf16 %v1566_v32, %v1566_v32 }
 0xee9   : > { %v4726_v34 = vpop.f32.mrf.mxu0 }
 0xeea   : > { %4749 = vmatmul.mubr.msk.bf16.vlgmr.msra.gmra.mxu0 %vm676_vm2, %v1572_v33 }
 0xeeb   : > { %v1569_v35 = vpop.f32.mrf.mxu0  ;;  %4760 = vmatprep.mubr.msk.bf16.mxu0 %vm5355_vm0, %v5354_v1 }
 0xeed   : > { %v4727_v37 = vpop.f32.mrf.mxu0 }
 0xef1   : > { %v1683_v40 = vpop.f32.mrf.mxu0 }
 0xef2   : > { %v1689_v41 = vpack.c.bf16 %v1683_v40, %v1683_v40 }
 0xef3   : > { %v4738_v42 = vpop.f32.mrf.mxu0 }
 0xef4   : > { %4743 = vmatmul.mubr.msk.bf16.vlgmr.msra.gmra.mxu1 %vm676_vm2, %v1689_v41 }
 0xef5   : > { %4753 = vmatpush3.bf16.xpose.msra.mxu1 %v1792_v43  ;;  %v1686_v44 = vpop.f32.mrf.mxu0  ;;  %4754 = vmatprep.mubr.msk.bf16.mxu1 %vm5355_vm0, %v5354_v1 }
 0xef6   : > { %4764 = vmatprep.subr.bf16.mxu1 %v5354_v1 }
 0xef7   : > { %v4739_v45 = vpop.f32.mrf.mxu0 }
 0xefc   : > { %4755 = vmatmul.mubr.msk.bf16.vlgmr.msra.gmra.mxu1 %vm676_vm2, %v1785_v47 }
 0xefd   : > { %4766 = vmatprep.mubr.msk.bf16.mxu1 %vm5355_vm0, %v5354_v1  ;;  %4765 = vmatpush3.bf16.msra.mxu1 %v1905_v18 }
 0xefe   : > { %4776 = vmatprep.subr.bf16.mxu1 %v5354_v1 }
 0xfaa   : > { %v1778_v48 = vpop.f32.mrf.mxu0 }
 0xfac   : > { %v4750_v49 = vpop.f32.mrf.mxu0 }
 0xfae   : > { %v1781_v50 = vpop.f32.mrf.mxu0 }
 0xfb0   : > { %v4751_v51 = vpop.f32.mrf.mxu0 }
 0xfb4   : > { %v1732_v53 = vpop.f32.mrf.mxu1 }
 0xfb5   : > { %v5795_v54 = vadd.f32 %v1778_v48, %v1732_v53 }
 0xfb6   : > { %v4744_v55 = vpop.f32.mrf.mxu1 }
 0xfb8   : > { %v1735_v56 = vpop.f32.mrf.mxu1 }
 0xfba   : > { %v4745_v57 = vpop.f32.mrf.mxu1 }
 0xfbc   : > { %v1828_v58 = vpop.f32.mrf.mxu1 }
 0xfbd   : > { %v1834_v59 = vmul.f32 0.35355338, %v1828_v58 }
 0xfbe   : > { %v4756_v60 = vpop.f32.mrf.mxu1 }
 0xfbf   : > { %v1835_v61 = vsel %vm610_vm5, -1e+09, %v1834_v59 }
 0xfc0   : > { %v1831_v62 = vpop.f32.mrf.mxu1  ;;  %v1836_v6 = vsel %vm676_vm2, %v1835_v61, -inf }
 0xfc1   : > { %1837 = vmax.xlane.f32.xlu1 %v1836_v6 }
 0xfc2   : > { %v4757_v63 = vpop.f32.mrf.mxu1 }
 0xfd2   : > { %1950 = vrot.lane.b32.xlu1 %v5714_v39, %s6486_s27 }
 0xfd6   : > { %1948 = vrot.lane.b32.xlu1 %v5721_v46, %s6486_s27 }
0x104a   : > { %v1838_v0 = vpop.xlane.xlu1 %1837 }
0x104b   : > { %v1839_v2 = vsub.f32 %v1835_v61, %v1838_v0 }
0x104d   : > { %v1840_v4 = vmul.f32 1.442695, %v1839_v2 }
0x104e   : > { %v1951_v12 = vpop.permute.xlu1 %1950 }
0x104f   : > { %5130 = vpow2.f32 %v1840_v4  ;;  %v1956_v14 = vsel %vm676_vm2, %v1951_v12, 0 }
0x1052   : > { %v1949_v16 = vpop.permute.xlu1 %1948 }
0x105c   : > { %v5131_v5 = vpop.eup %5130 }
0x105d   : > { %v1842_v7 = vsel %vm676_vm2, %v5131_v5, 0.0 }
0x105e   : > { %1843 = vadd.xlane.f32.xlu0 %v1842_v7  ;;  %v5084_v7 = vld [vmem:[%s6421_s9 + $0x8] sm:$0xff]  }
0x1074   : > { %1850 = vrot.lane.b32.xlu0 %v5714_v39, %s6487_s30 }
0x10e7   : > { %v1844_v8 = vpop.xlane.xlu0 %1843 }
0x10e8   : > { %5132 = vrcp.f32 %v1844_v8  ;;  %v5086_v8 = vld [vmem:[%s6422_s10 + $0x18] sm:$0xff]  }
0x10eb   : > { %v1851_v9 = vpop.permute.xlu0 %1850 }
0x10ec   : > { %v1856_v10 = vsel %vm743_vm4, %v1851_v9, 0  ;;  %v5087_v9 = vld [vmem:[%s6422_s10 + $0x10] sm:$0xff]  }
0x10ed   : > { %4759 = vmatpush3.bf16.msra.mxu0 %v1856_v10  ;;  %v5088_v10 = vld [vmem:[%s6422_s10 + $0x8] sm:$0xff]  }
0x10ee   : > { %4770 = vmatprep.subr.bf16.mxu0 %v5354_v1 }
0x10f5   : > { %v5133_v46 = vpop.eup %5132 }
0x10f6   : > { %v1846_v11 = vmul.f32 %v5133_v46, %v5131_v5 }
0x10f8   : > { %v1849_v13 = vpack.c.bf16 %v1846_v11, %v1846_v11  ;;  %4368 = vst.msk [vmem:[%s5758_s28 + $0x10] sm:$0xff] %vm676_vm2, %v1846_v11 }
0x10fa   : > { %4761 = vmatmul.mubr.msk.bf16.vlgmr.msra.gmra.mxu0 %vm676_vm2, %v1849_v13 }
0x10fb   : > { %4771 = vmatpush3.bf16.xpose.msra.mxu0 %v1956_v14  ;;  %4772 = vmatprep.mubr.msk.bf16.mxu0 %vm5355_vm0, %v5354_v1 }
0x10fc   : > { %4782 = vmatprep.subr.bf16.mxu0 %v5354_v1 }
0x1102   : > { %4773 = vmatmul.mubr.msk.bf16.vlgmr.msra.gmra.mxu0 %vm676_vm2, %v1949_v16 }
0x1103   : > { %4784 = vmatprep.mubr.msk.bf16.mxu0 %vm5355_vm0, %v5354_v1 }
0x11ba   : > { %v1892_v19 = vpop.f32.mrf.mxu0 }
0x11bb   : > { %v1898_v20 = vpack.c.bf16 %v1892_v19, %v1892_v19 }
0x11bc   : > { %v4762_v21 = vpop.f32.mrf.mxu0 }
0x11bd   : > { %4767 = vmatmul.mubr.msk.bf16.vlgmr.msra.gmra.mxu1 %vm676_vm2, %v1898_v20 }
0x11be   : > { %v1895_v22 = vpop.f32.mrf.mxu0  ;;  %4778 = vmatprep.mubr.msk.bf16.mxu1 %vm5355_vm0, %v5354_v1 }
0x11c0   : > { %v4763_v23 = vpop.f32.mrf.mxu0 }
0x11c2   : > { %v1992_v24 = vpop.f32.mrf.mxu0 }
0x11c3   : > { %v1998_v25 = vmul.f32 0.35355338, %v1992_v24 }
0x11c4   : > { %v4774_v26 = vpop.f32.mrf.mxu0 }
0x11c5   : > { %v1999_v27 = vsel %vm610_vm5, -1e+09, %v1998_v25 }
0x11c6   : > { %v1995_v3 = vpop.f32.mrf.mxu0  ;;  %v2000_v28 = vsel %vm676_vm2, %v1999_v27, -inf }
0x11c7   : > { %2001 = vmax.xlane.f32.xlu0 %v2000_v28 }
0x11c8   : > { %v4775_v29 = vpop.f32.mrf.mxu0 }
0x11dd   : > { %2014 = vrot.lane.b32.xlu0 %v5714_v39, %s6488_s23  ;;  %v4375_v39 = vld [vmem:[%s6420_s8 + $0xc] sm:$0xf] }
0x11de   : > { %v2069_v44 = vsel %vm743_vm4, %v4375_v39, 0 }
0x11df   : > { %4783 = vmatpush3.bf16.msra.mxu0 %v2069_v44 }
0x11e0   : > { %4796 = vmatprep.subr.bf16.mxu0 %v5354_v1 }
0x1250   : > { %v2002_v31 = vpop.xlane.xlu0 %2001 }
0x1251   : > { %v2003_v32 = vsub.f32 %v1999_v27, %v2002_v31 }
0x1253   : > { %v2004_v33 = vmul.f32 1.442695, %v2003_v32 }
0x1254   : > { %v2015_v34 = vpop.permute.xlu0 %2014 }
0x1255   : > { %5134 = vpow2.f32 %v2004_v33  ;;  %v2020_v35 = vsel %vm743_vm4, %v2015_v34, 0 }
0x1256   : > { %4777 = vmatpush3.bf16.msra.mxu1 %v2020_v35  ;;  %v5090_v35 = vld [vmem:[%s6476_s4 + $0x18] sm:$0xff]  }
0x1257   : > { %4788 = vmatprep.subr.bf16.mxu1 %v5354_v1 }
0x1262   : > { %v5135_v37 = vpop.eup %5134 }
0x1263   : > { %v2006_v38 = vsel %vm676_vm2, %v5135_v37, 0.0 }
0x1264   : > { %2007 = vadd.xlane.f32.xlu1 %v2006_v38 }
0x127d   : > { %v1941_v40 = vpop.f32.mrf.mxu1 }
0x127e   : > { %v1947_v41 = vadd.f32 %v1941_v40, %v5795_v54 }
0x127f   : > { %v4768_v42 = vpop.f32.mrf.mxu1 }
0x1281   : > { %v1944_v43 = vpop.f32.mrf.mxu1 }
0x1283   : > { %v4769_v45 = vpop.f32.mrf.mxu1 }
0x12ed   : > { %v2008_v47 = vpop.xlane.xlu1 %2007 }
0x12ee   : > { %5136 = vrcp.f32 %v2008_v47 }
0x12fb   : > { %v5137_v48 = vpop.eup %5136 }
0x12fc   : > { %v2010_v49 = vmul.f32 %v5137_v48, %v5135_v37  ;;  %v5091_v37 = vld [vmem:[%s6476_s4 + $0x10] sm:$0xff]   ;;  %s6095_s4 = scalar_lea.vmem [#allocation9], %s5586_s19  ;;  %s6243_s19 = scalar_lea.hbm %s6425_s13, %s6237_s24 }
0x12fe   : > { %v2013_v50 = vpack.c.bf16 %v2010_v49, %v2010_v49  ;;  %4373 = vst.msk [vmem:[%s5758_s28 + $0x18] sm:$0xff] %vm676_vm2, %v2010_v49 }
0x1300   : > { %4779 = vmatmul.mubr.msk.bf16.vlgmr.msra.gmra.mxu1 %vm676_vm2, %v2013_v50 }
0x1301   : > { %4792 = vmatprep.mubr.msk.bf16.mxu1 %vm5355_vm0, %v5354_v1  ;;  %4789 = vmatpush3.bf16.msra.mxu1 %v5084_v7 }
0x1302   : > { %4790 = vmatprep.subr.bf16.mxu1 %v5354_v1 }
0x13c0   : > { %v2056_v51 = vpop.f32.mrf.mxu1 }
0x13c1   : > { %v2062_v53 = vpack.c.bf16 %v2056_v51, %v2056_v51 }
0x13c2   : > { %v4780_v54 = vpop.f32.mrf.mxu1 }
0x13c3   : > { %4785 = vmatmul.mubr.msk.bf16.vlgmr.msra.gmra.mxu0 %vm676_vm2, %v2062_v53 }
0x13c4   : > { %v2059_v55 = vpop.f32.mrf.mxu1  ;;  %4804 = vmatprep.mubr.msk.bf16.mxu0 %vm5355_vm0, %v5354_v1  ;;  %4797 = vmatpush3.bf16.msra.mxu0 %v5086_v8 }
0x13c5   : > { %4798 = vmatprep.subr.bf16.mxu0 %v5354_v1 }
0x13c6   : > { %v4781_v56 = vpop.f32.mrf.mxu1 }
0x13c8   : > { %4799 = vmatpush3.bf16.msra.mxu0 %v5087_v9 }
0x13c9   : > { %4800 = vmatprep.subr.bf16.mxu0 %v5354_v1 }
0x13cc   : > { %4801 = vmatpush3.bf16.msra.mxu0 %v5088_v10 }
0x13cd   : > { %4802 = vmatprep.subr.bf16.mxu0 %v5354_v1 }
0x13d0   : > { %4803 = vmatpush3.bf16.msra.mxu0 %v5089_v17 }
0x13d1   : > { %4822 = vmatprep.subr.bf16.mxu0 %v5354_v1 }
0x1483   : > { %v2105_v57 = vpop.f32.mrf.mxu0 }
0x1484   : > { %v2111_v58 = vadd.f32 %v2105_v57, %v1947_v41 }
0x1485   : > { %v4786_v59 = vpop.f32.mrf.mxu0 }
0x1486   : > { %v2112_v60 = vadd.f32 %v2111_v58, %v5707_v36  ;;  %v5085_v36 = vld [vmem:[%s6421_s9] sm:$0xff]  }
0x1487   : > { %v2108_v61 = vpop.f32.mrf.mxu0  ;;  %4791 = vmatpush3.bf16.msra.mxu1 %v5085_v36 }
0x1488   : > { %v2113_v62 = vsel %vm628_vm1, %v2112_v60, 0.0  ;;  %4808 = vmatprep.subr.bf16.mxu1 %v5354_v1 }
0x1489   : > { %2114 = vadd.xlane.f32.xlu1 %v2113_v62  ;;  %v4787_v6 = vpop.f32.mrf.mxu0 }
0x1512   : > { %v2115_v63 = vpop.xlane.xlu1 %2114 }
0x1513   : > { %v2116_v0 = vmul.f32 0.03125, %v2115_v63 }
0x1515   : > { %v2117_v2 = vsub.f32 %v2112_v60, %v2116_v0 }
0x1517   : > { %v2118_v4 = vmul.f32 %v2117_v2, %v2117_v2 }
0x1519   : > { %v2119_v5 = vsel %vm628_vm1, %v2118_v4, 0.0 }
0x151a   : > { %2120 = vadd.xlane.f32.xlu1 %v2119_v5 }
0x15a3   : > { %v2121_v46 = vpop.xlane.xlu1 %2120 }
0x15a4   : > { %v2122_v11 = vmul.f32 0.03125, %v2121_v46 }
0x15a6   : > { %v2123_v12 = vadd.f32 1e-05, %v2122_v11 }
0x15a8   : > { %5138 = vrsqrt.f32 %v2123_v12 }
0x15b5   : > { %v5139_v13 = vpop.eup %5138 }
0x15b6   : > { %v2125_v14 = vmul.f32 %v5139_v13, %v2117_v2 }
0x15b8   : > { %v2126_v16 = vpack.c.bf16 %v2125_v14, %v2125_v14 }
0x15ba   : > { %4793 = vmatmul.mubr.msk.bf16.vlgmr.msra.gmra.mxu1 %vm628_vm1, %v2126_v16 }
0x15bb   : > { %4812 = vmatprep.mubr.msk.bf16.mxu1 %vm5355_vm0, %v5354_v1  ;;  %4809 = vmatpush3.bf16.msra.mxu1 %v5090_v35 }
0x15bc   : > { %4810 = vmatprep.subr.bf16.mxu1 %v5354_v1 }
0x15bf   : > { %4811 = vmatpush3.bf16.msra.mxu1 %v5091_v37 }
0x15c0   : > { %4816 = vmatprep.subr.bf16.mxu1 %v5354_v1 }
0x167a   : > { %v2180_v18 = vpop.f32.mrf.mxu1 }
0x167b   : > { %v2186_v19 = vmax.f32 %v2180_v18, 0.0 }
0x167c   : > { %v4794_v20 = vpop.f32.mrf.mxu1 }
0x167d   : > { %v2187_v21 = vpack.c.bf16 %v2186_v19, %v2186_v19 }
0x167e   : > { %v2183_v22 = vpop.f32.mrf.mxu1 }
0x167f   : > { %4805 = vmatmul.mubr.msk.bf16.vlgmr.msra.gmra.mxu0 %vm2220_vm6, %v2187_v21 }
0x1680   : > { %v4795_v23 = vpop.f32.mrf.mxu1  ;;  %4824 = vmatprep.mubr.msk.bf16.mxu0 %vm5355_vm0, %v5354_v1 }
0x173f   : > { %v2258_v24 = vpop.f32.mrf.mxu0 }
0x1740   : > { %v2259_v25 = vadd.f32 %v2258_v24, %v2125_v14 }
0x1741   : > { %v4806_v26 = vpop.f32.mrf.mxu0 }
0x1742   : > { %v2264_v27 = vsel %vm628_vm1, %v2259_v25, 0.0 }
0x1743   : > { %2265 = vadd.xlane.f32.xlu1 %v2264_v27  ;;  %v2261_v3 = vpop.f32.mrf.mxu0 }
0x1745   : > { %v4807_v28 = vpop.f32.mrf.mxu0 }
0x1746   : > { %v4394_v28 = vld [vmem:[%s6417_s5 + $0x10] sm:$0xf] }
0x17cc   : > { %v2266_v29 = vpop.xlane.xlu1 %2265 }
0x17cd   : > { %v2267_v31 = vmul.f32 0.03125, %v2266_v29  ;;  %v2621_v29 = vsel %vm743_vm4, %v4394_v28, 0 }
0x17cf   : > { %v2268_v32 = vsub.f32 %v2259_v25, %v2267_v31  ;;  %v4398_v31 = vld [vmem:[%s6417_s5 + $0x14] sm:$0xf] }
0x17d1   : > { %v2269_v33 = vmul.f32 %v2268_v32, %v2268_v32 }
0x17d3   : > { %v2270_v34 = vsel %vm628_vm1, %v2269_v33, 0.0 }
0x17d4   : > { %2271 = vadd.xlane.f32.xlu1 %v2270_v34 }
0x185d   : > { %v2272_v38 = vpop.xlane.xlu1 %2271 }
0x185e   : > { %v2273_v40 = vmul.f32 0.03125, %v2272_v38 }
0x1860   : > { %v2274_v41 = vadd.f32 1e-05, %v2273_v40 }
0x1862   : > { %5140 = vrsqrt.f32 %v2274_v41 }
0x186f   : > { %v5141_v42 = vpop.eup %5140 }
0x1870   : > { %v5892_v39 = vmul.f32 %v5141_v42, %v2268_v32  ;;  %v2575_v32 = vsel %vm743_vm4, %v4398_v31, 0 }
0x1872   : > { %v2277_v43 = vpack.c.bf16 %v5892_v39, %v5892_v39 }
0x1874   : > { %4813 = vmatmul.mubr.msk.bf16.vlgmr.msra.gmra.mxu1 %vm628_vm1, %v2277_v43 }
0x1875   : > { %4818 = vmatprep.mubr.msk.bf16.mxu1 %vm5355_vm0, %v5354_v1 }
0x1934   : > { %v2332_v44 = vpop.f32.mrf.mxu1 }
0x1935   : > { %v5899_v45 = vpack.c.bf16 %v2332_v44, %v2332_v44 }
0x1936   : > { %v4814_v47 = vpop.f32.mrf.mxu1 }
0x1937   : > { %2456 = vrot.lane.b32.xlu0 %v5899_v45, %s6483_s17  ;;  %2340 = vrot.lane.b32.xlu1 %v5899_v45, %s6485_s2 }
0x1938   : > { %v2335_v48 = vpop.f32.mrf.mxu1 }
0x193a   : > { %v4815_v49 = vpop.f32.mrf.mxu1 }
0x193b   : > { %2454 = vrot.lane.b32.xlu0 %v5899_v45, %s6481_s21 }
0x19a9   : > { %v2341_v50 = vpop.permute.xlu1 %2340  ;;  %v2457_v53 = vpop.permute.xlu0 %2456 }
0x19aa   : > { %v2346_v51 = vsel %vm676_vm2, %v2341_v50, 0  ;;  %v2462_v54 = vsel %vm676_vm2, %v2457_v53, 0 }
0x19ab   : > { %4817 = vmatpush3.bf16.xpose.msra.mxu1 %v2346_v51 }
0x19ac   : > { %4828 = vmatprep.subr.bf16.mxu1 %v5354_v1 }
0x19ad   : > { %v2455_v55 = vpop.permute.xlu0 %2454 }
0x19b2   : > { %4819 = vmatmul.mubr.msk.bf16.vlgmr.msra.gmra.mxu1 %vm676_vm2, %v5899_v45 }
0x19b3   : > { %4829 = vmatpush3.bf16.xpose.msra.mxu1 %v2462_v54  ;;  %4830 = vmatprep.mubr.msk.bf16.mxu1 %vm5355_vm0, %v5354_v1 }
0x19b4   : > { %4840 = vmatprep.subr.bf16.mxu1 %v5354_v1 }
0x19ba   : > { %4831 = vmatmul.mubr.msk.bf16.vlgmr.msra.gmra.mxu1 %vm676_vm2, %v2455_v55 }
0x19bb   : > { %4842 = vmatprep.mubr.msk.bf16.mxu1 %vm5355_vm0, %v5354_v1  ;;  %4841 = vmatpush3.bf16.msra.mxu1 %v2575_v32 }
0x19bc   : > { %4852 = vmatprep.subr.bf16.mxu1 %v5354_v1 }
0x1a72   : > { %v2382_v56 = vpop.f32.mrf.mxu1 }
0x1a73   : > { %v2388_v57 = vmul.f32 0.35355338, %v2382_v56 }
0x1a74   : > { %v4820_v58 = vpop.f32.mrf.mxu1 }
0x1a75   : > { %v2389_v59 = vsel %vm608_vm3, -1e+09, %v2388_v57 }
0x1a76   : > { %v2385_v60 = vpop.f32.mrf.mxu1  ;;  %v2390_v61 = vsel %vm676_vm2, %v2389_v59, -inf }
0x1a77   : > { %2391 = vmax.xlane.f32.xlu0 %v2390_v61 }
0x1a78   : > { %v4821_v62 = vpop.f32.mrf.mxu1 }
0x1a7a   : > { %v2498_v6 = vpop.f32.mrf.mxu1 }
0x1a7b   : > { %v2504_v63 = vmul.f32 0.35355338, %v2498_v6 }
0x1a7c   : > { %v4832_v0 = vpop.f32.mrf.mxu1 }
0x1a7d   : > { %v2505_v2 = vsel %vm608_vm3, -1e+09, %v2504_v63 }
0x1a7e   : > { %v2501_v4 = vpop.f32.mrf.mxu1  ;;  %v2506_v5 = vsel %vm676_vm2, %v2505_v2, -inf }
0x1a7f   : > { %2507 = vmax.xlane.f32.xlu1 %v2506_v5 }
0x1a80   : > { %v4833_v7 = vpop.f32.mrf.mxu1 }
0x1a90   : > { %2520 = vrot.lane.b32.xlu1 %v5899_v45, %s6489_s20  ;;  %s4067_s20 = sshll.u32 %s5937_s3, 4  ;;  %s6309_s20 = int_to_ptr.vmem [resolvable:$true] %s4067_s20 }
0x1a94   : > { %2663 = vrot.lane.b32.xlu1 %v5899_v45, %s6484_s18 }
0x1b00   : > { %v2392_v36 = vpop.xlane.xlu0 %2391 }
0x1b01   : > { %v2393_v8 = vsub.f32 %v2389_v59, %v2392_v36 }
0x1b03   : > { %v2394_v9 = vmul.f32 1.442695, %v2393_v8 }
0x1b05   : > { %5142 = vpow2.f32 %v2394_v9 }
0x1b08   : > { %v2508_v10 = vpop.xlane.xlu1 %2507 }
0x1b09   : > { %v2509_v46 = vsub.f32 %v2505_v2, %v2508_v10 }
0x1b0b   : > { %v2510_v11 = vmul.f32 1.442695, %v2509_v46 }
0x1b0c   : > { %v2521_v23 = vpop.permute.xlu1 %2520 }
0x1b0d   : > { %5144 = vpow2.f32 %v2510_v11  ;;  %v2526_v25 = vsel %vm743_vm4, %v2521_v23, 0 }
0x1b10   : > { %v2664_v49 = vpop.permute.xlu1 %2663 }
0x1b12   : > { %v5143_v12 = vpop.eup %5142 }
0x1b13   : > { %v2396_v13 = vsel %vm676_vm2, %v5143_v12, 0.0 }
0x1b14   : > { %2397 = vadd.xlane.f32.xlu0 %v2396_v13 }
0x1b1a   : > { %v5145_v14 = vpop.eup %5144 }
0x1b1b   : > { %v2512_v16 = vsel %vm676_vm2, %v5145_v14, 0.0 }
0x1b1c   : > { %2513 = vadd.xlane.f32.xlu0 %v2512_v16 }
0x1b32   : > { %2403 = vrot.lane.b32.xlu0 %v5899_v45, %s6490_s1  ;;  %s4083_s1 = sshll.u32 %s5758_s28, 4  ;;  %s5367_s28 = smov [#allocation4]   ;;  %s6232_s1 = int_to_ptr.vmem [resolvable:$true] %s4083_s1 }
0x1b36   : > { %2665 = vrot.lane.b32.xlu0 %v5899_v45, %s6487_s30 }
0x1b9d   : > { %v2398_v17 = vpop.xlane.xlu0 %2397 }
0x1b9e   : > { %5146 = vrcp.f32 %v2398_v17 }
0x1ba5   : > { %v2514_v18 = vpop.xlane.xlu0 %2513 }
0x1ba6   : > { %5148 = vrcp.f32 %v2514_v18  ;;  %v4404_v18 = vld [vmem:[%s6417_s5 + $0x18] sm:$0xf] }
0x1ba9   : > { %v2404_v19 = vpop.permute.xlu0 %2403 }
0x1baa   : > { %v2409_v20 = vsel %vm743_vm4, %v2404_v19, 0  ;;  %v2784_v19 = vsel %vm743_vm4, %v4404_v18, 0 }
0x1bab   : > { %v5147_v21 = vpop.eup %5146  ;;  %4823 = vmatpush3.bf16.msra.mxu0 %v2409_v20 }
0x1bac   : > { %4834 = vmatprep.subr.bf16.mxu0 %v5354_v1  ;;  %v2400_v22 = vmul.f32 %v5147_v21, %v5143_v12 }
0x1bad   : > { %v2666_v40 = vpop.permute.xlu0 %2665 }
0x1bae   : > { %v2402_v24 = vpack.c.bf16 %v2400_v22, %v2400_v22  ;;  %2401 = vst.msk [vmem:[%s5937_s3] sm:$0xff] %vm676_vm2, %v2400_v22  ;;  %v2671_v44 = vsel %vm676_vm2, %v2666_v40, 0 }
0x1bb0   : > { %4825 = vmatmul.mubr.msk.bf16.vlgmr.msra.gmra.mxu0 %vm676_vm2, %v2402_v24 }
0x1bb1   : > { %4835 = vmatpush3.bf16.msra.mxu0 %v2526_v25  ;;  %4836 = vmatprep.mubr.msk.bf16.mxu0 %vm5355_vm0, %v5354_v1 }
0x1bb2   : > { %4846 = vmatprep.subr.bf16.mxu0 %v5354_v1 }
0x1bb3   : > { %v5149_v26 = vpop.eup %5148 }
0x1bb4   : > { %v2516_v27 = vmul.f32 %v5149_v26, %v5145_v14 }
0x1bb6   : > { %v2519_v3 = vpack.c.bf16 %v2516_v27, %v2516_v27  ;;  %4396 = vst.msk [vmem:[%s5937_s3 + $0x8] sm:$0xff] %vm676_vm2, %v2516_v27 }
0x1bb8   : > { %4837 = vmatmul.mubr.msk.bf16.vlgmr.msra.gmra.mxu0 %vm676_vm2, %v2519_v3 }
0x1bb9   : > { %4848 = vmatprep.mubr.msk.bf16.mxu0 %vm5355_vm0, %v5354_v1  ;;  %4847 = vmatpush3.bf16.msra.mxu0 %v2621_v29 }
0x1bba   : > { %4858 = vmatprep.subr.bf16.mxu0 %v5354_v1 }
0x1c70   : > { %v2445_v33 = vpop.f32.mrf.mxu0 }
0x1c71   : > { %v2451_v34 = vpack.c.bf16 %v2445_v33, %v2445_v33 }
0x1c72   : > { %v4826_v35 = vpop.f32.mrf.mxu0 }
0x1c73   : > { %4849 = vmatmul.mubr.msk.bf16.vlgmr.msra.gmra.mxu0 %vm676_vm2, %v2451_v34 }
0x1c74   : > { %v2448_v37 = vpop.f32.mrf.mxu0  ;;  %4860 = vmatprep.mubr.msk.bf16.mxu0 %vm5355_vm0, %v5354_v1 }
0x1c76   : > { %v4827_v38 = vpop.f32.mrf.mxu0 }
0x1c78   : > { %v2562_v41 = vpop.f32.mrf.mxu0 }
0x1c79   : > { %v2568_v42 = vpack.c.bf16 %v2562_v41, %v2562_v41  ;;  %v4409_v41 = vld [vmem:[%s6417_s5 + $0x1c] sm:$0xf] }
0x1c7a   : > { %v4838_v43 = vpop.f32.mrf.mxu0 }
0x1c7b   : > { %4843 = vmatmul.mubr.msk.bf16.vlgmr.msra.gmra.mxu1 %vm676_vm2, %v2568_v42  ;;  %v2948_v43 = vsel %vm743_vm4, %v4409_v41, 0 }
0x1c7c   : > { %4853 = vmatpush3.bf16.xpose.msra.mxu1 %v2671_v44  ;;  %v2565_v47 = vpop.f32.mrf.mxu0  ;;  %4854 = vmatprep.mubr.msk.bf16.mxu1 %vm5355_vm0, %v5354_v1 }
0x1c7d   : > { %4864 = vmatprep.subr.bf16.mxu1 %v5354_v1 }
0x1c7e   : > { %v4839_v48 = vpop.f32.mrf.mxu0 }
0x1c83   : > { %4855 = vmatmul.mubr.msk.bf16.vlgmr.msra.gmra.mxu1 %vm676_vm2, %v2664_v49 }
0x1c84   : > { %4866 = vmatprep.mubr.msk.bf16.mxu1 %vm5355_vm0, %v5354_v1  ;;  %4865 = vmatpush3.bf16.msra.mxu1 %v2784_v19 }
0x1c85   : > { %4876 = vmatprep.subr.bf16.mxu1 %v5354_v1 }
0x1d33   : > { %v2657_v50 = vpop.f32.mrf.mxu0 }
0x1d35   : > { %v4850_v51 = vpop.f32.mrf.mxu0 }
0x1d37   : > { %v2660_v53 = vpop.f32.mrf.mxu0 }
0x1d39   : > { %v4851_v54 = vpop.f32.mrf.mxu0 }
0x1d3b   : > { %v2611_v55 = vpop.f32.mrf.mxu1 }
0x1d3c   : > { %v5972_v56 = vadd.f32 %v2657_v50, %v2611_v55 }
0x1d3d   : > { %v4844_v57 = vpop.f32.mrf.mxu1 }
0x1d3f   : > { %v2614_v58 = vpop.f32.mrf.mxu1 }
0x1d41   : > { %v4845_v59 = vpop.f32.mrf.mxu1 }
0x1d43   : > { %v2707_v60 = vpop.f32.mrf.mxu1 }
0x1d44   : > { %v2713_v61 = vmul.f32 0.35355338, %v2707_v60 }
0x1d45   : > { %v4856_v62 = vpop.f32.mrf.mxu1 }
0x1d46   : > { %v2714_v6 = vsel %vm608_vm3, -1e+09, %v2713_v61 }
0x1d47   : > { %v2710_v63 = vpop.f32.mrf.mxu1  ;;  %v2715_v0 = vsel %vm676_vm2, %v2714_v6, -inf }
0x1d48   : > { %2716 = vmax.xlane.f32.xlu0 %v2715_v0 }
0x1d49   : > { %v4857_v2 = vpop.f32.mrf.mxu1 }
0x1d5e   : > { %2729 = vrot.lane.b32.xlu0 %v5899_v45, %s6491_s22  ;;  %s4051_s22 = sshll.u32 %s5589_s26, 4  ;;  %s6247_s26 = scalar_lea.sflag [#allocation5], %s4009_s16  ;;  %s6229_s22 = int_to_ptr.vmem [resolvable:$true] %s4051_s22 }
0x1d62   : > { %2827 = vrot.lane.b32.xlu0 %v5899_v45, %s6486_s27 }
0x1dd1   : > { %v2717_v4 = vpop.xlane.xlu0 %2716 }
0x1dd2   : > { %v2718_v5 = vsub.f32 %v2714_v6, %v2717_v4 }
0x1dd4   : > { %v2719_v7 = vmul.f32 1.442695, %v2718_v5 }
0x1dd5   : > { %v2730_v36 = vpop.permute.xlu0 %2729 }
0x1dd6   : > { %5150 = vpow2.f32 %v2719_v7  ;;  %v2735_v8 = vsel %vm743_vm4, %v2730_v36, 0  ;;  %v5092_v36 = vld [vmem:[%s6419_s7 + $0x18] sm:$0xff]  }
0x1dd7   : > { %4859 = vmatpush3.bf16.msra.mxu0 %v2735_v8  ;;  %v5094_v8 = vld [vmem:[%s6418_s6 + $0x18] sm:$0xff]  }
0x1dd8   : > { %4870 = vmatprep.subr.bf16.mxu0 %v5354_v1 }
0x1dd9   : > { %v2828_v17 = vpop.permute.xlu0 %2827 }
0x1de3   : > { %v5151_v9 = vpop.eup %5150 }
0x1de4   : > { %v2721_v10 = vsel %vm676_vm2, %v5151_v9, 0.0 }
0x1de5   : > { %2722 = vadd.xlane.f32.xlu1 %v2721_v10 }
0x1df6   : > { %2829 = vrot.lane.b32.xlu1 %v5899_v45, %s6488_s23 }
0x1e6e   : > { %v2723_v46 = vpop.xlane.xlu1 %2722 }
0x1e6f   : > { %5152 = vrcp.f32 %v2723_v46 }
0x1e72   : > { %v2830_v13 = vpop.permute.xlu1 %2829 }
0x1e73   : > { %v2835_v16 = vsel %vm676_vm2, %v2830_v13, 0 }
0x1e7c   : > { %v5153_v11 = vpop.eup %5152 }
0x1e7d   : > { %v2725_v12 = vmul.f32 %v5153_v11, %v5151_v9  ;;  %v5095_v9 = vld [vmem:[%s6418_s6 + $0x10] sm:$0xff]  }
0x1e7f   : > { %v2728_v14 = vpack.c.bf16 %v2725_v12, %v2725_v12  ;;  %4402 = vst.msk [vmem:[%s5937_s3 + $0x10] sm:$0xff] %vm676_vm2, %v2725_v12 }
0x1e81   : > { %4861 = vmatmul.mubr.msk.bf16.vlgmr.msra.gmra.mxu0 %vm676_vm2, %v2728_v14 }
0x1e82   : > { %4871 = vmatpush3.bf16.xpose.msra.mxu0 %v2835_v16  ;;  %4872 = vmatprep.mubr.msk.bf16.mxu0 %vm5355_vm0, %v5354_v1 }
0x1e83   : > { %4882 = vmatprep.subr.bf16.mxu0 %v5354_v1 }
0x1e89   : > { %4873 = vmatmul.mubr.msk.bf16.vlgmr.msra.gmra.mxu0 %vm676_vm2, %v2828_v17 }
0x1e8a   : > { %4884 = vmatprep.mubr.msk.bf16.mxu0 %vm5355_vm0, %v5354_v1  ;;  %4883 = vmatpush3.bf16.msra.mxu0 %v2948_v43 }
0x1e8b   : > { %4896 = vmatprep.subr.bf16.mxu0 %v5354_v1 }
0x1f41   : > { %v2771_v20 = vpop.f32.mrf.mxu0 }
0x1f42   : > { %v2777_v21 = vpack.c.bf16 %v2771_v20, %v2771_v20 }
0x1f43   : > { %v4862_v22 = vpop.f32.mrf.mxu0 }
0x1f44   : > { %4867 = vmatmul.mubr.msk.bf16.vlgmr.msra.gmra.mxu1 %vm676_vm2, %v2777_v21 }
0x1f45   : > { %v2774_v23 = vpop.f32.mrf.mxu0  ;;  %4878 = vmatprep.mubr.msk.bf16.mxu1 %vm5355_vm0, %v5354_v1 }
0x1f47   : > { %v4863_v24 = vpop.f32.mrf.mxu0 }
0x1f49   : > { %v2871_v25 = vpop.f32.mrf.mxu0 }
0x1f4a   : > { %v2877_v26 = vmul.f32 0.35355338, %v2871_v25 }
0x1f4b   : > { %v4874_v27 = vpop.f32.mrf.mxu0 }
0x1f4c   : > { %v2878_v3 = vsel %vm608_vm3, -1e+09, %v2877_v26 }
0x1f4d   : > { %v2874_v28 = vpop.f32.mrf.mxu0  ;;  %v2879_v29 = vsel %vm676_vm2, %v2878_v3, -inf }
0x1f4e   : > { %2880 = vmax.xlane.f32.xlu1 %v2879_v29 }
0x1f4f   : > { %v4875_v31 = vpop.f32.mrf.mxu0 }
0x1fd7   : > { %v2881_v32 = vpop.xlane.xlu1 %2880 }
0x1fd8   : > { %v2882_v33 = vsub.f32 %v2878_v3, %v2881_v32 }
0x1fda   : > { %v2883_v34 = vmul.f32 1.442695, %v2882_v33 }
0x1fdc   : > { %5154 = vpow2.f32 %v2883_v34 }
0x1fe9   : > { %v5155_v35 = vpop.eup %5154 }
0x1fea   : > { %v2885_v37 = vsel %vm676_vm2, %v5155_v35, 0.0 }
0x1feb   : > { %2886 = vadd.xlane.f32.xlu0 %v2885_v37 }
0x2001   : > { %2893 = vrot.lane.b32.xlu0 %v5899_v45, %s6492_s12 }
0x2004   : > { %v2820_v38 = vpop.f32.mrf.mxu1 }
0x2005   : > { %v2826_v15 = vadd.f32 %v2820_v38, %v5972_v56 }
0x2006   : > { %v4868_v40 = vpop.f32.mrf.mxu1 }
0x2008   : > { %v2823_v42 = vpop.f32.mrf.mxu1 }
0x200a   : > { %v4869_v44 = vpop.f32.mrf.mxu1 }
0x2074   : > { %v2887_v47 = vpop.xlane.xlu0 %2886 }
0x2075   : > { %5156 = vrcp.f32 %v2887_v47 }
0x2078   : > { %v2894_v48 = vpop.permute.xlu0 %2893 }
0x2079   : > { %v2899_v45 = vsel %vm743_vm4, %v2894_v48, 0 }
0x207a   : > { %4877 = vmatpush3.bf16.msra.mxu1 %v2899_v45 }
0x207b   : > { %4888 = vmatprep.subr.bf16.mxu1 %v5354_v1 }
0x2082   : > { %v5157_v49 = vpop.eup %5156 }
0x2083   : > { %v2889_v50 = vmul.f32 %v5157_v49, %v5155_v35 }
0x2085   : > { %v2892_v51 = vpack.c.bf16 %v2889_v50, %v2889_v50  ;;  %4407 = vst.msk [vmem:[%s5937_s3 + $0x18] sm:$0xff] %vm676_vm2, %v2889_v50 }
0x2087   : > { %4879 = vmatmul.mubr.msk.bf16.vlgmr.msra.gmra.mxu1 %vm676_vm2, %v2892_v51 }
0x2088   : > { %4892 = vmatprep.mubr.msk.bf16.mxu1 %vm5355_vm0, %v5354_v1  ;;  %4889 = vmatpush3.bf16.msra.mxu1 %v5094_v8 }
0x2089   : > { %4890 = vmatprep.subr.bf16.mxu1 %v5354_v1 }
0x208c   : > { %4891 = vmatpush3.bf16.msra.mxu1 %v5095_v9 }
0x208d   : > { %4904 = vmatprep.subr.bf16.mxu1 %v5354_v1 }
0x2147   : > { %v2935_v53 = vpop.f32.mrf.mxu1 }
0x2148   : > { %v2941_v54 = vpack.c.bf16 %v2935_v53, %v2935_v53 }
0x2149   : > { %v4880_v55 = vpop.f32.mrf.mxu1 }
0x214a   : > { %4885 = vmatmul.mubr.msk.bf16.vlgmr.msra.gmra.mxu0 %vm676_vm2, %v2941_v54 }
0x214b   : > { %v2938_v56 = vpop.f32.mrf.mxu1  ;;  %4900 = vmatprep.mubr.msk.bf16.mxu0 %vm5355_vm0, %v5354_v1  ;;  %4897 = vmatpush3.bf16.msra.mxu0 %v5092_v36 }
0x214c   : > { %4898 = vmatprep.subr.bf16.mxu0 %v5354_v1 }
0x214d   : > { %v4881_v57 = vpop.f32.mrf.mxu1 }
0x220a   : > { %v2984_v58 = vpop.f32.mrf.mxu0 }
0x220b   : > { %v2990_v59 = vadd.f32 %v2984_v58, %v2826_v15 }
0x220c   : > { %v4886_v60 = vpop.f32.mrf.mxu0 }
0x220d   : > { %v2991_v61 = vadd.f32 %v2990_v59, %v5892_v39  ;;  %v5093_v39 = vld [vmem:[%s6419_s7 + $0x10] sm:$0xff]  }
0x220e   : > { %v2987_v62 = vpop.f32.mrf.mxu0  ;;  %4899 = vmatpush3.bf16.msra.mxu0 %v5093_v39 }
0x220f   : > { %v2992_v6 = vsel %vm628_vm1, %v2991_v61, 0.0  ;;  %4910 = vmatprep.subr.bf16.mxu0 %v5354_v1  ;;  %v4431_v62 = vld [vmem:[%s6420_s8 + $0x14] sm:$0xf] }
0x2210   : > { %2993 = vadd.xlane.f32.xlu1 %v2992_v6  ;;  %v4887_v63 = vpop.f32.mrf.mxu0  ;;  %v3360_v6 = vsel %vm743_vm4, %v4431_v62, 0 }
0x2211   : > { %4901 = vmatmul.mubr.msk.bf16.vlgmr.msra.gmra.mxu0 %vm628_vm1, %v5695_v30 }
0x2212   : > { %4912 = vmatprep.mubr.msk.bf16.mxu0 %vm5355_vm0, %v5354_v1 }
0x2299   : > { %v2994_v0 = vpop.xlane.xlu1 %2993 }
0x229a   : > { %v2995_v2 = vmul.f32 0.03125, %v2994_v0 }
0x229c   : > { %v2996_v4 = vsub.f32 %v2991_v61, %v2995_v2 }
0x229e   : > { %v2997_v5 = vmul.f32 %v2996_v4, %v2996_v4 }
0x22a0   : > { %v2998_v7 = vsel %vm628_vm1, %v2997_v5, 0.0  ;;  %v4427_v5 = vld [vmem:[%s6420_s8 + $0x10] sm:$0xf] }
0x22a1   : > { %2999 = vadd.xlane.f32.xlu1 %v2998_v7  ;;  %v3406_v39 = vsel %vm743_vm4, %v4427_v5, 0 }
0x22d1   : > { %v3117_v30 = vpop.f32.mrf.mxu0 }
0x22d2   : > { %v6056_v16 = vpack.c.bf16 %v3117_v30, %v3117_v30 }
0x22d3   : > { %v4902_v17 = vpop.f32.mrf.mxu0 }
0x22d4   : > { %3241 = vrot.lane.b32.xlu1 %v6056_v16, %s6481_s21  ;;  %v3129_v18 = vsel %vm676_vm2, %v6056_v16, 0 }
0x22d5   : > { %v3120_v19 = vpop.f32.mrf.mxu0 }
0x22d7   : > { %v4903_v20 = vpop.f32.mrf.mxu0 }
0x232a   : > { %v3000_v10 = vpop.xlane.xlu1 %2999 }
0x232b   : > { %v3001_v46 = vmul.f32 0.03125, %v3000_v10 }
0x232d   : > { %v3002_v11 = vadd.f32 1e-05, %v3001_v46 }
0x232f   : > { %5158 = vrsqrt.f32 %v3002_v11 }
0x233c   : > { %v5159_v12 = vpop.eup %5158 }
0x233d   : > { %v6049_v13 = vmul.f32 %v5159_v12, %v2996_v4 }
0x233f   : > { %v3005_v14 = vpack.c.bf16 %v6049_v13, %v6049_v13 }
0x2341   : > { %4893 = vmatmul.mubr.msk.bf16.vlgmr.msra.gmra.mxu1 %vm628_vm1, %v3005_v14 }
0x2342   : > { %4906 = vmatprep.mubr.msk.bf16.mxu1 %vm5355_vm0, %v5354_v1  ;;  %4905 = vmatpush3.bf16.xpose.msra.mxu1 %v3129_v18 }
0x2343   : > { %4916 = vmatprep.subr.bf16.mxu1 %v5354_v1 }
0x2346   : > { %v3242_v21 = vpop.permute.xlu1 %3241 }
0x2347   : > { %v3247_v24 = vsel %vm676_vm2, %v3242_v21, 0 }
0x2401   : > { %v3060_v22 = vpop.f32.mrf.mxu1 }
0x2402   : > { %v6063_v23 = vpack.c.bf16 %v3060_v22, %v3060_v22 }
0x2403   : > { %v4894_v25 = vpop.f32.mrf.mxu1 }
0x2404   : > { %3239 = vrot.lane.b32.xlu0 %v6063_v23, %s6481_s21  ;;  %4907 = vmatmul.mubr.msk.bf16.vlgmr.msra.gmra.mxu1 %vm676_vm2, %v6063_v23 }
0x2405   : > { %v3063_v26 = vpop.f32.mrf.mxu1  ;;  %4917 = vmatpush3.bf16.xpose.msra.mxu1 %v3247_v24  ;;  %4918 = vmatprep.mubr.msk.bf16.mxu1 %vm5355_vm0, %v5354_v1 }
0x2406   : > { %4928 = vmatprep.subr.bf16.mxu1 %v5354_v1 }
0x2407   : > { %v4895_v27 = vpop.f32.mrf.mxu1 }
0x2476   : > { %v3240_v3 = vpop.permute.xlu0 %3239 }
0x2477   : > { %4919 = vmatmul.mubr.msk.bf16.vlgmr.msra.gmra.mxu1 %vm676_vm2, %v3240_v3 }
0x2478   : > { %4930 = vmatprep.mubr.msk.bf16.mxu1 %vm5355_vm0, %v5354_v1  ;;  %4929 = vmatpush3.bf16.msra.mxu1 %v3360_v6 }
0x2479   : > { %4940 = vmatprep.subr.bf16.mxu1 %v5354_v1 }
0x24c4   : > { %v3165_v28 = vpop.f32.mrf.mxu1 }
0x24c5   : > { %v3171_v29 = vmul.f32 0.35355338, %v3165_v28 }
0x24c6   : > { %v4908_v31 = vpop.f32.mrf.mxu1 }
0x24c7   : > { %v3172_v32 = vsel %vm610_vm5, -1e+09, %v3171_v29 }
0x24c8   : > { %v3168_v33 = vpop.f32.mrf.mxu1  ;;  %v3173_v34 = vsel %vm676_vm2, %v3172_v32, -inf }
0x24c9   : > { %3174 = vmax.xlane.f32.xlu0 %v3173_v34 }
0x24ca   : > { %v4909_v35 = vpop.f32.mrf.mxu1 }
0x2537   : > { %v3283_v37 = vpop.f32.mrf.mxu1 }
0x2538   : > { %v3289_v38 = vmul.f32 0.35355338, %v3283_v37 }
0x2539   : > { %v4920_v15 = vpop.f32.mrf.mxu1 }
0x253a   : > { %v3290_v40 = vsel %vm610_vm5, -1e+09, %v3289_v38 }
0x253b   : > { %v3286_v41 = vpop.f32.mrf.mxu1  ;;  %v3291_v42 = vsel %vm676_vm2, %v3290_v40, -inf }
0x253c   : > { %3292 = vmax.xlane.f32.xlu1 %v3291_v42 }
0x253d   : > { %v4921_v43 = vpop.f32.mrf.mxu1 }
0x254d   : > { %3187 = vrot.lane.b32.xlu1 %v6056_v16, %s6485_s2  ;;  %s5184_s2 = sshll.u32 %s5367_s28, 4  ;;  %s5185_s2 = int_to_ptr.vmem [resolvable:$false] %s5184_s2 }
0x254e   : > { %p5187_p0 = scmp.lt.s32.totalorder %s6229_s22, %s5185_s2 }
0x2551   : > { %3450 = vrot.lane.b32.xlu1 %v6056_v16, %s6484_s18 }
0x2552   : > { %v3175_v44 = vpop.xlane.xlu0 %3174 }
0x2553   : > { %v3176_v47 = vsub.f32 %v3172_v32, %v3175_v44 }
0x2555   : > { %v3177_v48 = vmul.f32 1.442695, %v3176_v47  ;;  %3448 = vrot.lane.b32.xlu1 %v6063_v23, %s6484_s18 }
0x2557   : > { %5160 = vpow2.f32 %v3177_v48 }
0x2564   : > { %v5161_v45 = vpop.eup %5160 }
0x2565   : > { %v3179_v49 = vsel %vm676_vm2, %v5161_v45, 0.0 }
0x2566   : > { %3180 = vadd.xlane.f32.xlu0 %v3179_v49 }
0x25c5   : > { %v3293_v50 = vpop.xlane.xlu1 %3292 }
0x25c6   : > { %v3294_v51 = vsub.f32 %v3290_v40, %v3293_v50 }
0x25c8   : > { %v3295_v53 = vmul.f32 1.442695, %v3294_v51 }
0x25c9   : > { %v3188_v54 = vpop.permute.xlu1 %3187 }
0x25ca   : > { %5162 = vpow2.f32 %v3295_v53  ;;  %v3193_v55 = vsel %vm743_vm4, %v3188_v54, 0  ;;  %v4437_v54 = vld [vmem:[%s6420_s8 + $0x18] sm:$0xf] }
0x25cb   : > { %4911 = vmatpush3.bf16.msra.mxu0 %v3193_v55  ;;  %v3569_v55 = vsel %vm743_vm4, %v4437_v54, 0 }
0x25cc   : > { %4922 = vmatprep.subr.bf16.mxu0 %v5354_v1 }
0x25cd   : > { %v3451_v12 = vpop.permute.xlu1 %3450 }
0x25ce   : > { %v3456_v18 = vsel %vm676_vm2, %v3451_v12, 0 }
0x25d1   : > { %v3449_v21 = vpop.permute.xlu1 %3448 }
0x25d7   : > { %v5163_v56 = vpop.eup %5162 }
0x25d8   : > { %v3297_v57 = vsel %vm676_vm2, %v5163_v56, 0.0 }
0x25d9   : > { %3298 = vadd.xlane.f32.xlu0 %v3297_v57 }
0x25ef   : > { %v3181_v58 = vpop.xlane.xlu0 %3180  ;;  %3305 = vrot.lane.b32.xlu0 %v6056_v16, %s6483_s17  ;;  %s5180_s17 = scalar_lea.vmem %s6229_s22, 512 }
0x25f0   : > { %5164 = vrcp.f32 %v3181_v58  ;;  %p5181_p11 = scmp.ne.s32.totalorder %s6229_s22, %s5180_s17 }
0x25f2   : > { %p5182_p12 = pnand %p5181_p11, %p5499_p5 }
0x25f4   : > { %p5183_p13 = pneg %p5182_p12 }
0x25fd   : > { %v5165_v59 = vpop.eup %5164 }
0x25fe   : > { %v3183_v60 = vmul.f32 %v5165_v59, %v5161_v45 }
0x2600   : > { %v3185_v61 = vpack.c.bf16 %v3183_v60, %v3183_v60  ;;  %3184 = vst.msk [vmem:[%s6095_s4] sm:$0xff] %vm676_vm2, %v3183_v60 }
0x2602   : > { %4913 = vmatmul.mubr.msk.bf16.vlgmr.msra.gmra.mxu0 %vm676_vm2, %v3185_v61 }
0x2603   : > { %4924 = vmatprep.mubr.msk.bf16.mxu0 %vm5355_vm0, %v5354_v1 }
0x2662   : > { %v3299_v63 = vpop.xlane.xlu0 %3298 }
0x2663   : > { %5166 = vrcp.f32 %v3299_v63 }
0x2666   : > { %v3306_v0 = vpop.permute.xlu0 %3305 }
0x2667   : > { %v3311_v2 = vsel %vm743_vm4, %v3306_v0, 0 }
0x2668   : > { %4923 = vmatpush3.bf16.msra.mxu0 %v3311_v2 }
0x2669   : > { %4934 = vmatprep.subr.bf16.mxu0 %v5354_v1 }
0x2670   : > { %v5167_v4 = vpop.eup %5166 }
0x2671   : > { %v3301_v7 = vmul.f32 %v5167_v4, %v5163_v56 }
0x2673   : > { %v3304_v36 = vpack.c.bf16 %v3301_v7, %v3301_v7  ;;  %4429 = vst.msk [vmem:[%s6095_s4 + $0x8] sm:$0xff] %vm676_vm2, %v3301_v7 }
0x2675   : > { %4925 = vmatmul.mubr.msk.bf16.vlgmr.msra.gmra.mxu0 %vm676_vm2, %v3304_v36 }
0x2676   : > { %4935 = vmatpush3.bf16.msra.mxu0 %v3406_v39  ;;  %4936 = vmatprep.mubr.msk.bf16.mxu0 %vm5355_vm0, %v5354_v1 }
0x2677   : > { %4946 = vmatprep.subr.bf16.mxu0 %v5354_v1 }
0x26c2   : > { %v3229_v8 = vpop.f32.mrf.mxu0 }
0x26c3   : > { %v3235_v9 = vpack.c.bf16 %v3229_v8, %v3229_v8 }
0x26c4   : > { %v4914_v10 = vpop.f32.mrf.mxu0 }
0x26c5   : > { %4937 = vmatmul.mubr.msk.bf16.vlgmr.msra.gmra.mxu0 %vm676_vm2, %v3235_v9 }
0x26c6   : > { %v3232_v46 = vpop.f32.mrf.mxu0  ;;  %4948 = vmatprep.mubr.msk.bf16.mxu0 %vm5355_vm0, %v5354_v1 }
0x26c8   : > { %v4915_v11 = vpop.f32.mrf.mxu0 }
0x26c9   : > { %v4442_v11 = vld [vmem:[%s6420_s8 + $0x1c] sm:$0xf] }
0x2735   : > { %v3347_v14 = vpop.f32.mrf.mxu0 }
0x2736   : > { %v3353_v30 = vpack.c.bf16 %v3347_v14, %v3347_v14  ;;  %v3733_v14 = vsel %vm743_vm4, %v4442_v11, 0 }
0x2737   : > { %v4926_v17 = vpop.f32.mrf.mxu0 }
0x2738   : > { %4931 = vmatmul.mubr.msk.bf16.vlgmr.msra.gmra.mxu1 %vm676_vm2, %v3353_v30 }
0x2739   : > { %4941 = vmatpush3.bf16.xpose.msra.mxu1 %v3456_v18  ;;  %v3350_v19 = vpop.f32.mrf.mxu0  ;;  %4942 = vmatprep.mubr.msk.bf16.mxu1 %vm5355_vm0, %v5354_v1 }
0x273a   : > { %4952 = vmatprep.subr.bf16.mxu1 %v5354_v1 }
0x273b   : > { %v4927_v20 = vpop.f32.mrf.mxu0 }
0x2740   : > { %4943 = vmatmul.mubr.msk.bf16.vlgmr.msra.gmra.mxu1 %vm676_vm2, %v3449_v21 }
0x2741   : > { %4954 = vmatprep.mubr.msk.bf16.mxu1 %vm5355_vm0, %v5354_v1  ;;  %4953 = vmatpush3.bf16.msra.mxu1 %v3569_v55 }
0x2742   : > { %4964 = vmatprep.subr.bf16.mxu1 %v5354_v1 }
0x2785   : > { %v6130_v22 = vpop.f32.mrf.mxu0 }
0x2787   : > { %v4938_v24 = vpop.f32.mrf.mxu0 }
0x2789   : > { %v3445_v25 = vpop.f32.mrf.mxu0 }
0x278b   : > { %v4939_v26 = vpop.f32.mrf.mxu0 }
0x27f8   : > { %v6132_v27 = vpop.f32.mrf.mxu1 }
0x27f9   : > { %v3443_v52 = vadd.f32 %v6130_v22, %v6132_v27 }
0x27fa   : > { %v4932_v3 = vpop.f32.mrf.mxu1 }
0x27fc   : > { %v3399_v28 = vpop.f32.mrf.mxu1 }
0x27fe   : > { %v4933_v29 = vpop.f32.mrf.mxu1 }
0x2800   : > { %v3492_v31 = vpop.f32.mrf.mxu1 }
0x2801   : > { %v3498_v32 = vmul.f32 0.35355338, %v3492_v31 }
0x2802   : > { %v4944_v33 = vpop.f32.mrf.mxu1 }
0x2803   : > { %v3499_v34 = vsel %vm610_vm5, -1e+09, %v3498_v32 }
0x2804   : > { %v3495_v35 = vpop.f32.mrf.mxu1  ;;  %v3500_v37 = vsel %vm676_vm2, %v3499_v34, -inf }
0x2805   : > { %3501 = vmax.xlane.f32.xlu0 %v3500_v37 }
0x2806   : > { %v4945_v38 = vpop.f32.mrf.mxu1 }
0x281b   : > { %3514 = vrot.lane.b32.xlu0 %v6056_v16, %s6487_s30 }
0x281f   : > { %3612 = vrot.lane.b32.xlu0 %v6063_v23, %s6486_s27 }
0x288e   : > { %v3502_v15 = vpop.xlane.xlu0 %3501 }
0x288f   : > { %v3503_v40 = vsub.f32 %v3499_v34, %v3502_v15 }
0x2891   : > { %v3504_v41 = vmul.f32 1.442695, %v3503_v40 }
0x2892   : > { %v3515_v42 = vpop.permute.xlu0 %3514 }
0x2893   : > { %5168 = vpow2.f32 %v3504_v41  ;;  %v3520_v43 = vsel %vm743_vm4, %v3515_v42, 0  ;;  %v5096_v41 = vld [vmem:[%s6421_s9 + $0x18] sm:$0xff]  }
0x2894   : > { %4947 = vmatpush3.bf16.msra.mxu0 %v3520_v43  ;;  %v5098_v42 = vld [vmem:[%s6422_s10 + $0x38] sm:$0xff]   ;;  %v5099_v43 = vld [vmem:[%s6422_s10 + $0x30] sm:$0xff]  }
0x2895   : > { %4958 = vmatprep.subr.bf16.mxu0 %v5354_v1 }
0x2896   : > { %v3613_v53 = vpop.permute.xlu0 %3612 }
0x28a0   : > { %v5169_v44 = vpop.eup %5168 }
0x28a1   : > { %v3506_v47 = vsel %vm676_vm2, %v5169_v44, 0.0 }
0x28a2   : > { %3507 = vadd.xlane.f32.xlu1 %v3506_v47 }
0x28b3   : > { %3614 = vrot.lane.b32.xlu1 %v6056_v16, %s6486_s27  ;;  %s5186_s27 = scalar_lea.vmem %s5185_s2, 1024 }
0x28b4   : > { %p5188_p1 = scmp.lt.s32.totalorder %s5186_s27, %s5180_s17 }
0x28b6   : > { %p5189_p2 = por %p5188_p1, %p5187_p0 }
0x28b8   : > { %p5190_p3 = pnand %p5189_p2, %p5183_p13 }
0x292b   : > { %v3508_v48 = vpop.xlane.xlu1 %3507 }
0x292c   : > { %5170 = vrcp.f32 %v3508_v48 }
0x292f   : > { %v3615_v49 = vpop.permute.xlu1 %3614 }
0x2930   : > { %v3620_v51 = vsel %vm676_vm2, %v3615_v49, 0 }
0x2939   : > { %v5171_v23 = vpop.eup %5170 }
0x293a   : > { %v3510_v45 = vmul.f32 %v5171_v23, %v5169_v44  ;;  %v5100_v44 = vld [vmem:[%s6422_s10 + $0x28] sm:$0xff]  }
0x293c   : > { %v3513_v50 = vpack.c.bf16 %v3510_v45, %v3510_v45  ;;  %4435 = vst.msk [vmem:[%s6095_s4 + $0x10] sm:$0xff] %vm676_vm2, %v3510_v45 }
0x293e   : > { %4949 = vmatmul.mubr.msk.bf16.vlgmr.msra.gmra.mxu0 %vm676_vm2, %v3513_v50 }
0x293f   : > { %4959 = vmatpush3.bf16.xpose.msra.mxu0 %v3620_v51  ;;  %4960 = vmatprep.mubr.msk.bf16.mxu0 %vm5355_vm0, %v5354_v1  ;;  %v5101_v51 = vld [vmem:[%s6422_s10 + $0x20] sm:$0xff]  }
0x2940   : > { %4970 = vmatprep.subr.bf16.mxu0 %v5354_v1 }
0x2946   : > { %4961 = vmatmul.mubr.msk.bf16.vlgmr.msra.gmra.mxu0 %vm676_vm2, %v3613_v53 }
0x2947   : > { %4972 = vmatprep.mubr.msk.bf16.mxu0 %vm5355_vm0, %v5354_v1  ;;  %4971 = vmatpush3.bf16.msra.mxu0 %v3733_v14 }
0x2948   : > { %4984 = vmatprep.subr.bf16.mxu0 %v5354_v1 }
0x29fe   : > { %v3556_v56 = vpop.f32.mrf.mxu0 }
0x29ff   : > { %v3562_v57 = vpack.c.bf16 %v3556_v56, %v3556_v56 }
0x2a00   : > { %v4950_v58 = vpop.f32.mrf.mxu0 }
0x2a01   : > { %4955 = vmatmul.mubr.msk.bf16.vlgmr.msra.gmra.mxu1 %vm676_vm2, %v3562_v57 }
0x2a02   : > { %v3559_v59 = vpop.f32.mrf.mxu0  ;;  %4966 = vmatprep.mubr.msk.bf16.mxu1 %vm5355_vm0, %v5354_v1 }
0x2a04   : > { %v4951_v60 = vpop.f32.mrf.mxu0 }
0x2a06   : > { %v3656_v61 = vpop.f32.mrf.mxu0 }
0x2a07   : > { %v3662_v62 = vmul.f32 0.35355338, %v3656_v61 }
0x2a08   : > { %v4962_v6 = vpop.f32.mrf.mxu0 }
0x2a09   : > { %v3663_v63 = vsel %vm610_vm5, -1e+09, %v3662_v62 }
0x2a0a   : > { %v3659_v0 = vpop.f32.mrf.mxu0  ;;  %v3664_v2 = vsel %vm676_vm2, %v3663_v63, -inf }
0x2a0b   : > { %3665 = vmax.xlane.f32.xlu1 %v3664_v2 }
0x2a0c   : > { %v4963_v4 = vpop.f32.mrf.mxu0 }
0x2a94   : > { %v3666_v5 = vpop.xlane.xlu1 %3665 }
0x2a95   : > { %v3667_v7 = vsub.f32 %v3663_v63, %v3666_v5 }
0x2a97   : > { %v3668_v36 = vmul.f32 1.442695, %v3667_v7 }
0x2a99   : > { %5172 = vpow2.f32 %v3668_v36  ;;  %v5102_v36 = vld [vmem:[%s6423_s11 + $0x8] sm:$0xff]  }
0x2aa6   : > { %v5173_v39 = vpop.eup %5172 }
0x2aa7   : > { %v3670_v8 = vsel %vm676_vm2, %v5173_v39, 0.0 }
0x2aa8   : > { %3671 = vadd.xlane.f32.xlu0 %v3670_v8 }
0x2abe   : > { %3678 = vrot.lane.b32.xlu0 %v6056_v16, %s6488_s23 }
0x2ac1   : > { %v3605_v9 = vpop.f32.mrf.mxu1 }
0x2ac2   : > { %v3611_v10 = vadd.f32 %v3605_v9, %v3443_v52 }
0x2ac3   : > { %v4956_v46 = vpop.f32.mrf.mxu1 }
0x2ac5   : > { %v3608_v12 = vpop.f32.mrf.mxu1 }
0x2ac7   : > { %v4957_v30 = vpop.f32.mrf.mxu1 }
0x2b31   : > { %v3672_v17 = vpop.xlane.xlu0 %3671 }
0x2b32   : > { %5174 = vrcp.f32 %v3672_v17 }
0x2b35   : > { %v3679_v16 = vpop.permute.xlu0 %3678 }
0x2b36   : > { %v3684_v18 = vsel %vm743_vm4, %v3679_v16, 0 }
0x2b37   : > { %4965 = vmatpush3.bf16.msra.mxu1 %v3684_v18 }
0x2b38   : > { %4976 = vmatprep.subr.bf16.mxu1 %v5354_v1 }
0x2b3f   : > { %v5175_v19 = vpop.eup %5174 }
0x2b40   : > { %v3674_v20 = vmul.f32 %v5175_v19, %v5173_v39  ;;  %v5103_v39 = vld [vmem:[%s6423_s11] sm:$0xff]  }
0x2b42   : > { %v3677_v21 = vpack.c.bf16 %v3674_v20, %v3674_v20  ;;  %4440 = vst.msk [vmem:[%s6095_s4 + $0x18] sm:$0xff] %vm676_vm2, %v3674_v20 }
0x2b44   : > { %4967 = vmatmul.mubr.msk.bf16.vlgmr.msra.gmra.mxu1 %vm676_vm2, %v3677_v21 }
0x2b45   : > { %4980 = vmatprep.mubr.msk.bf16.mxu1 %vm5355_vm0, %v5354_v1  ;;  %4977 = vmatpush3.bf16.msra.mxu1 %v5096_v41 }
0x2b46   : > { %4978 = vmatprep.subr.bf16.mxu1 %v5354_v1 }
0x2c04   : > { %v3720_v22 = vpop.f32.mrf.mxu1 }
0x2c05   : > { %v3726_v24 = vpack.c.bf16 %v3720_v22, %v3720_v22 }
0x2c06   : > { %v4968_v25 = vpop.f32.mrf.mxu1 }
0x2c07   : > { %4973 = vmatmul.mubr.msk.bf16.vlgmr.msra.gmra.mxu0 %vm676_vm2, %v3726_v24 }
0x2c08   : > { %v3723_v26 = vpop.f32.mrf.mxu1  ;;  %4992 = vmatprep.mubr.msk.bf16.mxu0 %vm5355_vm0, %v5354_v1  ;;  %4985 = vmatpush3.bf16.msra.mxu0 %v5098_v42 }
0x2c09   : > { %4986 = vmatprep.subr.bf16.mxu0 %v5354_v1 }
0x2c0a   : > { %v4969_v27 = vpop.f32.mrf.mxu1 }
0x2c0c   : > { %4987 = vmatpush3.bf16.msra.mxu0 %v5099_v43 }
0x2c0d   : > { %4988 = vmatprep.subr.bf16.mxu0 %v5354_v1 }
0x2c10   : > { %4989 = vmatpush3.bf16.msra.mxu0 %v5100_v44 }
0x2c11   : > { %4990 = vmatprep.subr.bf16.mxu0 %v5354_v1 }
0x2c14   : > { %4991 = vmatpush3.bf16.msra.mxu0 %v5101_v51 }
0x2cc7   : > { %v3769_v3 = vpop.f32.mrf.mxu0 }
0x2cc8   : > { %v3775_v28 = vadd.f32 %v3769_v3, %v3611_v10 }
0x2cc9   : > { %v4974_v29 = vpop.f32.mrf.mxu0 }
0x2cca   : > { %v3776_v31 = vadd.f32 %v3775_v28, %v6049_v13  ;;  %v5097_v13 = vld [vmem:[%s6421_s9 + $0x10] sm:$0xff]  }
0x2ccb   : > { %v3772_v32 = vpop.f32.mrf.mxu0  ;;  %4979 = vmatpush3.bf16.msra.mxu1 %v5097_v13 }
0x2ccc   : > { %v3777_v33 = vsel %vm628_vm1, %v3776_v31, 0.0  ;;  %4996 = vmatprep.subr.bf16.mxu1 %v5354_v1 }
0x2ccd   : > { %3778 = vadd.xlane.f32.xlu1 %v3777_v33  ;;  %v4975_v34 = vpop.f32.mrf.mxu0 }
0x2d56   : > { %v3779_v35 = vpop.xlane.xlu1 %3778 }
0x2d57   : > { %v3780_v37 = vmul.f32 0.03125, %v3779_v35 }
0x2d59   : > { %v3781_v38 = vsub.f32 %v3776_v31, %v3780_v37 }
0x2d5b   : > { %v3782_v15 = vmul.f32 %v3781_v38, %v3781_v38 }
0x2d5d   : > { %v3783_v40 = vsel %vm628_vm1, %v3782_v15, 0.0 }
0x2d5e   : > { %3784 = vadd.xlane.f32.xlu1 %v3783_v40 }
0x2de7   : > { %v3785_v47 = vpop.xlane.xlu1 %3784 }
0x2de8   : > { %v3786_v48 = vmul.f32 0.03125, %v3785_v47 }
0x2dea   : > { %v3787_v23 = vadd.f32 1e-05, %v3786_v48 }
0x2dec   : > { %5176 = vrsqrt.f32 %v3787_v23 }
0x2df9   : > { %v5177_v45 = vpop.eup %5176 }
0x2dfa   : > { %v3789_v49 = vmul.f32 %v5177_v45, %v3781_v38 }
0x2dfc   : > { %v3790_v50 = vpack.c.bf16 %v3789_v49, %v3789_v49 }
0x2dfe   : > { %4981 = vmatmul.mubr.msk.bf16.vlgmr.msra.gmra.mxu1 %vm628_vm1, %v3790_v50 }
0x2dff   : > { %5000 = vmatprep.mubr.msk.bf16.mxu1 %vm5355_vm0, %v5354_v1  ;;  %4997 = vmatpush3.bf16.msra.mxu1 %v5102_v36 }
0x2e00   : > { %4998 = vmatprep.subr.bf16.mxu1 %v5354_v1 }
0x2e03   : > { %4999 = vmatpush3.bf16.msra.mxu1 %v5103_v39 }
0x2ebe   : > { %v3845_v53 = vpop.f32.mrf.mxu1 }
0x2ebf   : > { %v3851_v54 = vmax.f32 %v3845_v53, 0.0 }
0x2ec0   : > { %v4982_v55 = vpop.f32.mrf.mxu1 }
0x2ec1   : > { %v3852_v56 = vpack.c.bf16 %v3851_v54, %v3851_v54 }
0x2ec2   : > { %v3848_v57 = vpop.f32.mrf.mxu1 }
0x2ec3   : > { %4993 = vmatmul.mubr.msk.bf16.vlgmr.msra.gmra.mxu0 %vm2220_vm6, %v3852_v56 }
0x2ec4   : > { %v4983_v58 = vpop.f32.mrf.mxu1 }
0x2f83   : > { %v3923_v59 = vpop.f32.mrf.mxu0 }
0x2f84   : > { %v3924_v60 = vadd.f32 %v3923_v59, %v3789_v49 }
0x2f85   : > { %v4994_v61 = vpop.f32.mrf.mxu0 }
0x2f86   : > { %v3929_v62 = vsel %vm628_vm1, %v3924_v60, 0.0 }
0x2f87   : > { %3930 = vadd.xlane.f32.xlu1 %v3929_v62  ;;  %v3926_v6 = vpop.f32.mrf.mxu0 }
0x2f89   : > { %v4995_v63 = vpop.f32.mrf.mxu0 }
0x3010   : > { %v3931_v0 = vpop.xlane.xlu1 %3930 }
0x3011   : > { %v3932_v2 = vmul.f32 0.03125, %v3931_v0 }
0x3013   : > { %v3933_v4 = vsub.f32 %v3924_v60, %v3932_v2 }
0x3015   : > { %v3934_v5 = vmul.f32 %v3933_v4, %v3933_v4 }
0x3017   : > { %v3935_v7 = vsel %vm628_vm1, %v3934_v5, 0.0 }
0x3018   : > { %3936 = vadd.xlane.f32.xlu1 %v3935_v7 }
0x30a1   : > { %v3937_v8 = vpop.xlane.xlu1 %3936 }
0x30a2   : > { %v3938_v52 = vmul.f32 0.03125, %v3937_v8 }
0x30a4   : > { %v3939_v9 = vadd.f32 1e-05, %v3938_v52 }
0x30a6   : > { %5178 = vrsqrt.f32 %v3939_v9 }
0x30b3   : > { %v5179_v10 = vpop.eup %5178 }
0x30b4   : > { %v3941_v46 = vmul.f32 %v5179_v10, %v3933_v4 }
0x30b6   : > { %v3942_v11 = vpack.c.bf16 %v3941_v46, %v3941_v46 }
0x30b8   : > { %5001 = vmatmul.mubr.msk.bf16.vlgmr.msra.gmra.mxu1 %vm628_vm1, %v3942_v11 }
0x30b9   : > { %5193 = shalt.err (!%p5190_p3)
}
0x30ba   : > { %s5194_s30 = scalar_lea.hbm %s6243_s19, 512  ;;  %s5198_s21 = scalar_lea.hbm %s6425_s13, 1024 }
0x30bb   : > { %p5195_p4 = scmp.ne.s32.totalorder %s6243_s19, %s5194_s30  ;;  %p5199_p9 = scmp.lt.s32.totalorder %s6243_s19, %s6425_s13 }
0x30bc   : > { %p5200_p10 = scmp.lt.s32.totalorder %s5198_s21, %s5194_s30 }
0x30bd   : > { %p5196_p7 = pnand %p5195_p4, %p5499_p5 }
0x30be   : > { %p5201_p11 = por %p5200_p10, %p5199_p9 }
0x30bf   : > { %p5197_p8 = pneg %p5196_p7 }
0x30c1   : > { %p5202_p12 = pnand %p5201_p11, %p5197_p8 }
0x30c3   : > { %5205 = shalt.err (!%p5202_p12)
}
0x30c4   : > { %s5368_s17 = smov 128   ;;  %s5369_s2 = smov 8  }
0x30c5   : > { %5005 = dma.vmem_to_hbm [thread:$0]  (%p5499_p5), %s6229_s22, 512, %s6243_s19, %s6247_s26, %s5368_s17, %s5368_s17, %s5369_s2  }
0x30c6   : > { %s6277_s29 = scalar_lea.hbm %s6427_s15, %s6237_s24  ;;  %s6281_s23 = scalar_lea.sflag [#allocation8], %s4009_s16 }
0x30c7   : > { %s5206_s21 = scalar_lea.vmem %s6232_s1, 512  ;;  %s5370_s18 = smov [#allocation7]  }
0x30c8   : > { %p5207_p13 = scmp.ne.s32.totalorder %s6232_s1, %s5206_s21  ;;  %s5210_s28 = sshll.u32 %s5370_s18, 4  ;;  %s5211_s28 = int_to_ptr.vmem [resolvable:$false] %s5210_s28 }
0x30c9   : > { %s5212_s12 = scalar_lea.vmem %s5211_s28, 1024  ;;  %p5213_p2 = scmp.lt.s32.totalorder %s6232_s1, %s5211_s28 }
0x30ca   : > { %p5208_p0 = pnand %p5207_p13, %p5499_p5  ;;  %p5214_p3 = scmp.lt.s32.totalorder %s5212_s12, %s5206_s21 }
0x30cc   : > { %p5209_p1 = pneg %p5208_p0  ;;  %p5215_p4 = por %p5214_p3, %p5213_p2 }
0x30ce   : > { %p5216_p7 = pnand %p5215_p4, %p5209_p1 }
0x30d0   : > { %5219 = shalt.err (!%p5216_p7)
}
0x30d1   : > { %s5220_s22 = scalar_lea.hbm %s6277_s29, 512  ;;  %s5224_s27 = scalar_lea.hbm %s6427_s15, 1024 }
0x30d2   : > { %p5221_p8 = scmp.ne.s32.totalorder %s6277_s29, %s5220_s22  ;;  %p5225_p11 = scmp.lt.s32.totalorder %s6277_s29, %s6427_s15 }
0x30d3   : > { %p5226_p12 = scmp.lt.s32.totalorder %s5224_s27, %s5220_s22 }
0x30d4   : > { %p5222_p9 = pnand %p5221_p8, %p5499_p5 }
0x30d5   : > { %p5227_p13 = por %p5226_p12, %p5225_p11 }
0x30d6   : > { %p5223_p10 = pneg %p5222_p9 }
0x30d8   : > { %p5228_p0 = pnand %p5227_p13, %p5223_p10 }
0x30da   : > { %5231 = shalt.err (!%p5228_p0)
}
0x30db   : > { %5007 = dma.vmem_to_hbm [thread:$0]  (%p5499_p5), %s6232_s1, 512, %s6277_s29, %s6281_s23, %s5368_s17, %s5368_s17, %s5369_s2  }
0x30dc   : > { %s6493_s12 = sshll.u32 %s6095_s4, 4  ;;  %s4066_s22 = scalar_lea.hbm %s6426_s14, %s6237_s24  ;;  %s6313_s12 = int_to_ptr.vmem [resolvable:$true] %s6493_s12 }
0x30dd   : > { %s5232_s16 = scalar_lea.vmem %s6309_s20, 512  ;;  %s5371_s19 = smov [#allocation6]  }
0x30de   : > { %p5233_p1 = scmp.ne.s32.totalorder %s6309_s20, %s5232_s16  ;;  %s5236_s1 = sshll.u32 %s5371_s19, 4  ;;  %s5237_s1 = int_to_ptr.vmem [resolvable:$false] %s5236_s1 }
0x30df   : > { %s5238_s3 = scalar_lea.vmem %s5237_s1, 1024  ;;  %p5239_p4 = scmp.lt.s32.totalorder %s6309_s20, %s5237_s1 }
0x30e0   : > { %p5234_p2 = pnand %p5233_p1, %p5499_p5  ;;  %p5240_p7 = scmp.lt.s32.totalorder %s5238_s3, %s5232_s16 }
0x30e2   : > { %p5235_p3 = pneg %p5234_p2  ;;  %p5241_p8 = por %p5240_p7, %p5239_p4 }
0x30e4   : > { %p5242_p9 = pnand %p5241_p8, %p5235_p3 }
0x30e6   : > { %5245 = shalt.err (!%p5242_p9)
}
0x30e7   : > { %s5246_s4 = scalar_lea.hbm %s4066_s22, 512  ;;  %s5250_s30 = scalar_lea.hbm %s6426_s14, 1024 }
0x30e8   : > { %p5247_p10 = scmp.ne.s32.totalorder %s4066_s22, %s5246_s4  ;;  %p5251_p13 = scmp.lt.s32.totalorder %s4066_s22, %s6426_s14 }
0x30e9   : > { %p5252_p0 = scmp.lt.s32.totalorder %s5250_s30, %s5246_s4 }
0x30ea   : > { %p5248_p11 = pnand %p5247_p10, %p5499_p5 }
0x30eb   : > { %p5253_p1 = por %p5252_p0, %p5251_p13 }
0x30ec   : > { %p5249_p12 = pneg %p5248_p11 }
0x30ee   : > { %p5254_p2 = pnand %p5253_p1, %p5249_p12 }
0x30f0   : > { %5257 = shalt.err (!%p5254_p2)
}
0x30f1   : > { %5006 = dma.vmem_to_hbm [thread:$0]  (%p5499_p5), %s6309_s20, 512, %s4066_s22, %s6247_s26, %s5368_s17, %s5368_s17, %s5369_s2  }
0x30f2   : > { %s6494_s19 = sld [smem:[#allocation27_spill]]  ;;  %s5258_s3 = scalar_lea.vmem %s6313_s12, 512 }
0x30f3   : > { %p5259_p3 = scmp.ne.s32.totalorder %s6313_s12, %s5258_s3  ;;  %s5372_s4 = smov [#allocation9]  }
0x30f4   : > { %s5262_s29 = sshll.u32 %s5372_s4, 4  ;;  %s5263_s29 = int_to_ptr.vmem [resolvable:$false] %s5262_s29 }
0x30f5   : > { %p5260_p4 = pnand %p5259_p3, %p5499_p5  ;;  %s5264_s27 = scalar_lea.vmem %s5263_s29, 1024 }
0x30f6   : > { %p5265_p8 = scmp.lt.s32.totalorder %s6313_s12, %s5263_s29  ;;  %p5266_p9 = scmp.lt.s32.totalorder %s5264_s27, %s5258_s3 }
0x30f7   : > { %p5261_p7 = pneg %p5260_p4 }
0x30f8   : > { %s4098_s1 = scalar_lea.hbm %s6494_s19, %s6237_s24  ;;  %p5267_p10 = por %p5266_p9, %p5265_p8 }
0x30fa   : > { %p5268_p11 = pnand %p5267_p10, %p5261_p7 }
0x30fc   : > { %5271 = shalt.err (!%p5268_p11)
}
0x30fd   : > { %s5272_s30 = scalar_lea.hbm %s4098_s1, 512  ;;  %s5276_s26 = scalar_lea.hbm %s6494_s19, 1024 }
0x30fe   : > { %p5273_p12 = scmp.ne.s32.totalorder %s4098_s1, %s5272_s30  ;;  %p5277_p1 = scmp.lt.s32.totalorder %s4098_s1, %s6494_s19 }
0x30ff   : > { %p5278_p2 = scmp.lt.s32.totalorder %s5276_s26, %s5272_s30 }
0x3100   : > { %p5274_p13 = pnand %p5273_p12, %p5499_p5 }
0x3101   : > { %p5279_p3 = por %p5278_p2, %p5277_p1 }
0x3102   : > { %p5275_p0 = pneg %p5274_p13 }
0x3104   : > { %p5280_p4 = pnand %p5279_p3, %p5275_p0 }
0x3106   : > { %5283 = shalt.err (!%p5280_p4)
}
0x3107   : > { %s6495_s21 = sld [smem:[#allocation20_spill]]  ;;  %s4472_s16 = sshll.u32 %s5480_s25, 7  ;;  %vm4002_vm7 = vcmask 130048  }
0x3108   : > { %5008 = dma.vmem_to_hbm [thread:$0]  (%p5499_p5), %s6313_s12, 512, %s4098_s1, %s6281_s23, %s5368_s17, %s5368_s17, %s5369_s2  }
0x3109   : > { %s6496_s30 = sld [smem:[#allocation26_spill]]  ;;  %s5373_s25 = smov [#allocation2]  }
0x310a   : > { %s5288_s2 = sshll.u32 %s5373_s25, 4  ;;  %s5289_s2 = int_to_ptr.vmem [resolvable:$false] %s5288_s2 }
0x310b   : > { %s5290_s23 = scalar_lea.vmem %s5289_s2, 256 }
0x310d   : > { %s4323_s28 = sshll.u32 %s6495_s21, 3  ;;  %s4005_s24 = scalar_lea.sflag [#allocation3], %s6495_s21 }
0x310e   : > { %s558_s3 = scalar_lea.vmem [#allocation2], %s4323_s28 }
0x310f   : > { %s4038_s4 = sshll.u32 %s558_s3, 4  ;;  %s6368_s20 = scalar_lea.hbm %s6496_s30, %s4472_s16  ;;  %s6370_s4 = int_to_ptr.vmem [resolvable:$true] %s4038_s4 }
0x3110   : > { %s5284_s17 = scalar_lea.vmem %s6370_s4, 128  ;;  %p5291_p10 = scmp.lt.s32.totalorder %s6370_s4, %s5289_s2 }
0x3111   : > { %p5285_p7 = scmp.ne.s32.totalorder %s6370_s4, %s5284_s17  ;;  %p5292_p11 = scmp.lt.s32.totalorder %s5290_s23, %s5284_s17 }
0x3113   : > { %p5286_p8 = pnand %p5285_p7, %p5499_p5  ;;  %p5293_p12 = por %p5292_p11, %p5291_p10 }
0x3115   : > { %p5287_p9 = pneg %p5286_p8 }
0x3117   : > { %p5294_p13 = pnand %p5293_p12, %p5287_p9 }
0x3178   : > { %v3996_v1 = vpop.f32.mrf.mxu1 }
0x3179   : > { %4003 = vst.msk [vmem:[%s558_s3] sm:$0xff] %vm4002_vm7, %v3996_v1 }
0x317a   : > { %v5002_v12 = vpop.f32.mrf.mxu1 }
0x317b   : > { %5297 = shalt.err (!%p5294_p13)
}
0x317c   : > { %s5298_s12 = scalar_lea.hbm %s6368_s20, 128  ;;  %s5302_s22 = scalar_lea.hbm %s6496_s30, 256 }
0x317d   : > { %p5299_p0 = scmp.ne.s32.totalorder %s6368_s20, %s5298_s12  ;;  %p5303_p3 = scmp.lt.s32.totalorder %s6368_s20, %s6496_s30 }
0x317e   : > { %p5304_p4 = scmp.lt.s32.totalorder %s5302_s22, %s5298_s12 }
0x317f   : > { %p5300_p1 = pnand %p5299_p0, %p5499_p5 }
0x3180   : > { %p5305_p7 = por %p5304_p4, %p5303_p3 }
0x3181   : > { %p5301_p2 = pneg %p5300_p1 }
0x3183   : > { %p5306_p8 = pnand %p5305_p7, %p5301_p2 }
0x3185   : > { %5309 = shalt.err (!%p5306_p8)
}
0x3186   : > { %5004 = dma.vmem_to_hbm [thread:$0]  (%p5499_p5), %s6370_s4, 128, %s6368_s20, %s4005_s24   ;;  %v3999_v14 = vpop.f32.mrf.mxu1 }
0x3188   : > { %v5003_v30 = vpop.f32.mrf.mxu1 }
0x3189 PF: > { %s6497_s28 = sld [smem:[#allocation16_spill]] }
0x318a   : > { %s6498_s16 = sld [smem:[#allocation13_spill]] }
0x318f   : > { %p5030_p9 = scmp.ge.s32.totalorder %s6497_s28, 2 }
0x3190   : > { %s4114_s29 = sand.u32 1, %s6498_s16  }
0x3191   : > { %p5015_p10 = pnand %p5030_p9, %p5503_p6  ;;  %s4115_s27 = scalar_lea.sflag [#allocation3], %s4114_s29 }
0x3193   : > { %p5016_p11 = pneg %p5015_p10 }
0x3195   : > { %5327 = dma.done.wait (%p5016_p11), %s4115_s27, 128  }
0x3196   : > { %5329 = vsyncadd (%p5016_p11), %s4115_s27, 4294967168  ;;  %s6500_s17 = sadd.s32 4294967294, %s6497_s28  }
0x3197   : > { %s4123_s0 = sand.u32 1, %s6500_s17  }
0x3198   : > { %s4124_s25 = scalar_lea.sflag [#allocation5], %s4123_s0 }
0x3199   : > { %5331 = dma.done.wait (%p5016_p11), %s4124_s25, 1024  }
0x319a   : > { %5333 = vsyncadd (%p5016_p11), %s4124_s25, 4294966272  ;;  %s4142_s4 = scalar_lea.sflag [#allocation8], %s4123_s0 }
0x319b   : > { %5335 = dma.done.wait (%p5016_p11), %s4142_s4, 1024  }
0x319c   : > { %5337 = vsyncadd (%p5016_p11), %s4142_s4, 4294966272  ;;  %s6501_s24 = sld [smem:[#allocation17_spill]] }
0x319d   : > { %s6502_s21 = sld [smem:[#allocation14_spill]] }
0x319e   : > { %s6503_s22 = sld [smem:[#allocation15_spill]] }
0x319f   : > { %s6504_s23 = sld [smem:[#allocation18_spill]] }
0x31a2   : > { %p33_p5 = scmp.ge.s32.totalorder %s6501_s24, 4  }
0x31a4   :  { %35 = sbr.rel (!%p33_p5) target bundleno = 15 (0xf), region = 207 }
0x31a9   :  { %4156 = vsyncpa [#allocation3], 1 }
0x31aa   :  { %4158 = vsyncpa [#allocation3 + $0x1], 1 }
0x31ab   :  { %4159 = vsyncpa [#allocation5], 1 }
0x31ac   :  { %4161 = vsyncpa [#allocation5 + $0x1], 1 }
0x31ad   :  { %4162 = vsyncpa [#allocation8], 1 }
0x31ae   :  { %4164 = vsyncpa [#allocation8 + $0x1], 1 }

</bundles_post_ra>
